<compile_context>
chip_gen: v7x
topology: tpu7x:2x2x1
jax: 0.10.0
libtpu: 0.0.40
codegen_flags: <defaults>
</compile_context>

<pallas_src>
import numpy as np
import jax
import jax.numpy as jnp
from jax.experimental import pallas as pl
from jax.experimental.pallas import tpu as pltpu

# ---------------- configuration (small, self-consistent shapes) ----------------
NUM_CLASSES = 4          # n (forced by the reference's hard-coded 16 / range(4))
C_OUT = 128              # head in_channels (reference: 512 for swin-base; scaled down)
C_IN = 2 * C_OUT         # backbone num_features (out_channels = in_channels // 2)
N_TOK = 16               # number of backbone tokens
BATCH = 2
BN_EPS = 1e-5
NN = NUM_CLASSES * NUM_CLASSES


# ---------------- static edge-build helper ----------------
def build_edge_select(n):
    # Reproduces the reference's `f_e[m, i*j].fill(dist(f_v[i], f_v[j]))` loop:
    # for each edge row r, the LAST (i, j) pair (in loop order) with i*j == r wins.
    # Row r then holds ||f_v[i] - f_v[j]|| = ||M[r] @ f_v|| with M[r] = e_i - e_j.
    # Zero rows of M (i == j writes, or never-written rows) give distance 0, matching
    # the reference exactly.
    last = {}
    for i in range(n):
        for j in range(n):
            last[i * j] = (i, j)
    M = np.zeros((n * n, n), np.float32)
    for r, (i, j) in last.items():
        M[r, i] += 1.0
        M[r, j] -= 1.0
    return M


# ---------------- fused Pallas kernel (whole batch in one grid step) ----------------
def _mefarg_kernel(x_ref, gw_ref, cw_ref, emap_ref, wx_ref, we_ref,
                   fcw_ref, fcb_ref, sc_ref, efcw_ref, efcb_ref,
                   cl_ref, cle_ref, fv_ref, fe_ref, fu_ref):
    n, C, B = NUM_CLASSES, C_OUT, BATCH
    bf16, f32 = jnp.bfloat16, jnp.float32

    # ---- global LinearBlock: relu(BN(fc(x))), BN folded into gw ----
    x_tok = x_ref[...]                                                     # (B*N_TOK, C_IN)
    xg = jnp.maximum(
        jnp.dot(x_tok.astype(bf16), gw_ref[...],
                preferred_element_type=f32), 0.0)                          # (B*N_TOK, C)

    # ---- 4 class LinearBlocks as ONE wide matmul (BN folded) -> f_u ----
    fu = jnp.maximum(
        jnp.dot(xg.astype(bf16), cw_ref[...],
                preferred_element_type=f32), 0.0)                          # (B*N_TOK, n*C)
    fu_ref[...] = fu                                                       # lane-dense store

    # ---- f_v: per (batch, class) mean over tokens, rows in (b, k) order ----
    rows = []
    for b in range(B):
        cm = jnp.mean(fu[b * N_TOK:(b + 1) * N_TOK], axis=0, keepdims=True)   # (1, n*C)
        for k in range(n):
            rows.append(cm[:, k * C:(k + 1) * C])
    f_v = jnp.concatenate(rows, axis=0)                                    # (B*n, C)

    # ---- edge features: pairwise distances via the block-diagonal last-writer map ----
    diff = jnp.dot(emap_ref[...], f_v, preferred_element_type=f32)         # (B*NN, C)
    dist = jnp.sqrt(jnp.sum(diff * diff, axis=-1, keepdims=True))          # (B*NN, 1)
    edge = jnp.broadcast_to(dist, (B * NN, C))                             # (B*NN, C)

    # ---- selection / segment ops (replace start/end einsums, VPU/XLU only) ----
    def rep_i(v):   # node (B*n, C) -> edge (B*NN, C), value indexed by source node i
        return jnp.broadcast_to(v[:, None, :], (B * n, n, C)).reshape(B * NN, C)

    def rep_j(v):   # node (B*n, C) -> edge (B*NN, C), value indexed by target node j
        v3 = v.reshape(B, n, C)
        return jnp.broadcast_to(v3[:, None, :, :], (B, n, n, C)).reshape(B * NN, C)

    def seg_sum(v):  # edge (B*NN, C) -> node (B*n, C): sum over target j
        return jnp.sum(v.reshape(B * n, n, C), axis=1)

    # ---- two GNN layers (BN scales folded into A/B/E and U/V weights) ----
    x = f_v
    inv_n = 1.0 / float(n)
    for li in range(2):
        xw = jnp.dot(x.astype(bf16), wx_ref[li], preferred_element_type=f32)   # (B*n, 4C)
        ax, bx = xw[:, 0:C], xw[:, C:2 * C]
        ux, vx = xw[:, 2 * C:3 * C], xw[:, 3 * C:4 * C]
        e_lin = jnp.dot(edge.astype(bf16), we_ref[li],
                        preferred_element_type=f32)                            # (B*NN, C)

        edge = edge + jnp.maximum(rep_i(ax) + rep_j(bx) + e_lin, 0.0)  # edge += relu(bn(...))

        # softmax over j inside each (batch, source-node) group; sigmoid outputs are
        # bounded, so exp / group-sum is the exact softmax (no shift needed).
        p = jnp.exp(jax.nn.sigmoid(edge))
        e_soft = p / rep_i(seg_sum(p))                                         # exact division

        aggv = seg_sum(e_soft * rep_j(vx))                                     # (B*n, C)
        x = jnp.maximum(x + ux + aggv * inv_n, 0.0)        # relu(res + bn(U(x) + agg/n))

    fv_ref[...] = x
    fe_ref[...] = edge

    # ---- head fc: flatten(f_v) @ W as ONE K = n*C contraction ----
    slabs = [jnp.concatenate([x[b * n + k:b * n + k + 1, :] for b in range(B)], axis=0)
             for k in range(n)]                                            # n x (B, C)
    x2 = jnp.concatenate(slabs, axis=1)                                    # (B, n*C) flatten
    cl_flat = (jnp.dot(x2.astype(bf16), fcw_ref[...],
                       preferred_element_type=f32) + fcb_ref[...])         # (B, 7C)
    cl_rows = jnp.concatenate([cl_flat[:, m * C:(m + 1) * C] for m in range(7)],
                              axis=0)                                      # (7*B, C), (m,b) order

    # ---- similarity head: relu + L2-normalised sc, L2-normalised cl, lane dot ----
    scm = jnp.maximum(sc_ref[...], 0.0)
    scm = scm * jax.lax.rsqrt(
        jnp.maximum(jnp.sum(scm * scm, axis=-1, keepdims=True), 1e-24))
    scm = jnp.broadcast_to(scm[:, None, :], (7, B, C)).reshape(7 * B, C)   # (m,b) order
    cln = cl_rows * jax.lax.rsqrt(
        jnp.maximum(jnp.sum(cl_rows * cl_rows, axis=-1, keepdims=True), 1e-24))
    cl_val = jnp.sum(cln * scm, axis=-1, keepdims=True)                    # (7*B, 1)
    cl_ref[...] = jnp.broadcast_to(cl_val, (7 * B, C))                     # lane-dense store

    # ---- edge classifier (weight zero-padded to 128 lanes -> unmasked full-width store) ----
    cle_ref[...] = (jnp.dot(edge, efcw_ref[...], preferred_element_type=f32)
                    + efcb_ref[...])                                       # (B*NN, 128)


def mefarg_forward(x_backbone, params):
    # TODO(synk): swin_transformer_base backbone not implemented; x_backbone is the
    # backbone's token feature output (B, N_TOK, C_IN).
    B, N, Cin = x_backbone.shape
    n, C = NUM_CLASSES, C_OUT
    x2d = x_backbone.reshape(B * N, Cin)          # rows in (b, t) order

    def full_spec(shape):
        nd = len(shape)
        return pl.BlockSpec(shape, lambda i, _nd=nd: (0,) * _nd)

    outs = pl.pallas_call(
        _mefarg_kernel,
        grid=(1,),
        in_specs=[
            full_spec((B * N, Cin)),              # x tokens (batch folded into sublanes)
            full_spec((Cin, C)),                  # global linear (BN folded, bf16)
            full_spec((C, n * C)),                # 4 class linears concat (bf16)
            full_spec((B * NN, B * n)),           # block-diag edge-build selection
            full_spec((2, C, 4 * C)),             # GNN [A|B|U|V] per layer (bf16)
            full_spec((2, C, C)),                 # GNN E per layer (bf16)
            full_spec((n * C, 7 * C)),            # fc weight (bf16)
            full_spec((1, 7 * C)),                # fc bias
            full_spec((7, C)),                    # sc
            full_spec((C, 128)),                  # edge_fc weight (lane-padded)
            full_spec((1, 128)),                  # edge_fc bias  (lane-padded)
        ],
        out_specs=(
            full_spec((7 * B, C)),                # cl (lane-broadcast, (m,b) rows)
            full_spec((B * NN, 128)),             # cl_edge (lane-padded)
            full_spec((B * n, C)),                # f_v
            full_spec((B * NN, C)),               # f_e
            full_spec((B * N, n * C)),            # f_u (token-major, classes on lanes)
        ),
        out_shape=(
            jax.ShapeDtypeStruct((7 * B, C), jnp.float32),
            jax.ShapeDtypeStruct((B * NN, 128), jnp.float32),
            jax.ShapeDtypeStruct((B * n, C), jnp.float32),
            jax.ShapeDtypeStruct((B * NN, C), jnp.float32),
            jax.ShapeDtypeStruct((B * N, n * C), jnp.float32),
        ),
        compiler_params=pltpu.CompilerParams(
            dimension_semantics=("arbitrary",)),
    )(x2d, params["gw"], params["cw"], params["emap"],
      params["gnn_wx"], params["gnn_we"],
      params["fc_w"], params["fc_b"], params["sc"],
      params["efc_w"], params["efc_b"])

    cl_rows, cle, fv2, fe2, fu2 = outs
    # wrapper-side layout plumbing only (reshapes / slices / one tiny transpose)
    cl = cl_rows[:, 0].reshape(7, B).T                      # (B, 7)
    cl_edge = cle.reshape(B, NN, 128)[:, :, :3]             # (B, n*n, 3)
    f_v = fv2.reshape(B, n, C)
    f_e = fe2.reshape(B, NN, C)
    f_u = fu2.reshape(B, N, n, C).transpose(0, 2, 1, 3)     # (B, n, N_TOK, C)
    return cl, cl_edge, f_v, f_e, f_u


# ---------------- deterministic parameter construction ----------------
def init_params(key):
    keys = iter(jax.random.split(key, 24))
    bn_scale = float(1.0 / np.sqrt(1.0 + BN_EPS))   # eval-mode BN with init stats

    def nrm(shape, std):
        return std * jax.random.normal(next(keys), shape, jnp.float32)

    def xavier(shape):
        fan_out, fan_in = shape
        a = float(np.sqrt(6.0 / (fan_in + fan_out)))
        return jax.random.uniform(next(keys), shape, jnp.float32, -a, a)

    p = {}

    # global LinearBlock: Linear(C_IN, C_OUT) + BatchNorm1d (folded) + ReLU
    gw = nrm((C_OUT, C_IN), float(np.sqrt(2.0 / C_OUT)))        # torch (out, in) layout
    p["gw"] = (jnp.transpose(gw) * bn_scale).astype(jnp.bfloat16)       # (C_IN, C)

    # Head.class_linears: 4 LinearBlocks concatenated along the output dim
    cls_w = [nrm((C_OUT, C_OUT), float(np.sqrt(2.0 / C_OUT))) for _ in range(NUM_CLASSES)]
    p["cw"] = jnp.concatenate(
        [jnp.transpose(w) * bn_scale for w in cls_w], axis=1).astype(jnp.bfloat16)

    # GNN linears; bne scale folded into A,B,E and bnv scale into U,V (exact at init,
    # where the per-node BatchNorm affine is the uniform scale 1/sqrt(1+eps), shift 0).
    gnn_std = float(np.sqrt(2.0 / C_OUT))
    wx, we = [], []
    for _ in range(2):
        A = nrm((C_OUT, C_OUT), gnn_std)
        Bm = nrm((C_OUT, C_OUT), gnn_std)
        E = nrm((C_OUT, C_OUT), gnn_std)
        U = nrm((C_OUT, C_OUT), gnn_std)
        V = nrm((C_OUT, C_OUT), gnn_std)
        wx.append(jnp.concatenate(
            [jnp.transpose(A) * bn_scale, jnp.transpose(Bm) * bn_scale,
             jnp.transpose(U) * bn_scale, jnp.transpose(V) * bn_scale], axis=1))
        we.append(jnp.transpose(E) * bn_scale)
    p["gnn_wx"] = jnp.stack(wx, axis=0).astype(jnp.bfloat16)    # (2, C, 4C)
    p["gnn_we"] = jnp.stack(we, axis=0).astype(jnp.bfloat16)    # (2, C, C)

    # block-diagonal (per batch element) edge-build selection map
    emap = build_edge_select(NUM_CLASSES)                       # (n*n, n)
    p["emap"] = jnp.asarray(np.kron(np.eye(BATCH, dtype=np.float32), emap))  # (B*NN, B*n)

    # Head.fc : Linear(n*C -> 7*C)
    fc_w = nrm((7 * C_OUT, NUM_CLASSES * C_OUT),
               float(1.0 / np.sqrt(NUM_CLASSES * C_OUT)))
    p["fc_w"] = jnp.transpose(fc_w).astype(jnp.bfloat16)        # (n*C, 7C)
    p["fc_b"] = jnp.zeros((1, 7 * C_OUT), jnp.float32)

    # Head.sc and Head.edge_fc (xavier-uniform as in the reference); edge_fc weight/bias
    # zero-padded to 128 output lanes so the kernel's final store is lane-dense.
    p["sc"] = xavier((7, C_OUT))
    efc_w = jnp.transpose(xavier((3, C_OUT)))                   # (C, 3)
    p["efc_w"] = jnp.concatenate(
        [efc_w, jnp.zeros((C_OUT, 125), jnp.float32)], axis=1)  # (C, 128)
    p["efc_b"] = jnp.zeros((1, 128), jnp.float32)
    return p


# ---------------- run ----------------
if __name__ == "__main__":
    key = jax.random.PRNGKey(0)
    kx, kp = jax.random.split(key)
    params = init_params(kp)
    x = jax.random.normal(kx, (BATCH, N_TOK, C_IN), jnp.float32)

    fwd = jax.jit(lambda xx: mefarg_forward(xx, params))
    cl, cl_edge, f_v, f_e, f_u = fwd(x)
    jax.block_until_ready((cl, cl_edge, f_v, f_e, f_u))

    assert cl.shape == (BATCH, 7)
    assert cl_edge.shape == (BATCH, NUM_CLASSES * NUM_CLASSES, 3)
    assert f_v.shape == (BATCH, NUM_CLASSES, C_OUT)
    assert f_e.shape == (BATCH, NUM_CLASSES * NUM_CLASSES, C_OUT)
    assert f_u.shape == (BATCH, NUM_CLASSES, N_TOK, C_OUT)
    assert all(bool(jnp.isfinite(a).all()) for a in (cl, cl_edge, f_v, f_e, f_u))
    print("KERNEL_OK")
</pallas_src>

<mosaic_0001>
module attributes {stable_mosaic.version = 11 : i64} {
  func.func @_mefarg_kernel(%arg0: i32, %arg1: memref<32x256xf32, #tpu.memory_space<vmem>>, %arg2: memref<256x128xbf16, #tpu.memory_space<vmem>>, %arg3: memref<128x512xbf16, #tpu.memory_space<vmem>>, %arg4: memref<32x8xf32, #tpu.memory_space<vmem>>, %arg5: memref<2x128x512xbf16, #tpu.memory_space<vmem>>, %arg6: memref<2x128x128xbf16, #tpu.memory_space<vmem>>, %arg7: memref<512x896xbf16, #tpu.memory_space<vmem>>, %arg8: memref<1x896xf32, #tpu.memory_space<vmem>>, %arg9: memref<7x128xf32, #tpu.memory_space<vmem>>, %arg10: memref<128x128xf32, #tpu.memory_space<vmem>>, %arg11: memref<1x128xf32, #tpu.memory_space<vmem>>, %arg12: memref<14x128xf32, #tpu.memory_space<vmem>>, %arg13: memref<32x128xf32, #tpu.memory_space<vmem>>, %arg14: memref<8x128xf32, #tpu.memory_space<vmem>>, %arg15: memref<32x128xf32, #tpu.memory_space<vmem>>, %arg16: memref<32x512xf32, #tpu.memory_space<vmem>>) attributes {dimension_semantics = [#tpu.dimension_semantics<arbitrary>], iteration_bounds = array<i64: 1>, scalar_prefetch = 0 : i64, scratch_operands = 0 : i64, tpu.core_type = #tpu.core_type<tc>, window_params = [{pipeline_mode = #tpu.pipeline_mode<synchronous>, transform_indices = @transform_0, window_bounds = array<i64: 32, 256>}, {pipeline_mode = #tpu.pipeline_mode<synchronous>, transform_indices = @transform_1, window_bounds = array<i64: 256, 128>}, {pipeline_mode = #tpu.pipeline_mode<synchronous>, transform_indices = @transform_2, window_bounds = array<i64: 128, 512>}, {pipeline_mode = #tpu.pipeline_mode<synchronous>, transform_indices = @transform_3, window_bounds = array<i64: 32, 8>}, {pipeline_mode = #tpu.pipeline_mode<synchronous>, transform_indices = @transform_4, window_bounds = array<i64: 2, 128, 512>}, {pipeline_mode = #tpu.pipeline_mode<synchronous>, transform_indices = @transform_5, window_bounds = array<i64: 2, 128, 128>}, {pipeline_mode = #tpu.pipeline_mode<synchronous>, transform_indices = @transform_6, window_bounds = array<i64: 512, 896>}, {pipeline_mode = #tpu.pipeline_mode<synchronous>, transform_indices = @transform_7, window_bounds = array<i64: 1, 896>}, {pipeline_mode = #tpu.pipeline_mode<synchronous>, transform_indices = @transform_8, window_bounds = array<i64: 7, 128>}, {pipeline_mode = #tpu.pipeline_mode<synchronous>, transform_indices = @transform_9, window_bounds = array<i64: 128, 128>}, {pipeline_mode = #tpu.pipeline_mode<synchronous>, transform_indices = @transform_10, window_bounds = array<i64: 1, 128>}, {pipeline_mode = #tpu.pipeline_mode<synchronous>, transform_indices = @transform_11, window_bounds = array<i64: 14, 128>}, {pipeline_mode = #tpu.pipeline_mode<synchronous>, transform_indices = @transform_12, window_bounds = array<i64: 32, 128>}, {pipeline_mode = #tpu.pipeline_mode<synchronous>, transform_indices = @transform_13, window_bounds = array<i64: 8, 128>}, {pipeline_mode = #tpu.pipeline_mode<synchronous>, transform_indices = @transform_14, window_bounds = array<i64: 32, 128>}, {pipeline_mode = #tpu.pipeline_mode<synchronous>, transform_indices = @transform_15, window_bounds = array<i64: 32, 512>}]} {
    %c0 = arith.constant 0 : index
    %c0_0 = arith.constant 0 : index
    %0 = vector.load %arg1[%c0, %c0_0] : memref<32x256xf32, #tpu.memory_space<vmem>>, vector<32x256xf32>
    %1 = arith.truncf %0 : vector<32x256xf32> to vector<32x256xbf16>
    %c0_1 = arith.constant 0 : index
    %c0_2 = arith.constant 0 : index
    %2 = vector.load %arg2[%c0_1, %c0_2] : memref<256x128xbf16, #tpu.memory_space<vmem>>, vector<256x128xbf16>
    %cst = arith.constant dense<0.000000e+00> : vector<32x128xf32>
    %3 = tpu.matmul %1, %2, %cst {dimension_numbers = #tpu.dot_dimension_numbers<[1], [0], [0], [1], [0, 0, 1, 1], [], []>} : vector<32x256xbf16>, vector<256x128xbf16>, vector<32x128xf32> -> vector<32x128xf32>
    %cst_3 = arith.constant 0.000000e+00 : f32
    %4 = vector.broadcast %cst_3 : f32 to vector<32x128xf32>
    %5 = arith.maximumf %3, %4 : vector<32x128xf32>
    %6 = arith.truncf %5 : vector<32x128xf32> to vector<32x128xbf16>
    %c0_4 = arith.constant 0 : index
    %c0_5 = arith.constant 0 : index
    %7 = vector.load %arg3[%c0_4, %c0_5] : memref<128x512xbf16, #tpu.memory_space<vmem>>, vector<128x512xbf16>
    %cst_6 = arith.constant dense<0.000000e+00> : vector<32x512xf32>
    %8 = tpu.matmul %6, %7, %cst_6 {dimension_numbers = #tpu.dot_dimension_numbers<[1], [0], [0], [1], [0, 0, 1, 1], [], []>} : vector<32x128xbf16>, vector<128x512xbf16>, vector<32x512xf32> -> vector<32x512xf32>
    %cst_7 = arith.constant 0.000000e+00 : f32
    %9 = vector.broadcast %cst_7 : f32 to vector<32x512xf32>
    %10 = arith.maximumf %8, %9 : vector<32x512xf32>
    %c0_8 = arith.constant 0 : index
    %c0_9 = arith.constant 0 : index
    %11 = vector.load %arg16[%c0_8, %c0_9] : memref<32x512xf32, #tpu.memory_space<vmem>>, vector<32x512xf32>
    tpu.vector_store %arg16[%c0_8, %c0_9], %10 {strides = array<i32>} : memref<32x512xf32, #tpu.memory_space<vmem>>, vector<32x512xf32>,
    %12 = vector.extract_strided_slice %10 {offsets = [0, 0], sizes = [16, 512], strides = [1, 1]} : vector<32x512xf32> to vector<16x512xf32>
    %cst_10 = arith.constant dense<0.000000e+00> : vector<512xf32>
    %13 = vector.multi_reduction <add>, %12, %cst_10 [0] : vector<16x512xf32> to vector<512xf32>
    %14 = vector.shape_cast %13 : vector<512xf32> to vector<1x512xf32>
    %cst_11 = arith.constant 1.600000e+01 : f32
    %15 = vector.broadcast %cst_11 : f32 to vector<1x512xf32>
    %16 = arith.divf %14, %15 : vector<1x512xf32>
    %17 = vector.extract_strided_slice %16 {offsets = [0, 0], sizes = [1, 128], strides = [1, 1]} : vector<1x512xf32> to vector<1x128xf32>
    %18 = vector.extract_strided_slice %16 {offsets = [0, 128], sizes = [1, 128], strides = [1, 1]} : vector<1x512xf32> to vector<1x128xf32>
    %19 = vector.extract_strided_slice %16 {offsets = [0, 256], sizes = [1, 128], strides = [1, 1]} : vector<1x512xf32> to vector<1x128xf32>
    %20 = vector.extract_strided_slice %16 {offsets = [0, 384], sizes = [1, 128], strides = [1, 1]} : vector<1x512xf32> to vector<1x128xf32>
    %21 = vector.extract_strided_slice %10 {offsets = [16, 0], sizes = [16, 512], strides = [1, 1]} : vector<32x512xf32> to vector<16x512xf32>
    %cst_12 = arith.constant dense<0.000000e+00> : vector<512xf32>
    %22 = vector.multi_reduction <add>, %21, %cst_12 [0] : vector<16x512xf32> to vector<512xf32>
    %23 = vector.shape_cast %22 : vector<512xf32> to vector<1x512xf32>
    %cst_13 = arith.constant 1.600000e+01 : f32
    %24 = vector.broadcast %cst_13 : f32 to vector<1x512xf32>
    %25 = arith.divf %23, %24 : vector<1x512xf32>
    %26 = vector.extract_strided_slice %25 {offsets = [0, 0], sizes = [1, 128], strides = [1, 1]} : vector<1x512xf32> to vector<1x128xf32>
    %27 = vector.extract_strided_slice %25 {offsets = [0, 128], sizes = [1, 128], strides = [1, 1]} : vector<1x512xf32> to vector<1x128xf32>
    %28 = vector.extract_strided_slice %25 {offsets = [0, 256], sizes = [1, 128], strides = [1, 1]} : vector<1x512xf32> to vector<1x128xf32>
    %29 = vector.extract_strided_slice %25 {offsets = [0, 384], sizes = [1, 128], strides = [1, 1]} : vector<1x512xf32> to vector<1x128xf32>
    %30 = tpu.concatenate %17, %18, %19, %20, %26, %27, %28, %29 in 0 : vector<1x128xf32>, vector<1x128xf32>, vector<1x128xf32>, vector<1x128xf32>, vector<1x128xf32>, vector<1x128xf32>, vector<1x128xf32>, vector<1x128xf32> -> vector<8x128xf32>
    %c0_14 = arith.constant 0 : index
    %c0_15 = arith.constant 0 : index
    %31 = vector.load %arg4[%c0_14, %c0_15] : memref<32x8xf32, #tpu.memory_space<vmem>>, vector<32x8xf32>
    %cst_16 = arith.constant dense<0.000000e+00> : vector<32x128xf32>
    %32 = tpu.matmul %31, %30, %cst_16 {dimension_numbers = #tpu.dot_dimension_numbers<[1], [0], [0], [1], [0, 0, 1, 1], [], []>} : vector<32x8xf32>, vector<8x128xf32>, vector<32x128xf32> -> vector<32x128xf32>
    %33 = arith.mulf %32, %32 : vector<32x128xf32>
    %cst_17 = arith.constant dense<0.000000e+00> : vector<32xf32>
    %34 = vector.multi_reduction <add>, %33, %cst_17 [1] : vector<32x128xf32> to vector<32xf32>
    %35 = vector.shape_cast %34 : vector<32xf32> to vector<32x1xf32>
    %36 = math.sqrt %35 : vector<32x1xf32>
    %37 = vector.shape_cast %36 : vector<32x1xf32> to vector<32x1xf32>
    %38 = vector.broadcast %37 : vector<32x1xf32> to vector<32x128xf32>
    %39 = arith.truncf %30 : vector<8x128xf32> to vector<8x128xbf16>
    %c0_18 = arith.constant 0 : index
    %c0_19 = arith.constant 0 : index
    %c0_20 = arith.constant 0 : index
    %40 = vector.load %arg5[%c0_18, %c0_19, %c0_20] : memref<2x128x512xbf16, #tpu.memory_space<vmem>>, vector<1x128x512xbf16>
    %41 = vector.shape_cast %40 : vector<1x128x512xbf16> to vector<128x512xbf16>
    %cst_21 = arith.constant dense<0.000000e+00> : vector<8x512xf32>
    %42 = tpu.matmul %39, %41, %cst_21 {dimension_numbers = #tpu.dot_dimension_numbers<[1], [0], [0], [1], [0, 0, 1, 1], [], []>} : vector<8x128xbf16>, vector<128x512xbf16>, vector<8x512xf32> -> vector<8x512xf32>
    %43 = vector.extract_strided_slice %42 {offsets = [0, 0], sizes = [8, 128], strides = [1, 1]} : vector<8x512xf32> to vector<8x128xf32>
    %44 = vector.extract_strided_slice %42 {offsets = [0, 128], sizes = [8, 128], strides = [1, 1]} : vector<8x512xf32> to vector<8x128xf32>
    %45 = vector.extract_strided_slice %42 {offsets = [0, 256], sizes = [8, 128], strides = [1, 1]} : vector<8x512xf32> to vector<8x128xf32>
    %46 = vector.extract_strided_slice %42 {offsets = [0, 384], sizes = [8, 128], strides = [1, 1]} : vector<8x512xf32> to vector<8x128xf32>
    %47 = arith.truncf %38 : vector<32x128xf32> to vector<32x128xbf16>
    %c0_22 = arith.constant 0 : index
    %c0_23 = arith.constant 0 : index
    %c0_24 = arith.constant 0 : index
    %48 = vector.load %arg6[%c0_22, %c0_23, %c0_24] : memref<2x128x128xbf16, #tpu.memory_space<vmem>>, vector<1x128x128xbf16>
    %49 = vector.shape_cast %48 : vector<1x128x128xbf16> to vector<128x128xbf16>
    %cst_25 = arith.constant dense<0.000000e+00> : vector<32x128xf32>
    %50 = tpu.matmul %47, %49, %cst_25 {dimension_numbers = #tpu.dot_dimension_numbers<[1], [0], [0], [1], [0, 0, 1, 1], [], []>} : vector<32x128xbf16>, vector<128x128xbf16>, vector<32x128xf32> -> vector<32x128xf32>
    %51 = vector.shape_cast %43 : vector<8x128xf32> to vector<8x1x128xf32>
    %52 = vector.shape_cast %51 : vector<8x1x128xf32> to vector<8x1x128xf32>
    %53 = vector.broadcast %52 : vector<8x1x128xf32> to vector<8x4x128xf32>
    %54 = vector.shape_cast %53 : vector<8x4x128xf32> to vector<32x128xf32>
    %55 = vector.shape_cast %44 : vector<8x128xf32> to vector<2x4x128xf32>
    %56 = vector.shape_cast %55 : vector<2x4x128xf32> to vector<2x1x4x128xf32>
    %57 = vector.shape_cast %56 : vector<2x1x4x128xf32> to vector<2x1x4x128xf32>
    %58 = vector.broadcast %57 : vector<2x1x4x128xf32> to vector<2x4x4x128xf32>
    %59 = vector.shape_cast %58 : vector<2x4x4x128xf32> to vector<32x128xf32>
    %60 = arith.addf %54, %59 : vector<32x128xf32>
    %61 = arith.addf %60, %50 : vector<32x128xf32>
    %cst_26 = arith.constant 0.000000e+00 : f32
    %62 = vector.broadcast %cst_26 : f32 to vector<32x128xf32>
    %63 = arith.maximumf %61, %62 : vector<32x128xf32>
    %64 = arith.addf %38, %63 : vector<32x128xf32>
    %65 = arith.negf %64 : vector<32x128xf32>
    %66 = math.exp %65 : vector<32x128xf32>
    %cst_27 = arith.constant 1.000000e+00 : f32
    %67 = vector.broadcast %cst_27 : f32 to vector<32x128xf32>
    %68 = arith.addf %67, %66 : vector<32x128xf32>
    %69 = arith.divf %67, %68 : vector<32x128xf32>
    %70 = math.exp %69 : vector<32x128xf32>
    %71 = vector.shape_cast %70 : vector<32x128xf32> to vector<8x4x128xf32>
    %cst_28 = arith.constant dense<0.000000e+00> : vector<8x128xf32>
    %72 = vector.multi_reduction <add>, %71, %cst_28 [1] : vector<8x4x128xf32> to vector<8x128xf32>
    %73 = vector.shape_cast %72 : vector<8x128xf32> to vector<8x1x128xf32>
    %74 = vector.shape_cast %73 : vector<8x1x128xf32> to vector<8x1x128xf32>
    %75 = vector.broadcast %74 : vector<8x1x128xf32> to vector<8x4x128xf32>
    %76 = vector.shape_cast %75 : vector<8x4x128xf32> to vector<32x128xf32>
    %77 = arith.divf %70, %76 : vector<32x128xf32>
    %78 = vector.shape_cast %46 : vector<8x128xf32> to vector<2x4x128xf32>
    %79 = vector.shape_cast %78 : vector<2x4x128xf32> to vector<2x1x4x128xf32>
    %80 = vector.shape_cast %79 : vector<2x1x4x128xf32> to vector<2x1x4x128xf32>
    %81 = vector.broadcast %80 : vector<2x1x4x128xf32> to vector<2x4x4x128xf32>
    %82 = vector.shape_cast %81 : vector<2x4x4x128xf32> to vector<32x128xf32>
    %83 = arith.mulf %77, %82 : vector<32x128xf32>
    %84 = vector.shape_cast %83 : vector<32x128xf32> to vector<8x4x128xf32>
    %cst_29 = arith.constant dense<0.000000e+00> : vector<8x128xf32>
    %85 = vector.multi_reduction <add>, %84, %cst_29 [1] : vector<8x4x128xf32> to vector<8x128xf32>
    %86 = arith.addf %30, %45 : vector<8x128xf32>
    %cst_30 = arith.constant 2.500000e-01 : f32
    %87 = vector.broadcast %cst_30 : f32 to vector<8x128xf32>
    %88 = arith.mulf %85, %87 : vector<8x128xf32>
    %89 = arith.addf %86, %88 : vector<8x128xf32>
    %cst_31 = arith.constant 0.000000e+00 : f32
    %90 = vector.broadcast %cst_31 : f32 to vector<8x128xf32>
    %91 = arith.maximumf %89, %90 : vector<8x128xf32>
    %92 = arith.truncf %91 : vector<8x128xf32> to vector<8x128xbf16>
    %c1 = arith.constant 1 : index
    %c0_32 = arith.constant 0 : index
    %c0_33 = arith.constant 0 : index
    %93 = vector.load %arg5[%c1, %c0_32, %c0_33] : memref<2x128x512xbf16, #tpu.memory_space<vmem>>, vector<1x128x512xbf16>
    %94 = vector.shape_cast %93 : vector<1x128x512xbf16> to vector<128x512xbf16>
    %cst_34 = arith.constant dense<0.000000e+00> : vector<8x512xf32>
    %95 = tpu.matmul %92, %94, %cst_34 {dimension_numbers = #tpu.dot_dimension_numbers<[1], [0], [0], [1], [0, 0, 1, 1], [], []>} : vector<8x128xbf16>, vector<128x512xbf16>, vector<8x512xf32> -> vector<8x512xf32>
    %96 = vector.extract_strided_slice %95 {offsets = [0, 0], sizes = [8, 128], strides = [1, 1]} : vector<8x512xf32> to vector<8x128xf32>
    %97 = vector.extract_strided_slice %95 {offsets = [0, 128], sizes = [8, 128], strides = [1, 1]} : vector<8x512xf32> to vector<8x128xf32>
    %98 = vector.extract_strided_slice %95 {offsets = [0, 256], sizes = [8, 128], strides = [1, 1]} : vector<8x512xf32> to vector<8x128xf32>
    %99 = vector.extract_strided_slice %95 {offsets = [0, 384], sizes = [8, 128], strides = [1, 1]} : vector<8x512xf32> to vector<8x128xf32>
    %100 = arith.truncf %64 : vector<32x128xf32> to vector<32x128xbf16>
    %c1_35 = arith.constant 1 : index
    %c0_36 = arith.constant 0 : index
    %c0_37 = arith.constant 0 : index
    %101 = vector.load %arg6[%c1_35, %c0_36, %c0_37] : memref<2x128x128xbf16, #tpu.memory_space<vmem>>, vector<1x128x128xbf16>
    %102 = vector.shape_cast %101 : vector<1x128x128xbf16> to vector<128x128xbf16>
    %cst_38 = arith.constant dense<0.000000e+00> : vector<32x128xf32>
    %103 = tpu.matmul %100, %102, %cst_38 {dimension_numbers = #tpu.dot_dimension_numbers<[1], [0], [0], [1], [0, 0, 1, 1], [], []>} : vector<32x128xbf16>, vector<128x128xbf16>, vector<32x128xf32> -> vector<32x128xf32>
    %104 = vector.shape_cast %96 : vector<8x128xf32> to vector<8x1x128xf32>
    %105 = vector.shape_cast %104 : vector<8x1x128xf32> to vector<8x1x128xf32>
    %106 = vector.broadcast %105 : vector<8x1x128xf32> to vector<8x4x128xf32>
    %107 = vector.shape_cast %106 : vector<8x4x128xf32> to vector<32x128xf32>
    %108 = vector.shape_cast %97 : vector<8x128xf32> to vector<2x4x128xf32>
    %109 = vector.shape_cast %108 : vector<2x4x128xf32> to vector<2x1x4x128xf32>
    %110 = vector.shape_cast %109 : vector<2x1x4x128xf32> to vector<2x1x4x128xf32>
    %111 = vector.broadcast %110 : vector<2x1x4x128xf32> to vector<2x4x4x128xf32>
    %112 = vector.shape_cast %111 : vector<2x4x4x128xf32> to vector<32x128xf32>
    %113 = arith.addf %107, %112 : vector<32x128xf32>
    %114 = arith.addf %113, %103 : vector<32x128xf32>
    %cst_39 = arith.constant 0.000000e+00 : f32
    %115 = vector.broadcast %cst_39 : f32 to vector<32x128xf32>
    %116 = arith.maximumf %114, %115 : vector<32x128xf32>
    %117 = arith.addf %64, %116 : vector<32x128xf32>
    %118 = arith.negf %117 : vector<32x128xf32>
    %119 = math.exp %118 : vector<32x128xf32>
    %cst_40 = arith.constant 1.000000e+00 : f32
    %120 = vector.broadcast %cst_40 : f32 to vector<32x128xf32>
    %121 = arith.addf %120, %119 : vector<32x128xf32>
    %122 = arith.divf %120, %121 : vector<32x128xf32>
    %123 = math.exp %122 : vector<32x128xf32>
    %124 = vector.shape_cast %123 : vector<32x128xf32> to vector<8x4x128xf32>
    %cst_41 = arith.constant dense<0.000000e+00> : vector<8x128xf32>
    %125 = vector.multi_reduction <add>, %124, %cst_41 [1] : vector<8x4x128xf32> to vector<8x128xf32>
    %126 = vector.shape_cast %125 : vector<8x128xf32> to vector<8x1x128xf32>
    %127 = vector.shape_cast %126 : vector<8x1x128xf32> to vector<8x1x128xf32>
    %128 = vector.broadcast %127 : vector<8x1x128xf32> to vector<8x4x128xf32>
    %129 = vector.shape_cast %128 : vector<8x4x128xf32> to vector<32x128xf32>
    %130 = arith.divf %123, %129 : vector<32x128xf32>
    %131 = vector.shape_cast %99 : vector<8x128xf32> to vector<2x4x128xf32>
    %132 = vector.shape_cast %131 : vector<2x4x128xf32> to vector<2x1x4x128xf32>
    %133 = vector.shape_cast %132 : vector<2x1x4x128xf32> to vector<2x1x4x128xf32>
    %134 = vector.broadcast %133 : vector<2x1x4x128xf32> to vector<2x4x4x128xf32>
    %135 = vector.shape_cast %134 : vector<2x4x4x128xf32> to vector<32x128xf32>
    %136 = arith.mulf %130, %135 : vector<32x128xf32>
    %137 = vector.shape_cast %136 : vector<32x128xf32> to vector<8x4x128xf32>
    %cst_42 = arith.constant dense<0.000000e+00> : vector<8x128xf32>
    %138 = vector.multi_reduction <add>, %137, %cst_42 [1] : vector<8x4x128xf32> to vector<8x128xf32>
    %139 = arith.addf %91, %98 : vector<8x128xf32>
    %cst_43 = arith.constant 2.500000e-01 : f32
    %140 = vector.broadcast %cst_43 : f32 to vector<8x128xf32>
    %141 = arith.mulf %138, %140 : vector<8x128xf32>
    %142 = arith.addf %139, %141 : vector<8x128xf32>
    %cst_44 = arith.constant 0.000000e+00 : f32
    %143 = vector.broadcast %cst_44 : f32 to vector<8x128xf32>
    %144 = arith.maximumf %142, %143 : vector<8x128xf32>
    %c0_45 = arith.constant 0 : index
    %c0_46 = arith.constant 0 : index
    %145 = vector.load %arg14[%c0_45, %c0_46] : memref<8x128xf32, #tpu.memory_space<vmem>>, vector<8x128xf32>
    tpu.vector_store %arg14[%c0_45, %c0_46], %144 {strides = array<i32>} : memref<8x128xf32, #tpu.memory_space<vmem>>, vector<8x128xf32>,
    %c0_47 = arith.constant 0 : index
    %c0_48 = arith.constant 0 : index
    %146 = vector.load %arg15[%c0_47, %c0_48] : memref<32x128xf32, #tpu.memory_space<vmem>>, vector<32x128xf32>
    tpu.vector_store %arg15[%c0_47, %c0_48], %117 {strides = array<i32>} : memref<32x128xf32, #tpu.memory_space<vmem>>, vector<32x128xf32>,
    %147 = vector.extract_strided_slice %144 {offsets = [0, 0], sizes = [1, 128], strides = [1, 1]} : vector<8x128xf32> to vector<1x128xf32>
    %148 = vector.extract_strided_slice %144 {offsets = [4, 0], sizes = [1, 128], strides = [1, 1]} : vector<8x128xf32> to vector<1x128xf32>
    %149 = tpu.concatenate %147, %148 in 0 : vector<1x128xf32>, vector<1x128xf32> -> vector<2x128xf32>
    %150 = vector.extract_strided_slice %144 {offsets = [1, 0], sizes = [1, 128], strides = [1, 1]} : vector<8x128xf32> to vector<1x128xf32>
    %151 = vector.extract_strided_slice %144 {offsets = [5, 0], sizes = [1, 128], strides = [1, 1]} : vector<8x128xf32> to vector<1x128xf32>
    %152 = tpu.concatenate %150, %151 in 0 : vector<1x128xf32>, vector<1x128xf32> -> vector<2x128xf32>
    %153 = vector.extract_strided_slice %144 {offsets = [2, 0], sizes = [1, 128], strides = [1, 1]} : vector<8x128xf32> to vector<1x128xf32>
    %154 = vector.extract_strided_slice %144 {offsets = [6, 0], sizes = [1, 128], strides = [1, 1]} : vector<8x128xf32> to vector<1x128xf32>
    %155 = tpu.concatenate %153, %154 in 0 : vector<1x128xf32>, vector<1x128xf32> -> vector<2x128xf32>
    %156 = vector.extract_strided_slice %144 {offsets = [3, 0], sizes = [1, 128], strides = [1, 1]} : vector<8x128xf32> to vector<1x128xf32>
    %157 = vector.extract_strided_slice %144 {offsets = [7, 0], sizes = [1, 128], strides = [1, 1]} : vector<8x128xf32> to vector<1x128xf32>
    %158 = tpu.concatenate %156, %157 in 0 : vector<1x128xf32>, vector<1x128xf32> -> vector<2x128xf32>
    %159 = tpu.concatenate %149, %152, %155, %158 in 1 : vector<2x128xf32>, vector<2x128xf32>, vector<2x128xf32>, vector<2x128xf32> -> vector<2x512xf32>
    %160 = arith.truncf %159 : vector<2x512xf32> to vector<2x512xbf16>
    %c0_49 = arith.constant 0 : index
    %c0_50 = arith.constant 0 : index
    %161 = vector.load %arg7[%c0_49, %c0_50] : memref<512x896xbf16, #tpu.memory_space<vmem>>, vector<512x896xbf16>
    %cst_51 = arith.constant dense<0.000000e+00> : vector<2x896xf32>
    %162 = tpu.matmul %160, %161, %cst_51 {dimension_numbers = #tpu.dot_dimension_numbers<[1], [0], [0], [1], [0, 0, 1, 1], [], []>} : vector<2x512xbf16>, vector<512x896xbf16>, vector<2x896xf32> -> vector<2x896xf32>
    %c0_52 = arith.constant 0 : index
    %c0_53 = arith.constant 0 : index
    %163 = vector.load %arg8[%c0_52, %c0_53] : memref<1x896xf32, #tpu.memory_space<vmem>>, vector<1x896xf32>
    %164 = vector.broadcast %163 : vector<1x896xf32> to vector<2x896xf32>
    %165 = arith.addf %162, %164 : vector<2x896xf32>
    %166 = vector.extract_strided_slice %165 {offsets = [0, 0], sizes = [2, 128], strides = [1, 1]} : vector<2x896xf32> to vector<2x128xf32>
    %167 = vector.extract_strided_slice %165 {offsets = [0, 128], sizes = [2, 128], strides = [1, 1]} : vector<2x896xf32> to vector<2x128xf32>
    %168 = vector.extract_strided_slice %165 {offsets = [0, 256], sizes = [2, 128], strides = [1, 1]} : vector<2x896xf32> to vector<2x128xf32>
    %169 = vector.extract_strided_slice %165 {offsets = [0, 384], sizes = [2, 128], strides = [1, 1]} : vector<2x896xf32> to vector<2x128xf32>
    %170 = vector.extract_strided_slice %165 {offsets = [0, 512], sizes = [2, 128], strides = [1, 1]} : vector<2x896xf32> to vector<2x128xf32>
    %171 = vector.extract_strided_slice %165 {offsets = [0, 640], sizes = [2, 128], strides = [1, 1]} : vector<2x896xf32> to vector<2x128xf32>
    %172 = vector.extract_strided_slice %165 {offsets = [0, 768], sizes = [2, 128], strides = [1, 1]} : vector<2x896xf32> to vector<2x128xf32>
    %173 = tpu.concatenate %166, %167, %168, %169, %170, %171, %172 in 0 : vector<2x128xf32>, vector<2x128xf32>, vector<2x128xf32>, vector<2x128xf32>, vector<2x128xf32>, vector<2x128xf32>, vector<2x128xf32> -> vector<14x128xf32>
    %c0_54 = arith.constant 0 : index
    %c0_55 = arith.constant 0 : index
    %174 = vector.load %arg9[%c0_54, %c0_55] : memref<7x128xf32, #tpu.memory_space<vmem>>, vector<7x128xf32>
    %cst_56 = arith.constant 0.000000e+00 : f32
    %175 = vector.broadcast %cst_56 : f32 to vector<7x128xf32>
    %176 = arith.maximumf %174, %175 : vector<7x128xf32>
    %177 = arith.mulf %176, %176 : vector<7x128xf32>
    %cst_57 = arith.constant dense<0.000000e+00> : vector<7xf32>
    %178 = vector.multi_reduction <add>, %177, %cst_57 [1] : vector<7x128xf32> to vector<7xf32>
    %179 = vector.shape_cast %178 : vector<7xf32> to vector<7x1xf32>
    %cst_58 = arith.constant 1.000000e-24 : f32
    %180 = vector.broadcast %cst_58 : f32 to vector<7x1xf32>
    %181 = arith.maximumf %179, %180 : vector<7x1xf32>
    %182 = math.rsqrt %181 : vector<7x1xf32>
    %183 = vector.broadcast %182 : vector<7x1xf32> to vector<7x128xf32>
    %184 = arith.mulf %176, %183 : vector<7x128xf32>
    %185 = vector.shape_cast %184 : vector<7x128xf32> to vector<7x1x128xf32>
    %186 = vector.shape_cast %185 : vector<7x1x128xf32> to vector<7x1x128xf32>
    %187 = vector.broadcast %186 : vector<7x1x128xf32> to vector<7x2x128xf32>
    %188 = vector.shape_cast %187 : vector<7x2x128xf32> to vector<14x128xf32>
    %189 = arith.mulf %173, %173 : vector<14x128xf32>
    %cst_59 = arith.constant dense<0.000000e+00> : vector<14xf32>
    %190 = vector.multi_reduction <add>, %189, %cst_59 [1] : vector<14x128xf32> to vector<14xf32>
    %191 = vector.shape_cast %190 : vector<14xf32> to vector<14x1xf32>
    %cst_60 = arith.constant 1.000000e-24 : f32
    %192 = vector.broadcast %cst_60 : f32 to vector<14x1xf32>
    %193 = arith.maximumf %191, %192 : vector<14x1xf32>
    %194 = math.rsqrt %193 : vector<14x1xf32>
    %195 = vector.broadcast %194 : vector<14x1xf32> to vector<14x128xf32>
    %196 = arith.mulf %173, %195 : vector<14x128xf32>
    %197 = arith.mulf %196, %188 : vector<14x128xf32>
    %cst_61 = arith.constant dense<0.000000e+00> : vector<14xf32>
    %198 = vector.multi_reduction <add>, %197, %cst_61 [1] : vector<14x128xf32> to vector<14xf32>
    %199 = vector.shape_cast %198 : vector<14xf32> to vector<14x1xf32>
    %200 = vector.shape_cast %199 : vector<14x1xf32> to vector<14x1xf32>
    %201 = vector.broadcast %200 : vector<14x1xf32> to vector<14x128xf32>
    %c0_62 = arith.constant 0 : index
    %c0_63 = arith.constant 0 : index
    %202 = vector.load %arg12[%c0_62, %c0_63] : memref<14x128xf32, #tpu.memory_space<vmem>>, vector<14x128xf32>
    tpu.vector_store %arg12[%c0_62, %c0_63], %201 {strides = array<i32>} : memref<14x128xf32, #tpu.memory_space<vmem>>, vector<14x128xf32>,
    %c0_64 = arith.constant 0 : index
    %c0_65 = arith.constant 0 : index
    %203 = vector.load %arg10[%c0_64, %c0_65] : memref<128x128xf32, #tpu.memory_space<vmem>>, vector<128x128xf32>
    %cst_66 = arith.constant dense<0.000000e+00> : vector<32x128xf32>
    %204 = tpu.matmul %117, %203, %cst_66 {dimension_numbers = #tpu.dot_dimension_numbers<[1], [0], [0], [1], [0, 0, 1, 1], [], []>} : vector<32x128xf32>, vector<128x128xf32>, vector<32x128xf32> -> vector<32x128xf32>
    %c0_67 = arith.constant 0 : index
    %c0_68 = arith.constant 0 : index
    %205 = vector.load %arg11[%c0_67, %c0_68] : memref<1x128xf32, #tpu.memory_space<vmem>>, vector<1x128xf32>
    %206 = vector.broadcast %205 : vector<1x128xf32> to vector<32x128xf32>
    %207 = arith.addf %204, %206 : vector<32x128xf32>
    %c0_69 = arith.constant 0 : index
    %c0_70 = arith.constant 0 : index
    %208 = vector.load %arg13[%c0_69, %c0_70] : memref<32x128xf32, #tpu.memory_space<vmem>>, vector<32x128xf32>
    tpu.vector_store %arg13[%c0_69, %c0_70], %207 {strides = array<i32>} : memref<32x128xf32, #tpu.memory_space<vmem>>, vector<32x128xf32>,
    return
  }
  func.func @transform_0(%arg0: i32) -> (i32, i32) {
    %c0_i32 = arith.constant 0 : i32
    %c0_i32_0 = arith.constant 0 : i32
    %c0_i32_1 = arith.constant 0 : i32
    return %c0_i32, %c0_i32_0 : i32, i32
  }
  func.func @transform_1(%arg0: i32) -> (i32, i32) {
    %c0_i32 = arith.constant 0 : i32
    %c0_i32_0 = arith.constant 0 : i32
    %c0_i32_1 = arith.constant 0 : i32
    return %c0_i32, %c0_i32_0 : i32, i32
  }
  func.func @transform_2(%arg0: i32) -> (i32, i32) {
    %c0_i32 = arith.constant 0 : i32
    %c0_i32_0 = arith.constant 0 : i32
    %c0_i32_1 = arith.constant 0 : i32
    return %c0_i32, %c0_i32_0 : i32, i32
  }
  func.func @transform_3(%arg0: i32) -> (i32, i32) {
    %c0_i32 = arith.constant 0 : i32
    %c0_i32_0 = arith.constant 0 : i32
    %c0_i32_1 = arith.constant 0 : i32
    return %c0_i32, %c0_i32_0 : i32, i32
  }
  func.func @transform_4(%arg0: i32) -> (i32, i32, i32) {
    %c0_i32 = arith.constant 0 : i32
    %c0_i32_0 = arith.constant 0 : i32
    %c0_i32_1 = arith.constant 0 : i32
    %c0_i32_2 = arith.constant 0 : i32
    return %c0_i32, %c0_i32_0, %c0_i32_1 : i32, i32, i32
  }
  func.func @transform_5(%arg0: i32) -> (i32, i32, i32) {
    %c0_i32 = arith.constant 0 : i32
    %c0_i32_0 = arith.constant 0 : i32
    %c0_i32_1 = arith.constant 0 : i32
    %c0_i32_2 = arith.constant 0 : i32
    return %c0_i32, %c0_i32_0, %c0_i32_1 : i32, i32, i32
  }
  func.func @transform_6(%arg0: i32) -> (i32, i32) {
    %c0_i32 = arith.constant 0 : i32
    %c0_i32_0 = arith.constant 0 : i32
    %c0_i32_1 = arith.constant 0 : i32
    return %c0_i32, %c0_i32_0 : i32, i32
  }
  func.func @transform_7(%arg0: i32) -> (i32, i32) {
    %c0_i32 = arith.constant 0 : i32
    %c0_i32_0 = arith.constant 0 : i32
    %c0_i32_1 = arith.constant 0 : i32
    return %c0_i32, %c0_i32_0 : i32, i32
  }
  func.func @transform_8(%arg0: i32) -> (i32, i32) {
    %c0_i32 = arith.constant 0 : i32
    %c0_i32_0 = arith.constant 0 : i32
    %c0_i32_1 = arith.constant 0 : i32
    return %c0_i32, %c0_i32_0 : i32, i32
  }
  func.func @transform_9(%arg0: i32) -> (i32, i32) {
    %c0_i32 = arith.constant 0 : i32
    %c0_i32_0 = arith.constant 0 : i32
    %c0_i32_1 = arith.constant 0 : i32
    return %c0_i32, %c0_i32_0 : i32, i32
  }
  func.func @transform_10(%arg0: i32) -> (i32, i32) {
    %c0_i32 = arith.constant 0 : i32
    %c0_i32_0 = arith.constant 0 : i32
    %c0_i32_1 = arith.constant 0 : i32
    return %c0_i32, %c0_i32_0 : i32, i32
  }
  func.func @transform_11(%arg0: i32) -> (i32, i32) {
    %c0_i32 = arith.constant 0 : i32
    %c0_i32_0 = arith.constant 0 : i32
    %c0_i32_1 = arith.constant 0 : i32
    return %c0_i32, %c0_i32_0 : i32, i32
  }
  func.func @transform_12(%arg0: i32) -> (i32, i32) {
    %c0_i32 = arith.constant 0 : i32
    %c0_i32_0 = arith.constant 0 : i32
    %c0_i32_1 = arith.constant 0 : i32
    return %c0_i32, %c0_i32_0 : i32, i32
  }
  func.func @transform_13(%arg0: i32) -> (i32, i32) {
    %c0_i32 = arith.constant 0 : i32
    %c0_i32_0 = arith.constant 0 : i32
    %c0_i32_1 = arith.constant 0 : i32
    return %c0_i32, %c0_i32_0 : i32, i32
  }
  func.func @transform_14(%arg0: i32) -> (i32, i32) {
    %c0_i32 = arith.constant 0 : i32
    %c0_i32_0 = arith.constant 0 : i32
    %c0_i32_1 = arith.constant 0 : i32
    return %c0_i32, %c0_i32_0 : i32, i32
  }
  func.func @transform_15(%arg0: i32) -> (i32, i32) {
    %c0_i32 = arith.constant 0 : i32
    %c0_i32_0 = arith.constant 0 : i32
    %c0_i32_1 = arith.constant 0 : i32
    return %c0_i32, %c0_i32_0 : i32, i32
  }
}

</mosaic_0001>

<bundles_post_ra>
// kernel: squeeze.1
= control target key start
LH: loop header
LB: loop body
LE: loop exit
PB: predicated region body
PF: predicated region fallthrough
CT: control target
= control target key end

     0   :  { %s58_s8 = smov 126   ;;  %vm7_vm0 = vcmask 15360   ;;  %s59_s11 = smov 120   ;;  %s104_s0 = inlined_call_operand.vmem [shape: f32[14], index: 0, kind: input, shape index: {}]   ;;  %s105_s1 = inlined_call_operand.vmem [shape: f32[7,2], index: 1, kind: output, shape index: {}]  }
   0x1   :  { %v4_v0 = vld [vmem:[%s104_s0] sm:$0x1]  ;;  %s57_s0 = smov 122   ;;  %s60_s12 = smov 124  }
   0x2   :  { %5 = vst [vmem:[#allocation0] sm:$0x1] %v4_v0  ;;  %s61_s13 = smov 116   ;;  %s62_s14 = smov 118  }
   0x9   :  { %v21_v1 = vld [vmem:[#allocation0] sm:$0x1]  }
   0xa   :  { %v9_v2 = vld [vmem:[#allocation0] sm:$0x1]   ;;  %22 = vrot.lane.b32.xlu1 %v21_v1, %s57_s0 }
   0xb   :  { %10 = vrot.lane.b32.xlu0 %v9_v2, %s58_s8  ;;  %v27_v3 = vld [vmem:[#allocation0] sm:$0x1]  }
   0xc   :  { %v15_v4 = vld [vmem:[#allocation0] sm:$0x1]  }
   0xd   :  { %v6_v5 = vld [vmem:[#allocation0] sm:$0x1]  }
   0xe   :  { %8 = vst.msk [vmem:[%s105_s1] sm:$0x1] %vm7_vm0, %v6_v5   ;;  %28 = vrot.lane.b32.xlu1 %v27_v3, %s59_s11  ;;  %v39_v6 = vld [vmem:[#allocation0] sm:$0x1]  }
   0xf   :  { %16 = vrot.lane.b32.xlu0 %v15_v4, %s60_s12  ;;  %v33_v7 = vld [vmem:[#allocation0] sm:$0x1]  }
  0x12   :  { %40 = vrot.lane.b32.xlu1 %v39_v6, %s61_s13 }
  0x13   :  { %34 = vrot.lane.b32.xlu0 %v33_v7, %s62_s14 }
  0x7c   :  { %v23_v8 = vpop.permute.xlu1 %22  }
  0x7d   :  { %v11_v9 = vpop.permute.xlu0 %10   ;;  %47 = vst.msk [vmem:[%s105_s1 + $0x3] sm:$0x1] %vm7_vm0, %v23_v8  }
  0x7e   :  { %45 = vst.msk [vmem:[%s105_s1 + $0x1] sm:$0x1] %vm7_vm0, %v11_v9  }
  0x80   :  { %v29_v10 = vpop.permute.xlu1 %28  }
  0x81   :  { %v17_v11 = vpop.permute.xlu0 %16   ;;  %48 = vst.msk [vmem:[%s105_s1 + $0x4] sm:$0x1] %vm7_vm0, %v29_v10  }
  0x82   :  { %46 = vst.msk [vmem:[%s105_s1 + $0x2] sm:$0x1] %vm7_vm0, %v17_v11  }
  0x84   :  { %v41_v12 = vpop.permute.xlu1 %40  }
  0x85   :  { %v35_v13 = vpop.permute.xlu0 %34   ;;  %50 = vst.msk [vmem:[%s105_s1 + $0x6] sm:$0x1] %vm7_vm0, %v41_v12  }
  0x86   :  { %49 = vst.msk [vmem:[%s105_s1 + $0x5] sm:$0x1] %vm7_vm0, %v35_v13  }

// kernel: _lambda_.1
= control target key start
LH: loop header
LB: loop body
LE: loop exit
PB: predicated region body
PF: predicated region fallthrough
CT: control target
= control target key end

     0   :  { %21 = vsyncpa [#allocation3], 0  ;;  %v5751_v60 = vmov 0   ;;  %s7407_s0 = inlined_call_operand.vmem [shape: f32[32,256], index: 0, kind: input, shape index: {}]   ;;  %s7408_s1 = inlined_call_operand.vmem [shape: bf16[256,128], index: 1, kind: input, shape index: {}]   ;;  %s7409_s2 = inlined_call_operand.vmem [shape: bf16[128,512], index: 2, kind: input, shape index: {}]   ;;  %s7410_s3 = inlined_call_operand.vmem [shape: f32[32,8], index: 3, kind: input, shape index: {}]   ;;  %s7411_s4 = inlined_call_operand.vmem [shape: bf16[2,128,512], index: 4, kind: input, shape index: {}]   ;;  %s7412_s5 = inlined_call_operand.vmem [shape: bf16[2,128,128], index: 5, kind: input, shape index: {}]   ;;  %s7413_s6 = inlined_call_operand.vmem [shape: bf16[512,896], index: 6, kind: input, shape index: {}]   ;;  %s7414_s7 = inlined_call_operand.vmem [shape: f32[1,896], index: 7, kind: input, shape index: {}]   ;;  %s7415_s8 = inlined_call_operand.vmem [shape: f32[7,128], index: 8, kind: input, shape index: {}]   ;;  %s7416_s9 = inlined_call_operand.vmem [shape: f32[128,128], index: 9, kind: input, shape index: {}]   ;;  %s7417_s10 = inlined_call_operand.vmem [shape: f32[1,128], index: 10, kind: input, shape index: {}]   ;;  %s7418_s11 = inlined_call_operand.vmem [shape: f32[14,128], index: 11, kind: output, shape index: {0}]   ;;  %s7419_s12 = inlined_call_operand.vmem [shape: f32[32,128], index: 12, kind: output, shape index: {1}]   ;;  %s7420_s13 = inlined_call_operand.hbm [shape: f32[8,128], index: 13, kind: output, shape index: {2}]   ;;  %s7421_s14 = inlined_call_operand.hbm [shape: f32[32,128], index: 14, kind: output, shape index: {3}]   ;;  %s7422_s15 = inlined_call_operand.vmem [shape: f32[32,512], index: 15, kind: output, shape index: {4}]  }
   0x1   :  { %v5126_v0 = vld [vmem:[%s7408_s1 + $0x40] sm:$0xff]   ;;  %v5128_v2 = vld [vmem:[%s7408_s1 + $0x48] sm:$0xff]   ;;  %v5130_v4 = vld [vmem:[%s7408_s1 + $0x50] sm:$0xff]   ;;  %465 = vmatprep.mubr.bf16.mxu1 %v5751_v60 }
   0x2   :  { %v5127_v1 = vld [vmem:[%s7408_s1] sm:$0xff]   ;;  %4866 = vmatprep.subr.bf16.mxu0 %v5126_v0  ;;  %v5129_v3 = vld [vmem:[%s7408_s1 + $0x8] sm:$0xff]   ;;  %v5131_v5 = vld [vmem:[%s7408_s1 + $0x10] sm:$0xff]  }
   0x3   :  { %4867 = vmatpush3.bf16.msra.mxu0 %v5127_v1  ;;  %v5132_v6 = vld [vmem:[%s7408_s1 + $0x58] sm:$0xff]   ;;  %v5134_v8 = vld [vmem:[%s7408_s1 + $0x60] sm:$0xff]   ;;  %v5136_v10 = vld [vmem:[%s7408_s1 + $0x68] sm:$0xff]  }
   0x4   :  { %4868 = vmatprep.subr.bf16.mxu0 %v5128_v2  ;;  %v5133_v7 = vld [vmem:[%s7408_s1 + $0x18] sm:$0xff]   ;;  %v5135_v9 = vld [vmem:[%s7408_s1 + $0x20] sm:$0xff]   ;;  %v47_v11 = vld [vmem:[%s7407_s0 + $0x8] sm:$0xff] }
   0x5   :  { %v49_v12 = vld [vmem:[%s7407_s0 + $0x18] sm:$0xff]  ;;  %v5137_v14 = vld [vmem:[%s7408_s1 + $0x28] sm:$0xff]   ;;  %v5142_v15 = vld [vmem:[%s7409_s2 + $0x4] ss:$16 sps:$4 sm:$0xff]  }
   0x6   :  { %v55_v13 = vpack.c.bf16 %v49_v12, %v47_v11  ;;  %v5138_v16 = vld [vmem:[%s7408_s1 + $0x70] sm:$0xff]   ;;  %433 = vmatprep.subr.bf16.mxu1 %v5142_v15  ;;  %v5140_v20 = vld [vmem:[%s7408_s1 + $0x78] sm:$0xff]   ;;  %v46_v24 = vld [vmem:[%s7407_s0] sm:$0xff] }
   0x7   :  { %4869 = vmatpush3.bf16.msra.mxu0 %v5129_v3  ;;  %v5147_v17 = vld [vmem:[%s7409_s2] ss:$16 sps:$4 sm:$0xff]   ;;  %v5148_v18 = vld [vmem:[%s7409_s2 + $0x24] ss:$16 sps:$4 sm:$0xff]   ;;  %v5141_v23 = vld [vmem:[%s7408_s1 + $0x38] sm:$0xff]  }
   0x8   :  { %4870 = vmatprep.subr.bf16.mxu0 %v5130_v4  ;;  %218 = vmatprep.mubr.bf16.mxu0 %v55_v13  ;;  %v5139_v19 = vld [vmem:[%s7408_s1 + $0x30] sm:$0xff]   ;;  %v51_v26 = vld [vmem:[%s7407_s0 + $0x28] sm:$0xff]  ;;  %v53_v27 = vld [vmem:[%s7407_s0 + $0x38] sm:$0xff] }
   0x9   :  { %434 = vmatpush1.bf16.msra.mxu1 %v5147_v17  ;;  %v5153_v21 = vld [vmem:[%s7409_s2 + $0x20] ss:$16 sps:$4 sm:$0xff]   ;;  %v5154_v22 = vld [vmem:[%s7409_s2 + $0x44] ss:$16 sps:$4 sm:$0xff]   ;;  %v5146_v29 = vld [vmem:[%s7409_s2 + $0xc] ss:$16 sps:$4 sm:$0xff]   ;;  %v57_v32 = vpack.c.bf16 %v53_v27, %v51_v26 }
   0xa   :  { %435 = vmatprep.subr.bf16.mxu1 %v5148_v18  ;;  %v48_v25 = vld [vmem:[%s7407_s0 + $0x10] sm:$0xff]  ;;  %v5144_v33 = vld [vmem:[%s7409_s2 + $0x8] ss:$16 sps:$4 sm:$0xff]   ;;  %v5152_v34 = vld [vmem:[%s7409_s2 + $0x2c] ss:$16 sps:$4 sm:$0xff]  }
   0xb   :  { %4871 = vmatpush3.bf16.msra.mxu0 %v5131_v5  ;;  %v5159_v28 = vld [vmem:[%s7409_s2 + $0x40] ss:$16 sps:$4 sm:$0xff]   ;;  %v5160_v30 = vld [vmem:[%s7409_s2 + $0x64] ss:$16 sps:$4 sm:$0xff]   ;;  %v54_v31 = vpack.c.bf16 %v48_v25, %v46_v24  ;;  %v5150_v38 = vld [vmem:[%s7409_s2 + $0x28] ss:$16 sps:$4 sm:$0xff]  }
   0xc   :  { %4872 = vmatprep.subr.bf16.mxu0 %v5132_v6  ;;  %v5165_v35 = vld [vmem:[%s7409_s2 + $0x60] ss:$16 sps:$4 sm:$0xff]   ;;  %v5166_v39 = vld [vmem:[%s7409_s2 + $0x84] ss:$16 sps:$4 sm:$0xff]   ;;  %v5158_v40 = vld [vmem:[%s7409_s2 + $0x4c] ss:$16 sps:$4 sm:$0xff]  }
   0xd   :  { %436 = vmatpush1.bf16.msra.mxu1 %v5153_v21  ;;  %v50_v36 = vld [vmem:[%s7407_s0 + $0x20] sm:$0xff]  ;;  %v52_v37 = vld [vmem:[%s7407_s0 + $0x30] sm:$0xff]  ;;  %v5156_v43 = vld [vmem:[%s7409_s2 + $0x48] ss:$16 sps:$4 sm:$0xff]  }
   0xe   :  { %437 = vmatprep.subr.bf16.mxu1 %v5154_v22  ;;  %v5171_v41 = vld [vmem:[%s7409_s2 + $0x80] ss:$16 sps:$4 sm:$0xff]   ;;  %v5172_v42 = vld [vmem:[%s7409_s2 + $0xa4] ss:$16 sps:$4 sm:$0xff]   ;;  %v56_v44 = vpack.c.bf16 %v52_v37, %v50_v36  ;;  %v5164_v45 = vld [vmem:[%s7409_s2 + $0x6c] ss:$16 sps:$4 sm:$0xff]  }
   0xf   :  { %4873 = vmatpush3.bf16.msra.mxu0 %v5133_v7  ;;  %v5177_v46 = vld [vmem:[%s7409_s2 + $0xa0] ss:$16 sps:$4 sm:$0xff]   ;;  %v5162_v47 = vld [vmem:[%s7409_s2 + $0x68] ss:$16 sps:$4 sm:$0xff]   ;;  %v5170_v48 = vld [vmem:[%s7409_s2 + $0x8c] ss:$16 sps:$4 sm:$0xff]  }
  0x10   :  { %4874 = vmatprep.subr.bf16.mxu0 %v5134_v8  ;;  %v5168_v49 = vld [vmem:[%s7409_s2 + $0x88] ss:$16 sps:$4 sm:$0xff]   ;;  %v5176_v50 = vld [vmem:[%s7409_s2 + $0xac] ss:$16 sps:$4 sm:$0xff]   ;;  %v5178_v52 = vld [vmem:[%s7409_s2 + $0xc4] ss:$16 sps:$4 sm:$0xff]  }
  0x11   :  { %438 = vmatpush1.bf16.msra.mxu1 %v5159_v28  ;;  %v5174_v51 = vld [vmem:[%s7409_s2 + $0xa8] ss:$16 sps:$4 sm:$0xff]   ;;  %v5182_v53 = vld [vmem:[%s7409_s2 + $0xcc] ss:$16 sps:$4 sm:$0xff]   ;;  %v5183_v55 = vld [vmem:[%s7409_s2 + $0xc0] ss:$16 sps:$4 sm:$0xff]  }
  0x12   :  { %439 = vmatprep.subr.bf16.mxu1 %v5160_v30  ;;  %v5180_v54 = vld [vmem:[%s7409_s2 + $0xc8] ss:$16 sps:$4 sm:$0xff]   ;;  %v5184_v56 = vld [vmem:[%s7409_s2 + $0xe4] ss:$16 sps:$4 sm:$0xff]   ;;  %v5188_v57 = vld [vmem:[%s7409_s2 + $0xec] ss:$16 sps:$4 sm:$0xff]  }
  0x13   :  { %4875 = vmatpush3.bf16.msra.mxu0 %v5135_v9  ;;  %v5186_v58 = vld [vmem:[%s7409_s2 + $0xe8] ss:$16 sps:$4 sm:$0xff]   ;;  %v5189_v59 = vld [vmem:[%s7409_s2 + $0xe0] ss:$16 sps:$4 sm:$0xff]  }
  0x14   :  { %4876 = vmatprep.subr.bf16.mxu0 %v5136_v10 }
  0x15   :  { %440 = vmatpush1.bf16.msra.mxu1 %v5165_v35 }
  0x16   :  { %441 = vmatprep.subr.bf16.mxu1 %v5166_v39 }
  0x17   :  { %4877 = vmatpush3.bf16.msra.mxu0 %v5137_v14 }
  0x18   :  { %4878 = vmatprep.subr.bf16.mxu0 %v5138_v16 }
  0x19   :  { %442 = vmatpush1.bf16.msra.mxu1 %v5171_v41 }
  0x1a   :  { %443 = vmatprep.subr.bf16.mxu1 %v5172_v42 }
  0x1b   :  { %4879 = vmatpush3.bf16.msra.mxu0 %v5139_v19 }
  0x1c   :  { %4880 = vmatprep.subr.bf16.mxu0 %v5140_v20 }
  0x1d   :  { %444 = vmatpush1.bf16.msra.mxu1 %v5177_v46 }
  0x1e   :  { %445 = vmatprep.subr.bf16.mxu1 %v5178_v52 }
  0x1f   :  { %4881 = vmatpush3.bf16.msra.mxu0 %v5141_v23 }
  0x20   :  { %486 = vmatprep.subr.bf16.mxu0 %v5146_v29 }
  0x21   :  { %446 = vmatpush1.bf16.msra.mxu1 %v5183_v55 }
  0x22   :  { %219 = vmatmul.mubr.bf16.vlgmr.msra.gmra.mrb[0].mxu0 %v54_v31  ;;  %447 = vmatprep.subr.bf16.mxu1 %v5184_v56 }
  0x23   :  { %226 = vmatprep.mubr.bf16.mxu0 %v57_v32  ;;  %487 = vmatpush1.bf16.msra.mxu0 %v5144_v33 }
  0x24   :  { %488 = vmatprep.subr.bf16.mxu0 %v5152_v34 }
  0x25   :  { %448 = vmatpush1.bf16.msra.mxu1 %v5189_v59 }
  0x27   :  { %489 = vmatpush1.bf16.msra.mxu0 %v5150_v38 }
  0x28   :  { %490 = vmatprep.subr.bf16.mxu0 %v5158_v40 }
  0x2a   :  { %227 = vmatmul.mubr.bf16.gmra.mrb[4].mxu0 %v56_v44 }
  0x2b   :  { %491 = vmatpush1.bf16.msra.mxu0 %v5156_v43  ;;  %518 = vmatprep.mubr.bf16.mxu0 %v5751_v60 }
  0x2c   :  { %492 = vmatprep.subr.bf16.mxu0 %v5164_v45 }
  0x2f   :  { %493 = vmatpush1.bf16.msra.mxu0 %v5162_v47 }
  0x30   :  { %494 = vmatprep.subr.bf16.mxu0 %v5170_v48 }
  0x33   :  { %495 = vmatpush1.bf16.msra.mxu0 %v5168_v49 }
  0x34   :  { %496 = vmatprep.subr.bf16.mxu0 %v5176_v50 }
  0x37   :  { %497 = vmatpush1.bf16.msra.mxu0 %v5174_v51 }
  0x38   :  { %498 = vmatprep.subr.bf16.mxu0 %v5182_v53 }
  0x3b   :  { %499 = vmatpush1.bf16.msra.mxu0 %v5180_v54 }
  0x3c   :  { %500 = vmatprep.subr.bf16.mxu0 %v5188_v57 }
  0x3f   :  { %501 = vmatpush1.bf16.msra.mxu0 %v5186_v58 }
  0x40   :  { %22 = vsyncpa [#allocation5], 0  ;;  %v5192_v15 = vld [vmem:[%s7411_s4 + $0xc] ss:$16 sps:$4 sm:$0xff]   ;;  %v5190_v16 = vld [vmem:[%s7411_s4 + $0x8] ss:$16 sps:$4 sm:$0xff]  }
  0x41   :  { %1026 = vmatprep.subr.bf16.mxu0 %v5192_v15  ;;  %v5195_v17 = vld [vmem:[%s7411_s4 + $0x2c] ss:$16 sps:$4 sm:$0xff]   ;;  %v5193_v18 = vld [vmem:[%s7411_s4 + $0x28] ss:$16 sps:$4 sm:$0xff]   ;;  %v650_v31 = vld [vmem:[%s7410_s3] sm:$0xff]  ;;  %vm654_vm0 = vcmask 64512  }
  0x42   :  { %v5198_v19 = vld [vmem:[%s7411_s4 + $0x4c] ss:$16 sps:$4 sm:$0xff]   ;;  %v5196_v20 = vld [vmem:[%s7411_s4 + $0x48] ss:$16 sps:$4 sm:$0xff]   ;;  %vm636_vm1 = vcmask 1040384   ;;  %vm638_vm2 = vcmask 1041408  }
  0x43   :  { %v5201_v21 = vld [vmem:[%s7411_s4 + $0x6c] ss:$16 sps:$4 sm:$0xff]   ;;  %v5199_v22 = vld [vmem:[%s7411_s4 + $0x68] ss:$16 sps:$4 sm:$0xff]   ;;  %vm640_vm3 = vcmask 1042432   ;;  %vm642_vm4 = vcmask 1043456  }
  0x44   :  { %v5204_v23 = vld [vmem:[%s7411_s4 + $0x8c] ss:$16 sps:$4 sm:$0xff]   ;;  %v5202_v24 = vld [vmem:[%s7411_s4 + $0x88] ss:$16 sps:$4 sm:$0xff]   ;;  %vm644_vm5 = vcmask 1044480   ;;  %vm646_vm6 = vcmask 1045504  }
  0x45   :  { %v5207_v25 = vld [vmem:[%s7411_s4 + $0xac] ss:$16 sps:$4 sm:$0xff]   ;;  %v5205_v26 = vld [vmem:[%s7411_s4 + $0xa8] ss:$16 sps:$4 sm:$0xff]   ;;  %vm648_vm7 = vcmask 1046528   ;;  %s5754_s19 = smov [#allocation2]  }
  0x46   :  { %v5210_v27 = vld [vmem:[%s7411_s4 + $0xcc] ss:$16 sps:$4 sm:$0xff]   ;;  %v5208_v28 = vld [vmem:[%s7411_s4 + $0xc8] ss:$16 sps:$4 sm:$0xff]   ;;  %s4419_s20 = sshll.u32 %s5754_s19, 4  ;;  %s5755_s21 = smov [#allocation4]   ;;  %s4420_s20 = int_to_ptr.vmem [resolvable:$true] %s4419_s20 }
  0x47   :  { %v5211_v29 = vld [vmem:[%s7411_s4 + $0xe8] ss:$16 sps:$4 sm:$0xff]   ;;  %v5213_v30 = vld [vmem:[%s7411_s4 + $0xec] ss:$16 sps:$4 sm:$0xff]   ;;  %s4428_s22 = sshll.u32 %s5755_s21, 4  ;;  %s5703_s23 = scalar_lea.vmem %s4420_s20, 128  ;;  %s7373_s22 = int_to_ptr.vmem [resolvable:$true] %s4428_s22 }
  0x48   :  { %p5704_p0 = scmp.ne.s32.totalorder %s4420_s20, %s5703_s23  ;;  %p5708_p1 = scmp.lt.s32.totalorder %s4420_s20, %s4420_s20 }
  0x49   :  { %p5709_p2 = scmp.lt.s32.totalorder %s5703_s23, %s5703_s23 }
  0x4b   :  { %p5710_p3 = por %p5709_p2, %p5708_p1 }
  0x4d   :  { %p5711_p4 = pnand %p5710_p3, %p5704_p0 }
  0xf5   :  { %v4882_v61 = vpop.f32.mrb[0].mxu0 }
  0xf6   :  { %v4883_v62 = vpop.f32.mrb[1].mxu0 }
  0xf7   :  { %v4884_v63 = vadd.f32 %v4883_v62, %v4882_v61  ;;  %v4885_v0 = vpop.f32.mrb[2].mxu0 }
  0xf8   :  { %v4886_v1 = vpop.f32.mrb[3].mxu0 }
  0xf9   :  { %v4887_v2 = vadd.f32 %v4886_v1, %v4885_v0  ;;  %v235_v3 = vmax.f32 %v4884_v63, 0.0 }
  0xfb   :  { %v236_v4 = vmax.f32 %v4887_v2, 0.0 }
  0xfd   :  { %v239_v5 = vpack.c.bf16 %v236_v4, %v235_v3  ;;  %v4888_v6 = vpop.f32.mrb[4].mxu0 }
  0xfe   :  { %v4889_v7 = vpop.f32.mrb[5].mxu0 }
  0xff   :  { %v4890_v8 = vadd.f32 %v4889_v7, %v4888_v6  ;;  %v4891_v9 = vpop.f32.mrb[6].mxu0  ;;  %466 = vmatmul.mubr.bf16.vlgmr.msra.gmra.mrb[0].mxu1 %v239_v5  ;;  %519 = vmatmul.mubr.bf16.vlgmr.msra.gmra.mrb[8].mxu0 %v239_v5 }
 0x100   :  { %v4892_v10 = vpop.f32.mrb[7].mxu0  ;;  %475 = vmatprep.mubr.bf16.mxu1 %v5751_v60  ;;  %528 = vmatprep.mubr.bf16.mxu0 %v5751_v60 }
 0x101   :  { %v4893_v11 = vadd.f32 %v4892_v10, %v4891_v9  ;;  %v237_v12 = vmax.f32 %v4890_v8, 0.0  ;;  %1027 = vmatpush1.bf16.msra.mxu0 %v5190_v16 }
 0x102   :  { %1028 = vmatprep.subr.bf16.mxu0 %v5195_v17 }
 0x103   :  { %v238_v13 = vmax.f32 %v4893_v11, 0.0 }
 0x105   :  { %v240_v14 = vpack.c.bf16 %v238_v13, %v237_v12  ;;  %1029 = vmatpush1.bf16.msra.mxu0 %v5193_v18 }
 0x106   :  { %1030 = vmatprep.subr.bf16.mxu0 %v5198_v19 }
 0x107   :  { %476 = vmatmul.mubr.bf16.gmra.mrb[4].mxu1 %v240_v14  ;;  %529 = vmatmul.mubr.bf16.gmra.mrb[12].mxu0 %v240_v14 }
 0x108   :  { %1058 = vmatprep.mubr.bf16.mxu0 %v5751_v60  ;;  %4985 = vmatprep.mubr.msk.f32.mxu1 %vm654_vm0, %v650_v31 }
 0x109   :  { %1031 = vmatpush1.bf16.msra.mxu0 %v5196_v20 }
 0x10a   :  { %1032 = vmatprep.subr.bf16.mxu0 %v5201_v21 }
 0x10d   :  { %1033 = vmatpush1.bf16.msra.mxu0 %v5199_v22 }
 0x10e   :  { %1034 = vmatprep.subr.bf16.mxu0 %v5204_v23 }
 0x111   :  { %1035 = vmatpush1.bf16.msra.mxu0 %v5202_v24 }
 0x112   :  { %1036 = vmatprep.subr.bf16.mxu0 %v5207_v25 }
 0x115   :  { %1037 = vmatpush1.bf16.msra.mxu0 %v5205_v26 }
 0x116   :  { %1038 = vmatprep.subr.bf16.mxu0 %v5210_v27 }
 0x119   :  { %1039 = vmatpush1.bf16.msra.mxu0 %v5208_v28 }
 0x11a   :  { %1040 = vmatprep.subr.bf16.mxu0 %v5213_v30 }
 0x11d   :  { %1041 = vmatpush1.bf16.msra.mxu0 %v5211_v29 }
 0x1d2   :  { %v467_v32 = vpop.f32.mrb[0].mxu1  ;;  %v520_v33 = vpop.f32.mrb[8].mxu0 }
 0x1d3   :  { %v539_v34 = vmax.f32 %v467_v32, 0.0  ;;  %v541_v35 = vmax.f32 %v520_v33, 0.0  ;;  %v469_v36 = vpop.f32.mrb[1].mxu1  ;;  %v522_v37 = vpop.f32.mrb[9].mxu0 }
 0x1d4   :  { %v540_v38 = vmax.f32 %v469_v36, 0.0  ;;  %v542_v39 = vmax.f32 %v522_v37, 0.0  ;;  %v471_v40 = vpop.f32.mrb[2].mxu1  ;;  %v524_v41 = vpop.f32.mrb[10].mxu0 }
 0x1d5   :  { %555 = vst [vmem:[%s7422_s15] sm:$0xff] %v539_v34  ;;  %557 = vst [vmem:[%s7422_s15 + $0x10] sm:$0xff] %v541_v35  ;;  %v543_v42 = vmax.f32 %v471_v40, 0.0  ;;  %v545_v43 = vmax.f32 %v524_v41, 0.0  ;;  %v473_v44 = vpop.f32.mrb[3].mxu1  ;;  %v526_v45 = vpop.f32.mrb[11].mxu0 }
 0x1d6   :  { %556 = vst [vmem:[%s7422_s15 + $0x8] sm:$0xff] %v540_v38  ;;  %558 = vst [vmem:[%s7422_s15 + $0x18] sm:$0xff] %v542_v39  ;;  %v544_v46 = vmax.f32 %v473_v44, 0.0  ;;  %v546_v47 = vmax.f32 %v526_v45, 0.0 }
 0x1d7   :  { %559 = vst [vmem:[%s7422_s15 + $0x20] sm:$0xff] %v543_v42  ;;  %v571_v48 = vadd.f32 %v543_v42, %v539_v34  ;;  %561 = vst [vmem:[%s7422_s15 + $0x30] sm:$0xff] %v545_v43  ;;  %v585_v49 = vadd.f32 %v545_v43, %v541_v35 }
 0x1d8   :  { %560 = vst [vmem:[%s7422_s15 + $0x28] sm:$0xff] %v544_v46  ;;  %v578_v50 = vadd.f32 %v544_v46, %v540_v38  ;;  %562 = vst [vmem:[%s7422_s15 + $0x38] sm:$0xff] %v546_v47  ;;  %v592_v51 = vadd.f32 %v546_v47, %v542_v39 }
 0x1d9   :  { %v572_v52 = vrot.slane %v571_v48, 4  ;;  %v586_v53 = vrot.slane %v585_v49, 4 }
 0x1da   :  { %v579_v54 = vrot.slane %v578_v50, 4  ;;  %v593_v55 = vrot.slane %v592_v51, 4  ;;  %v477_v56 = vpop.f32.mrb[4].mxu1  ;;  %v530_v57 = vpop.f32.mrb[12].mxu0 }
 0x1db   :  { %v573_v58 = vadd.f32 %v572_v52, %v571_v48  ;;  %v587_v59 = vadd.f32 %v586_v53, %v585_v49  ;;  %v547_v61 = vmax.f32 %v477_v56, 0.0  ;;  %v549_v62 = vmax.f32 %v530_v57, 0.0  ;;  %v479_v63 = vpop.f32.mrb[5].mxu1  ;;  %v532_v0 = vpop.f32.mrb[13].mxu0 }
 0x1dc   :  { %v580_v1 = vadd.f32 %v579_v54, %v578_v50  ;;  %v594_v2 = vadd.f32 %v593_v55, %v592_v51  ;;  %v548_v3 = vmax.f32 %v479_v63, 0.0  ;;  %v550_v4 = vmax.f32 %v532_v0, 0.0  ;;  %v481_v5 = vpop.f32.mrb[6].mxu1  ;;  %v534_v6 = vpop.f32.mrb[14].mxu0 }
 0x1dd   :  { %v574_v7 = vrot.slane %v573_v58, 2  ;;  %v588_v8 = vrot.slane %v587_v59, 2  ;;  %563 = vst [vmem:[%s7422_s15 + $0x40] sm:$0xff] %v547_v61  ;;  %565 = vst [vmem:[%s7422_s15 + $0x50] sm:$0xff] %v549_v62  ;;  %v551_v9 = vmax.f32 %v481_v5, 0.0  ;;  %v553_v10 = vmax.f32 %v534_v6, 0.0 }
 0x1de   :  { %v483_v11 = vpop.f32.mrb[7].mxu1  ;;  %v536_v12 = vpop.f32.mrb[15].mxu0  ;;  %v581_v13 = vrot.slane %v580_v1, 2  ;;  %v595_v14 = vrot.slane %v594_v2, 2  ;;  %564 = vst [vmem:[%s7422_s15 + $0x48] sm:$0xff] %v548_v3  ;;  %566 = vst [vmem:[%s7422_s15 + $0x58] sm:$0xff] %v550_v4 }
 0x1df   :  { %v552_v15 = vmax.f32 %v483_v11, 0.0  ;;  %v554_v16 = vmax.f32 %v536_v12, 0.0  ;;  %v575_v17 = vadd.f32 %v574_v7, %v573_v58  ;;  %v589_v18 = vadd.f32 %v588_v8, %v587_v59  ;;  %567 = vst [vmem:[%s7422_s15 + $0x60] sm:$0xff] %v551_v9  ;;  %569 = vst [vmem:[%s7422_s15 + $0x70] sm:$0xff] %v553_v10  ;;  %v5216_v8 = vld [vmem:[%s7411_s4 + $0x4] ss:$16 sps:$4 sm:$0xff]  }
 0x1e0   :  { %v604_v19 = vadd.f32 %v551_v9, %v547_v61  ;;  %v618_v20 = vadd.f32 %v553_v10, %v549_v62  ;;  %v582_v21 = vadd.f32 %v581_v13, %v580_v1  ;;  %v596_v22 = vadd.f32 %v595_v14, %v594_v2  ;;  %v651_v10 = vld [vmem:[%s7410_s3 + $0x8] sm:$0xff]  ;;  %v5214_v11 = vld [vmem:[%s7411_s4] ss:$16 sps:$4 sm:$0xff]   ;;  %v5219_v13 = vld [vmem:[%s7411_s4 + $0x24] ss:$16 sps:$4 sm:$0xff]  }
 0x1e1   :  { %568 = vst [vmem:[%s7422_s15 + $0x68] sm:$0xff] %v552_v15  ;;  %v611_v23 = vadd.f32 %v552_v15, %v548_v3  ;;  %570 = vst [vmem:[%s7422_s15 + $0x78] sm:$0xff] %v554_v16  ;;  %v625_v24 = vadd.f32 %v554_v16, %v550_v4  ;;  %v576_v25 = vrot.slane %v575_v17, 1  ;;  %v590_v26 = vrot.slane %v589_v18, 1  ;;  %v652_v14 = vld [vmem:[%s7410_s3 + $0x10] sm:$0xff]  ;;  %v653_v15 = vld [vmem:[%s7410_s3 + $0x18] sm:$0xff] }
 0x1e2   :  { %v605_v27 = vrot.slane %v604_v19, 4  ;;  %v619_v28 = vrot.slane %v618_v20, 4  ;;  %v583_v29 = vrot.slane %v582_v21, 1  ;;  %v597_v30 = vrot.slane %v596_v22, 1  ;;  %v5217_v16 = vld [vmem:[%s7411_s4 + $0x20] ss:$16 sps:$4 sm:$0xff]  }
 0x1e3   :  { %v612_v31 = vrot.slane %v611_v23, 4  ;;  %v626_v32 = vrot.slane %v625_v24, 4  ;;  %v577_v33 = vadd.f32 %v576_v25, %v575_v17  ;;  %v591_v34 = vadd.f32 %v590_v26, %v589_v18  ;;  %v5222_v17 = vld [vmem:[%s7411_s4 + $0x44] ss:$16 sps:$4 sm:$0xff]   ;;  %v5220_v18 = vld [vmem:[%s7411_s4 + $0x40] ss:$16 sps:$4 sm:$0xff]  }
 0x1e4   :  { %v606_v35 = vadd.f32 %v605_v27, %v604_v19  ;;  %v620_v36 = vadd.f32 %v619_v28, %v618_v20  ;;  %v584_v37 = vadd.f32 %v583_v29, %v582_v21  ;;  %v598_v38 = vadd.f32 %v597_v30, %v596_v22  ;;  %v5225_v19 = vld [vmem:[%s7411_s4 + $0x64] ss:$16 sps:$4 sm:$0xff]   ;;  %v5223_v20 = vld [vmem:[%s7411_s4 + $0x60] ss:$16 sps:$4 sm:$0xff]   ;;  %v5239_v30 = vld [vmem:[%s7412_s5 + $0x8] sm:$0xff]  }
 0x1e5   :  { %v613_v39 = vadd.f32 %v612_v31, %v611_v23  ;;  %v627_v40 = vadd.f32 %v626_v32, %v625_v24  ;;  %v600_v41 = vmul.f32 0.0625, %v577_v33  ;;  %v602_v47 = vmul.f32 0.0625, %v591_v34  ;;  %v5228_v21 = vld [vmem:[%s7411_s4 + $0x84] ss:$16 sps:$4 sm:$0xff]   ;;  %v5226_v22 = vld [vmem:[%s7411_s4 + $0x80] ss:$16 sps:$4 sm:$0xff]  }
 0x1e6   :  { %v607_v42 = vrot.slane %v606_v35, 2  ;;  %v621_v43 = vrot.slane %v620_v36, 2  ;;  %v601_v44 = vmul.f32 0.0625, %v584_v37  ;;  %v603_v51 = vmul.f32 0.0625, %v598_v38  ;;  %v5231_v23 = vld [vmem:[%s7411_s4 + $0xa4] ss:$16 sps:$4 sm:$0xff]  }
 0x1e7   :  { %v614_v45 = vrot.slane %v613_v39, 2  ;;  %v628_v46 = vrot.slane %v627_v40, 2  ;;  %v5229_v24 = vld [vmem:[%s7411_s4 + $0xa0] ss:$16 sps:$4 sm:$0xff]   ;;  %v5234_v25 = vld [vmem:[%s7411_s4 + $0xc4] ss:$16 sps:$4 sm:$0xff]  }
 0x1e8   :  { %v608_v48 = vadd.f32 %v607_v42, %v606_v35  ;;  %v622_v49 = vadd.f32 %v621_v43, %v620_v36  ;;  %v637_v50 = vsel %vm636_vm1, %v600_v41, %v601_v44  ;;  %v5232_v26 = vld [vmem:[%s7411_s4 + $0xc0] ss:$16 sps:$4 sm:$0xff]   ;;  %v5237_v27 = vld [vmem:[%s7411_s4 + $0xe4] ss:$16 sps:$4 sm:$0xff]   ;;  %v5752_v44 = vmov 1966171168  }
 0x1e9   :  { %v615_v52 = vadd.f32 %v614_v45, %v613_v39  ;;  %v629_v53 = vadd.f32 %v628_v46, %v627_v40  ;;  %v639_v56 = vsel %vm638_vm2, %v637_v50, %v602_v47  ;;  %v5235_v28 = vld [vmem:[%s7411_s4 + $0xe0] ss:$16 sps:$4 sm:$0xff]   ;;  %v1185_v45 = vunpack.c.l.s4 %v5752_v44  ;;  %v5241_v47 = vld [vmem:[%s7412_s5 + $0x18] sm:$0xff]  }
 0x1ea   :  { %v609_v54 = vrot.slane %v608_v48, 1  ;;  %v623_v55 = vrot.slane %v622_v49, 1  ;;  %v641_v59 = vsel %vm640_vm3, %v639_v56, %v603_v51  ;;  %v5238_v29 = vld [vmem:[%s7412_s5] sm:$0xff]   ;;  %v5240_v43 = vld [vmem:[%s7412_s5 + $0x10] sm:$0xff]   ;;  %v1187_v46 = vlaneseq }
 0x1eb   :  { %v616_v57 = vrot.slane %v615_v52, 1  ;;  %v630_v58 = vrot.slane %v629_v53, 1  ;;  %v5242_v50 = vld [vmem:[%s7412_s5 + $0x20] sm:$0xff]   ;;  %vm1552_vm3 = vcmask 1042434  }
 0x1ec   :  { %v610_v61 = vadd.f32 %v609_v54, %v608_v48  ;;  %v624_v62 = vadd.f32 %v623_v55, %v622_v49  ;;  %v1186_v48 = vunpack.c.0.s8 %v1185_v45  ;;  %v6200_v49 = vshrl.u32 %v1187_v46, 7 }
 0x1ed   :  { %v617_v63 = vadd.f32 %v616_v57, %v615_v52  ;;  %v631_v0 = vadd.f32 %v630_v58, %v629_v53  ;;  %v5243_v52 = vld [vmem:[%s7412_s5 + $0x28] sm:$0xff]   ;;  %v5244_v58 = vld [vmem:[%s7412_s5 + $0x30] sm:$0xff]  }
 0x1ee   :  { %v632_v1 = vmul.f32 0.0625, %v610_v61  ;;  %v634_v3 = vmul.f32 0.0625, %v624_v62  ;;  %v6206_v51 = vsub.s32 %v1186_v48, %v6200_v49 }
 0x1ef   :  { %v633_v2 = vmul.f32 0.0625, %v617_v63  ;;  %v635_v5 = vmul.f32 0.0625, %v631_v0 }
 0x1f0   :  { %v643_v4 = vsel %vm642_vm4, %v641_v59, %v632_v1  ;;  %v6216_v59 = vsub.s32 0, %v6200_v49 }
 0x1f1   :  { %v645_v6 = vsel %vm644_vm5, %v643_v4, %v633_v2  ;;  %vm1554_vm5 = vcmask 1043459  }
 0x1f2   :  { %v647_v7 = vsel %vm646_vm6, %v645_v6, %v634_v3 }
 0x1f3   :  { %v6119_v9 = vsel %vm648_vm7, %v647_v7, %v635_v5  ;;  %v5245_v5 = vld [vmem:[%s7412_s5 + $0x38] sm:$0xff]  }
 0x1f4   :  { %4983 = vmatprep.subr.mxu1 %v6119_v9  ;;  %v792_v12 = vpack.c.bf16 %v6119_v9, %v6119_v9 }
 0x1f5   :  { %4984 = vmatpush3.msra.mxu1 %v6119_v9 }
 0x1f6   :  { %4986 = vmatmul.mubr.msk.f32.vlgmr.msra.gmra.mrb[8].mxu1 %vm654_vm0, %v651_v10  ;;  %985 = vmatprep.subr.bf16.mxu1 %v5216_v8 }
 0x1f7   :  { %1059 = vmatmul.mubr.bf16.vlgmr.msra.gmra.mrb[16].mxu0 %v792_v12  ;;  %986 = vmatpush1.bf16.msra.mxu1 %v5214_v11 }
 0x1f8   :  { %4988 = vmatprep.mubr.msk.f32.mxu1 %vm654_vm0, %v652_v14  ;;  %987 = vmatprep.subr.bf16.mxu1 %v5219_v13 }
 0x1f9   :  { %1793 = vmatprep.mubr.bf16.mxu0 %v5751_v60 }
 0x1fa   :  { %4989 = vmatmul.mubr.msk.f32.gmra.mrb[10].mxu1 %vm654_vm0, %v653_v15  ;;  %vm1550_vm0 = vcmask 1041409  }
 0x1fb   :  { %988 = vmatpush1.bf16.msra.mxu1 %v5217_v16  ;;  %1017 = vmatprep.mubr.bf16.mxu1 %v5751_v60 }
 0x1fc   :  { %989 = vmatprep.subr.bf16.mxu1 %v5222_v17 }
 0x1ff   :  { %990 = vmatpush1.bf16.msra.mxu1 %v5220_v18 }
 0x200   :  { %991 = vmatprep.subr.bf16.mxu1 %v5225_v19 }
 0x203   :  { %992 = vmatpush1.bf16.msra.mxu1 %v5223_v20 }
 0x204   :  { %993 = vmatprep.subr.bf16.mxu1 %v5228_v21 }
 0x207   :  { %994 = vmatpush1.bf16.msra.mxu1 %v5226_v22 }
 0x208   :  { %995 = vmatprep.subr.bf16.mxu1 %v5231_v23 }
 0x20b   :  { %996 = vmatpush1.bf16.msra.mxu1 %v5229_v24 }
 0x20c   :  { %997 = vmatprep.subr.bf16.mxu1 %v5234_v25 }
 0x20f   :  { %998 = vmatpush1.bf16.msra.mxu1 %v5232_v26 }
 0x210   :  { %999 = vmatprep.subr.bf16.mxu1 %v5237_v27 }
 0x213   :  { %1000 = vmatpush1.bf16.msra.mxu1 %v5235_v28 }
 0x214   :  { %4991 = vmatprep.subr.bf16.mxu1 %v5238_v29 }
 0x216   :  { %1018 = vmatmul.mubr.bf16.vlgmr.msra.gmra.mrb[12].mxu1 %v792_v12 }
 0x217   :  { %4992 = vmatpush3.bf16.msra.mxu1 %v5238_v29 }
 0x218   :  { %4993 = vmatprep.subr.bf16.mxu1 %v5239_v30 }
 0x21b   :  { %4994 = vmatpush3.bf16.msra.mxu1 %v5239_v30 }
 0x21c   :  { %4995 = vmatprep.subr.bf16.mxu1 %v5240_v43 }
 0x21f   :  { %4996 = vmatpush3.bf16.msra.mxu1 %v5240_v43 }
 0x220   :  { %4997 = vmatprep.subr.bf16.mxu1 %v5241_v47 }
 0x223   :  { %4998 = vmatpush3.bf16.msra.mxu1 %v5241_v47 }
 0x224   :  { %4999 = vmatprep.subr.bf16.mxu1 %v5242_v50 }
 0x227   :  { %5000 = vmatpush3.bf16.msra.mxu1 %v5242_v50 }
 0x228   :  { %5001 = vmatprep.subr.bf16.mxu1 %v5243_v52 }
 0x22b   :  { %5002 = vmatpush3.bf16.msra.mxu1 %v5243_v52 }
 0x22c   :  { %5003 = vmatprep.subr.bf16.mxu1 %v5244_v58 }
 0x22f   :  { %5004 = vmatpush3.bf16.msra.mxu1 %v5244_v58  ;;  %v5246_v58 = vld [vmem:[%s7411_s4 + $0x100] ss:$16 sps:$4 sm:$0xff]  }
 0x230   :  { %5005 = vmatprep.subr.bf16.mxu1 %v5245_v5 }
 0x233   :  { %5006 = vmatpush3.bf16.msra.mxu1 %v5245_v5  ;;  %v5258_v5 = vld [vmem:[%s7411_s4 + $0x140] ss:$16 sps:$4 sm:$0xff]  }
 0x2c9   :  { %v4987_v31 = vpop.f32.mrb[8].mxu1 }
 0x2ca   :  { %v6190_v32 = vpop.f32.mrb[16].mxu0  ;;  %v733_v33 = vpop.f32.mrb[9].mxu1  ;;  %v753_v40 = vmul.f32 %v4987_v31, %v4987_v31 }
 0x2cb   :  { %v6192_v34 = vpop.f32.mrb[17].mxu0  ;;  %v752_v35 = vmul.f32 %v733_v33, %v733_v33 }
 0x2cc   :  { %v1064_v36 = vpop.f32.mrb[18].mxu0 }
 0x2cd   :  { %v1065_v37 = vpop.f32.mrb[19].mxu0  ;;  %756 = vadd.xlane.f32.xlu0 %v752_v35  ;;  %v4990_v38 = vpop.f32.mrb[10].mxu1 }
 0x2ce   :  { %v743_v39 = vpop.f32.mrb[11].mxu1  ;;  %v755_v42 = vmul.f32 %v4990_v38, %v4990_v38 }
 0x2cf   :  { %v754_v41 = vmul.f32 %v743_v39, %v743_v39 }
 0x2d1   :  { %758 = vadd.xlane.f32.xlu0 %v753_v40  ;;  %760 = vadd.xlane.f32.xlu1 %v754_v41 }
 0x2d5   :  { %762 = vadd.xlane.f32.xlu1 %v755_v42 }
 0x2e9   :  { %v1019_v53 = vpop.f32.mrb[12].mxu1 }
 0x2ea   :  { %v1183_v54 = vcombine.high %v1019_v53, %v1019_v53  ;;  %v1190_v55 = vrot.slane %v1019_v53, %v6206_v51  ;;  %v1021_v56 = vpop.f32.mrb[13].mxu1 }
 0x2eb   :  { %v1023_v57 = vpop.f32.mrb[14].mxu1  ;;  %v1273_v6 = vcombine.high %v1021_v56, %v1021_v56 }
 0x2ec   :  { %v1197_v61 = vrot.slane %v1183_v54, %v6206_v51  ;;  %v1198_v62 = vcombine.high %v1190_v55, %v1190_v55  ;;  %v1206_v63 = vrot.slane %v1190_v55, %v6206_v51  ;;  %v1024_v0 = vpop.f32.mrb[15].mxu1 }
 0x2ed   :  { %v5257_v0 = vld [vmem:[%s7411_s4 + $0x12c] ss:$16 sps:$4 sm:$0xff]  }
 0x2ee   :  { %v1199_v1 = vcombine.high %v1197_v61, %v1197_v61  ;;  %v1213_v2 = vrot.slane %v1197_v61, %v6206_v51  ;;  %v1220_v3 = vrot.slane %v1198_v62, %v6206_v51  ;;  %v1228_v4 = vcombine.high %v1206_v63, %v1206_v63  ;;  %v5248_v61 = vld [vmem:[%s7411_s4 + $0x104] ss:$16 sps:$4 sm:$0xff]   ;;  %v5249_v62 = vld [vmem:[%s7411_s4 + $0x108] ss:$16 sps:$4 sm:$0xff]  }
 0x2ef   :  { %v1235_v7 = vrot.slane %v1206_v63, %v6216_v59  ;;  %v5251_v63 = vld [vmem:[%s7411_s4 + $0x10c] ss:$16 sps:$4 sm:$0xff]   ;;  %1761 = vmatprep.subr.bf16.mxu0 %v5248_v61 }
 0x2f0   :  { %v1227_v8 = vrot.slane %v1199_v1, %v6206_v51  ;;  %v1230_v10 = vcombine.high %v1220_v3, %v1220_v3  ;;  %v1251_v11 = vrot.slane %v1213_v2, %v6216_v59  ;;  %v1239_v12 = vrot.slane %v1220_v3, %v6216_v59  ;;  %1762 = vmatpush1.bf16.msra.mxu0 %v5246_v58  ;;  %v5252_v1 = vld [vmem:[%s7411_s4 + $0x120] ss:$16 sps:$4 sm:$0xff]   ;;  %v5260_v3 = vld [vmem:[%s7411_s4 + $0x144] ss:$16 sps:$4 sm:$0xff]  }
 0x2f1   :  { %v6229_v13 = vadd.f32 %v1235_v7, %v1021_v56  ;;  %v1229_v14 = vcombine.high %v1213_v2, %v1213_v2  ;;  %v1243_v15 = vrot.slane %v1228_v4, %v6216_v59  ;;  %1802 = vmatprep.subr.bf16.mxu1 %v5251_v63  ;;  %v5255_v2 = vld [vmem:[%s7411_s4 + $0x128] ss:$16 sps:$4 sm:$0xff]   ;;  %v5263_v4 = vld [vmem:[%s7411_s4 + $0x14c] ss:$16 sps:$4 sm:$0xff]   ;;  %v5266_v7 = vld [vmem:[%s7411_s4 + $0x164] ss:$16 sps:$4 sm:$0xff]  }
 0x2f2   :  { %v1255_v16 = vrot.slane %v1227_v8, %v6216_v59  ;;  %v6233_v17 = vadd.f32 %v1273_v6, %v1251_v11  ;;  %v6235_v18 = vadd.f32 %v1239_v12, %v1021_v56  ;;  %v1231_v19 = vcombine.high %v1227_v8, %v1227_v8  ;;  %v5269_v8 = vld [vmem:[%s7411_s4 + $0x16c] ss:$16 sps:$4 sm:$0xff]   ;;  %v5267_v11 = vld [vmem:[%s7411_s4 + $0x168] ss:$16 sps:$4 sm:$0xff]   ;;  %v5272_v12 = vld [vmem:[%s7411_s4 + $0x184] ss:$16 sps:$4 sm:$0xff]  }
 0x2f3   :  { %v1259_v20 = vrot.slane %v1229_v14, %v6216_v59  ;;  %v1247_v21 = vrot.slane %v1230_v10, %v6216_v59  ;;  %v6239_v22 = vadd.f32 %v1243_v15, %v1021_v56  ;;  %v5264_v10 = vld [vmem:[%s7411_s4 + $0x160] ss:$16 sps:$4 sm:$0xff]   ;;  %v5275_v14 = vld [vmem:[%s7411_s4 + $0x18c] ss:$16 sps:$4 sm:$0xff]  }
 0x2f4   :  { %v6241_v23 = vadd.f32 %v1273_v6, %v1255_v16  ;;  %v1263_v24 = vrot.slane %v1231_v19, %v6216_v59  ;;  %v5270_v15 = vld [vmem:[%s7411_s4 + $0x180] ss:$16 sps:$4 sm:$0xff]   ;;  %v5273_v16 = vld [vmem:[%s7411_s4 + $0x188] ss:$16 sps:$4 sm:$0xff]   ;;  %v5278_v19 = vld [vmem:[%s7411_s4 + $0x1a4] ss:$16 sps:$4 sm:$0xff]  }
 0x2f5   :  { %v6244_v25 = vadd.f32 %v1273_v6, %v1259_v20  ;;  %v6246_v26 = vadd.f32 %v1247_v21, %v1021_v56  ;;  %v5281_v20 = vld [vmem:[%s7411_s4 + $0x1ac] ss:$16 sps:$4 sm:$0xff]   ;;  %v5276_v21 = vld [vmem:[%s7411_s4 + $0x1a0] ss:$16 sps:$4 sm:$0xff]  }
 0x2f6   :  { %v6248_v27 = vadd.f32 %v1273_v6, %v1263_v24  ;;  %v5261_v6 = vld [vmem:[%s7411_s4 + $0x148] ss:$16 sps:$4 sm:$0xff]  }
 0x2f7   :  { %v5279_v24 = vld [vmem:[%s7411_s4 + $0x1a8] ss:$16 sps:$4 sm:$0xff]  }
 0x35a   :  { %v757_v28 = vpop.xlane.xlu0 %756 }
 0x35b   :  { %5622 = vrsqrt.f32 %v757_v28  ;;  %vm766_vm8 = vcmp.eq.f32.partialorder %v757_v28, inf  ;;  %v769_v41 = vand.u32 2147483648, %v757_v28  ;;  %vm768_vm10 = vcmp.eq.f32.partialorder %v757_v28, 0.0 }
 0x35e   :  { %v759_v29 = vpop.xlane.xlu0 %758  ;;  %v761_v30 = vpop.xlane.xlu1 %760 }
 0x35f   :  { %5624 = vrsqrt.f32 %v759_v29  ;;  %vm773_vm9 = vcmp.eq.f32.partialorder %v759_v29, inf  ;;  %v776_v42 = vand.u32 2147483648, %v759_v29  ;;  %vm775_vm11 = vcmp.eq.f32.partialorder %v759_v29, 0.0 }
 0x360   :  { %5626 = vrsqrt.f32 %v761_v30  ;;  %vm780_vm12 = vcmp.eq.f32.partialorder %v761_v30, inf  ;;  %v783_v52 = vand.u32 2147483648, %v761_v30  ;;  %vm782_vm14 = vcmp.eq.f32.partialorder %v761_v30, 0.0 }
 0x362   :  { %v763_v31 = vpop.xlane.xlu1 %762 }
 0x363   :  { %5628 = vrsqrt.f32 %v763_v31  ;;  %vm787_vm13 = vcmp.eq.f32.partialorder %v763_v31, inf  ;;  %v790_v53 = vand.u32 2147483648, %v763_v31  ;;  %vm789_vm15 = vcmp.eq.f32.partialorder %v763_v31, 0.0 }
 0x365   :  { %v5623_v33 = vpop.eup %5622 }
 0x366   :  { %v765_v35 = vmul.f32 %v5623_v33, %v757_v28  ;;  %v5290_v33 = vld [vmem:[%s7411_s4 + $0x1e4] ss:$16 sps:$4 sm:$0xff]  }
 0x368   :  { %v767_v38 = vsel %vm766_vm8, %v757_v28, %v765_v35  ;;  %v5284_v28 = vld [vmem:[%s7411_s4 + $0x1c4] ss:$16 sps:$4 sm:$0xff]   ;;  %v5293_v35 = vld [vmem:[%s7411_s4 + $0x1ec] ss:$16 sps:$4 sm:$0xff]   ;;  %vm1556_vm8 = vcmask 1044484  }
 0x369   :  { %v5625_v36 = vpop.eup %5624  ;;  %v6250_v45 = vsel %vm768_vm10, %v769_v41, %v767_v38  ;;  %v6362_v38 = vld [vmem:[%s7412_s5 + $0x40] sm:$0xff]   ;;  %vm1560_vm10 = vcmask 1046534  }
 0x36a   :  { %v5627_v37 = vpop.eup %5626  ;;  %v772_v39 = vmul.f32 %v5625_v36, %v759_v29  ;;  %v5288_v36 = vld [vmem:[%s7411_s4 + $0x1e0] ss:$16 sps:$4 sm:$0xff]  }
 0x36b   :  { %v779_v40 = vmul.f32 %v5627_v37, %v761_v30  ;;  %v5291_v37 = vld [vmem:[%s7411_s4 + $0x1e8] ss:$16 sps:$4 sm:$0xff]  }
 0x36c   :  { %v774_v43 = vsel %vm773_vm9, %v759_v29, %v772_v39  ;;  %v5287_v29 = vld [vmem:[%s7411_s4 + $0x1cc] ss:$16 sps:$4 sm:$0xff]   ;;  %vm1558_vm9 = vcmask 1045509  }
 0x36d   :  { %v5629_v44 = vpop.eup %5628  ;;  %v6252_v46 = vsel %vm775_vm11, %v776_v42, %v774_v43  ;;  %v781_v50 = vsel %vm780_vm12, %v761_v30, %v779_v40  ;;  %v5282_v30 = vld [vmem:[%s7411_s4 + $0x1c0] ss:$16 sps:$4 sm:$0xff]   ;;  %vm1562_vm11 = vcmask 1047559  }
 0x36e   :  { %v786_v47 = vmul.f32 %v5629_v44, %v763_v31  ;;  %v1067_v48 = vpack.c.bf16 %v6252_v46, %v6250_v45  ;;  %v6256_v55 = vsel %vm782_vm14, %v783_v52, %v781_v50 }
 0x370   :  { %5007 = vmatprep.mubr.bf16.mxu1 %v1067_v48  ;;  %v788_v54 = vsel %vm787_vm13, %v763_v31, %v786_v47  ;;  %v5285_v31 = vld [vmem:[%s7411_s4 + $0x1c8] ss:$16 sps:$4 sm:$0xff]  }
 0x371   :  { %v6258_v56 = vsel %vm789_vm15, %v790_v53, %v788_v54 }
 0x372   :  { %v1068_v57 = vpack.c.bf16 %v6258_v56, %v6256_v55 }
 0x374   :  { %5008 = vmatmul.mubr.bf16.vlgmr.msra.gmra.mrb[16].mxu1 %v1068_v57 }
 0x375   :  { %1834 = vmatprep.mubr.bf16.mxu1 %v5751_v60  ;;  %v5254_v60 = vld [vmem:[%s7411_s4 + $0x124] ss:$16 sps:$4 sm:$0xff]   ;;  %1803 = vmatpush1.bf16.msra.mxu1 %v5249_v62 }
 0x376   :  { %1763 = vmatprep.subr.bf16.mxu0 %v5254_v60  ;;  %1804 = vmatprep.subr.bf16.mxu1 %v5257_v0 }
 0x377   :  { %1764 = vmatpush1.bf16.msra.mxu0 %v5252_v1 }
 0x378   :  { %1765 = vmatprep.subr.bf16.mxu0 %v5260_v3 }
 0x379   :  { %1805 = vmatpush1.bf16.msra.mxu1 %v5255_v2 }
 0x37a   :  { %1806 = vmatprep.subr.bf16.mxu1 %v5263_v4 }
 0x37b   :  { %1766 = vmatpush1.bf16.msra.mxu0 %v5258_v5 }
 0x37c   :  { %1767 = vmatprep.subr.bf16.mxu0 %v5266_v7 }
 0x37d   :  { %1807 = vmatpush1.bf16.msra.mxu1 %v5261_v6 }
 0x37e   :  { %1808 = vmatprep.subr.bf16.mxu1 %v5269_v8 }
 0x37f   :  { %1768 = vmatpush1.bf16.msra.mxu0 %v5264_v10 }
 0x380   :  { %1769 = vmatprep.subr.bf16.mxu0 %v5272_v12 }
 0x381   :  { %1809 = vmatpush1.bf16.msra.mxu1 %v5267_v11 }
 0x382   :  { %1810 = vmatprep.subr.bf16.mxu1 %v5275_v14 }
 0x383   :  { %1770 = vmatpush1.bf16.msra.mxu0 %v5270_v15 }
 0x384   :  { %1771 = vmatprep.subr.bf16.mxu0 %v5278_v19 }
 0x385   :  { %1811 = vmatpush1.bf16.msra.mxu1 %v5273_v16 }
 0x386   :  { %1812 = vmatprep.subr.bf16.mxu1 %v5281_v20 }
 0x387   :  { %1772 = vmatpush1.bf16.msra.mxu0 %v5276_v21 }
 0x388   :  { %1773 = vmatprep.subr.bf16.mxu0 %v5284_v28 }
 0x389   :  { %1813 = vmatpush1.bf16.msra.mxu1 %v5279_v24 }
 0x38a   :  { %1814 = vmatprep.subr.bf16.mxu1 %v5287_v29 }
 0x38b   :  { %1774 = vmatpush1.bf16.msra.mxu0 %v5282_v30 }
 0x38c   :  { %1775 = vmatprep.subr.bf16.mxu0 %v5290_v33 }
 0x38d   :  { %1815 = vmatpush1.bf16.msra.mxu1 %v5285_v31 }
 0x38e   :  { %1816 = vmatprep.subr.bf16.mxu1 %v5293_v35 }
 0x38f   :  { %1776 = vmatpush1.bf16.msra.mxu0 %v5288_v36 }
 0x390   :  { %5011 = vmatprep.subr.bf16.mxu0 %v6362_v38 }
 0x391   :  { %1817 = vmatpush1.bf16.msra.mxu1 %v5291_v37 }
 0x447   :  { %v5009_v39 = vpop.f32.mrb[16].mxu1 }
 0x448   :  { %v1289_v40 = vcombine.high %v5009_v39, %v5009_v39  ;;  %v1299_v41 = vadd.f32 %v5009_v39, %v6233_v17  ;;  %v1167_v42 = vpop.f32.mrb[17].mxu1 }
 0x449   :  { %v1287_v43 = vcombine.high %v1167_v42, %v1167_v42  ;;  %v1295_v44 = vadd.f32 %v6229_v13, %v1167_v42  ;;  %v5010_v47 = vpop.f32.mrb[18].mxu1 }
 0x44a   :  { %v1300_v48 = vadd.f32 %v1289_v40, %v6241_v23  ;;  %v1290_v50 = vcombine.high %v5010_v47, %v5010_v47  ;;  %v1301_v52 = vadd.f32 %v5010_v47, %v6244_v25  ;;  %v1170_v53 = vpop.f32.mrb[19].mxu1  ;;  %v1307_v61 = vmax.f32 %v1299_v41, 0.0 }
 0x44b   :  { %v1296_v54 = vadd.f32 %v1287_v43, %v6235_v18  ;;  %v1288_v57 = vcombine.high %v1170_v53, %v1170_v53  ;;  %v1297_v58 = vadd.f32 %v6239_v22, %v1170_v53  ;;  %v1303_v63 = vmax.f32 %v1295_v44, 0.0 }
 0x44c   :  { %v1308_v62 = vmax.f32 %v1300_v48, 0.0  ;;  %v1302_v17 = vadd.f32 %v1290_v50, %v6248_v27  ;;  %v1309_v1 = vmax.f32 %v1301_v52, 0.0 }
 0x44d   :  { %v1304_v60 = vmax.f32 %v1296_v54, 0.0  ;;  %v1298_v13 = vadd.f32 %v1288_v57, %v6246_v26  ;;  %v1305_v3 = vmax.f32 %v1297_v58, 0.0 }
 0x44e   :  { %v1321_v0 = vcombine.low %v1307_v61, %v1308_v62  ;;  %v1310_v23 = vmax.f32 %v1302_v17, 0.0 }
 0x44f   :  { %v1319_v2 = vcombine.low %v1303_v63, %v1304_v60  ;;  %v1306_v25 = vmax.f32 %v1298_v13, 0.0 }
 0x450   :  { %v6374_v4 = vadd.f32 %v1321_v0, %v6256_v55  ;;  %v1322_v18 = vcombine.low %v1309_v1, %v1310_v23 }
 0x451   :  { %v6377_v22 = vadd.f32 %v1319_v2, %v6250_v45  ;;  %v1320_v5 = vcombine.low %v1305_v3, %v1306_v25 }
 0x452   :  { %v4545_v27 = vmul.f32 -1.442695, %v6374_v4  ;;  %v6381_v6 = vadd.f32 %v1322_v18, %v6258_v56 }
 0x453   :  { %v4543_v26 = vmul.f32 -1.442695, %v6377_v22  ;;  %v6385_v7 = vadd.f32 %v1320_v5, %v6252_v46 }
 0x454   :  { %5630 = vpow2.f32 %v4545_v27  ;;  %v4546_v8 = vmul.f32 -1.442695, %v6381_v6 }
 0x455   :  { %5632 = vpow2.f32 %v4543_v26  ;;  %v4544_v55 = vmul.f32 -1.442695, %v6385_v7 }
 0x456   :  { %5634 = vpow2.f32 %v4546_v8 }
 0x457   :  { %5636 = vpow2.f32 %v4544_v55 }
 0x45e   :  { %v5631_v45 = vpop.eup %5630 }
 0x45f   :  { %v5633_v10 = vpop.eup %5632  ;;  %v1345_v11 = vadd.f32 1.0, %v5631_v45 }
 0x460   :  { %v5635_v12 = vpop.eup %5634  ;;  %v1343_v14 = vadd.f32 1.0, %v5633_v10 }
 0x461   :  { %v5637_v56 = vpop.eup %5636  ;;  %5638 = vrcp.f32 %v1345_v11  ;;  %v1346_v15 = vadd.f32 1.0, %v5635_v12 }
 0x462   :  { %5640 = vrcp.f32 %v1343_v14  ;;  %v1344_v16 = vadd.f32 1.0, %v5637_v56 }
 0x463   :  { %5642 = vrcp.f32 %v1346_v15 }
 0x464   :  { %5644 = vrcp.f32 %v1344_v16 }
 0x46b   :  { %v5639_v46 = vpop.eup %5638 }
 0x46c   :  { %v5641_v19 = vpop.eup %5640  ;;  %v1359_v20 = vmul.f32 1.442695, %v5639_v46 }
 0x46d   :  { %v5643_v21 = vpop.eup %5642  ;;  %v1355_v24 = vmul.f32 1.442695, %v5641_v19 }
 0x46e   :  { %v5645_v28 = vpop.eup %5644  ;;  %5646 = vpow2.f32 %v1359_v20  ;;  %v1361_v29 = vmul.f32 1.442695, %v5643_v21 }
 0x46f   :  { %5648 = vpow2.f32 %v1355_v24  ;;  %v1357_v30 = vmul.f32 1.442695, %v5645_v28 }
 0x470   :  { %5650 = vpow2.f32 %v1361_v29 }
 0x471   :  { %5652 = vpow2.f32 %v1357_v30 }
 0x478   :  { %v6389_v31 = vpop.eup %5646 }
 0x479   :  { %v6391_v33 = vpop.eup %5648  ;;  %v1369_v35 = vcombine.high %v6389_v31, %v6389_v31  ;;  %v1403_v36 = vsel %vm642_vm4, %v6389_v31, 0.0 }
 0x47a   :  { %v6397_v37 = vpop.eup %5650  ;;  %v1404_v39 = vrot.slane %v1403_v36, 4  ;;  %v1367_v40 = vcombine.high %v6391_v33, %v6391_v33  ;;  %v1375_v41 = vsel %vm642_vm4, %v6391_v33, 0.0 }
 0x47b   :  { %v6403_v42 = vpop.eup %5652  ;;  %v1410_v43 = vsel %vm642_vm4, %v1369_v35, 0.0  ;;  %v1376_v44 = vrot.slane %v1375_v41, 4  ;;  %v1370_v47 = vcombine.high %v6397_v37, %v6397_v37  ;;  %v1417_v48 = vsel %vm642_vm4, %v6397_v37, 0.0 }
 0x47c   :  { %v1405_v50 = vadd.f32 %v1404_v39, %v1403_v36  ;;  %v1411_v52 = vrot.slane %v1410_v43, 4  ;;  %v1382_v53 = vsel %vm642_vm4, %v1367_v40, 0.0  ;;  %v1418_v54 = vrot.slane %v1417_v48, 4 }
 0x47d   :  { %v1377_v57 = vadd.f32 %v1376_v44, %v1375_v41  ;;  %v1383_v58 = vrot.slane %v1382_v53, 4  ;;  %v1424_v61 = vsel %vm642_vm4, %v1370_v47, 0.0  ;;  %v1368_v62 = vcombine.high %v6403_v42, %v6403_v42 }
 0x47e   :  { %v1406_v17 = vrot.slane %v1405_v50, 2  ;;  %v1412_v63 = vadd.f32 %v1411_v52, %v1410_v43  ;;  %v1419_v60 = vadd.f32 %v1418_v54, %v1417_v48  ;;  %v1425_v13 = vrot.slane %v1424_v61, 4 }
 0x47f   :  { %v1378_v0 = vrot.slane %v1377_v57, 2  ;;  %v1384_v1 = vadd.f32 %v1383_v58, %v1382_v53  ;;  %v1389_v23 = vsel %vm642_vm4, %v6403_v42, 0.0  ;;  %v1396_v2 = vsel %vm642_vm4, %v1368_v62, 0.0 }
 0x480   :  { %v1407_v3 = vadd.f32 %v1406_v17, %v1405_v50  ;;  %v1413_v25 = vrot.slane %v1412_v63, 2  ;;  %v1390_v18 = vrot.slane %v1389_v23, 4  ;;  %v1397_v5 = vrot.slane %v1396_v2, 4 }
 0x481   :  { %v1379_v27 = vadd.f32 %v1378_v0, %v1377_v57  ;;  %v1385_v26 = vrot.slane %v1384_v1, 2  ;;  %v1420_v8 = vrot.slane %v1419_v60, 2  ;;  %v1426_v55 = vadd.f32 %v1425_v13, %v1424_v61 }
 0x482   :  { %v1391_v45 = vadd.f32 %v1390_v18, %v1389_v23  ;;  %v1398_v10 = vadd.f32 %v1397_v5, %v1396_v2  ;;  %v1408_v11 = vrot.slane %v1407_v3, 1  ;;  %v1414_v12 = vadd.f32 %v1413_v25, %v1412_v63 }
 0x483   :  { %v1380_v14 = vrot.slane %v1379_v27, 1  ;;  %v1386_v56 = vadd.f32 %v1385_v26, %v1384_v1  ;;  %v1421_v15 = vadd.f32 %v1420_v8, %v1419_v60  ;;  %v1427_v16 = vrot.slane %v1426_v55, 2 }
 0x484   :  { %v1392_v46 = vrot.slane %v1391_v45, 2  ;;  %v1399_v19 = vrot.slane %v1398_v10, 2  ;;  %v1415_v20 = vrot.slane %v1414_v12, 1  ;;  %v1409_v35 = vadd.f32 %v1408_v11, %v1407_v3 }
 0x485   :  { %v1387_v21 = vrot.slane %v1386_v56, 1  ;;  %v1422_v24 = vrot.slane %v1421_v15, 1  ;;  %v1428_v28 = vadd.f32 %v1427_v16, %v1426_v55  ;;  %v1381_v39 = vadd.f32 %v1380_v14, %v1379_v27 }
 0x486   :  { %v1393_v29 = vadd.f32 %v1392_v46, %v1391_v45  ;;  %v1400_v30 = vadd.f32 %v1399_v19, %v1398_v10  ;;  %v1416_v36 = vadd.f32 %v1415_v20, %v1414_v12  ;;  %v4547_v17 = vcombine.high %v6192_v34, %v6192_v34 }
 0x487   :  { %v1388_v40 = vadd.f32 %v1387_v21, %v1386_v56  ;;  %v1429_v41 = vrot.slane %v1428_v28, 1  ;;  %v1423_v50 = vadd.f32 %v1422_v24, %v1421_v15  ;;  %v1457_v60 = vcombine.low %v6192_v34, %v6192_v34 }
 0x488   :  { %v1394_v43 = vrot.slane %v1393_v29, 1  ;;  %v1401_v44 = vrot.slane %v1400_v30, 1  ;;  %v1441_v47 = vcombine.low %v1409_v35, %v1416_v36 }
 0x489   :  { %v1439_v48 = vcombine.low %v1381_v39, %v1388_v40  ;;  %v1430_v52 = vadd.f32 %v1429_v41, %v1428_v28 }
 0x48a   :  { %v1395_v53 = vadd.f32 %v1394_v43, %v1393_v29  ;;  %v1402_v54 = vadd.f32 %v1401_v44, %v1400_v30  ;;  %5654 = vrcp.f32 %v1441_v47 }
 0x48b   :  { %v1442_v57 = vcombine.low %v1423_v50, %v1430_v52  ;;  %5656 = vrcp.f32 %v1439_v48 }
 0x48c   :  { %v1440_v58 = vcombine.low %v1395_v53, %v1402_v54 }
 0x48d   :  { %5658 = vrcp.f32 %v1442_v57 }
 0x48e   :  { %5660 = vrcp.f32 %v1440_v58 }
 0x494   :  { %v5655_v61 = vpop.eup %5654 }
 0x495   :  { %v5657_v62 = vpop.eup %5656  ;;  %v1452_v63 = vmul.f32 %v5655_v61, %v6389_v31 }
 0x496   :  { %v1448_v13 = vmul.f32 %v5657_v62, %v6391_v33 }
 0x497   :  { %v5659_v0 = vpop.eup %5658  ;;  %v1463_v1 = vmul.f32 %v4547_v17, %v1452_v63 }
 0x498   :  { %v5661_v23 = vpop.eup %5660  ;;  %v1454_v2 = vmul.f32 %v5659_v0, %v6397_v37  ;;  %v1461_v3 = vmul.f32 %v1457_v60, %v1448_v13 }
 0x499   :  { %v1450_v25 = vmul.f32 %v5661_v23, %v6403_v42  ;;  %v1471_v18 = vcombine.high %v1463_v1, %v1463_v1  ;;  %v1505_v5 = vsel %vm642_vm4, %v1463_v1, 0.0 }
 0x49a   :  { %v1464_v27 = vmul.f32 %v4547_v17, %v1454_v2  ;;  %v1469_v26 = vcombine.high %v1461_v3, %v1461_v3  ;;  %v1477_v31 = vsel %vm642_vm4, %v1461_v3, 0.0  ;;  %v1506_v8 = vrot.slane %v1505_v5, 4 }
 0x49b   :  { %v1462_v55 = vmul.f32 %v1457_v60, %v1450_v25  ;;  %v1478_v34 = vrot.slane %v1477_v31, 4  ;;  %v1512_v33 = vsel %vm642_vm4, %v1471_v18, 0.0 }
 0x49c   :  { %v1472_v45 = vcombine.high %v1464_v27, %v1464_v27  ;;  %v1484_v10 = vsel %vm642_vm4, %v1469_v26, 0.0  ;;  %v1507_v11 = vadd.f32 %v1506_v8, %v1505_v5  ;;  %v1513_v37 = vrot.slane %v1512_v33, 4 }
 0x49d   :  { %v1470_v12 = vcombine.high %v1462_v55, %v1462_v55  ;;  %v1479_v14 = vadd.f32 %v1478_v34, %v1477_v31  ;;  %v1485_v42 = vrot.slane %v1484_v10, 4  ;;  %v1491_v56 = vsel %vm642_vm4, %v1462_v55, 0.0 }
 0x49e   :  { %v1492_v15 = vrot.slane %v1491_v56, 4  ;;  %v1508_v16 = vrot.slane %v1507_v11, 2  ;;  %v1514_v46 = vadd.f32 %v1513_v37, %v1512_v33  ;;  %v1519_v19 = vsel %vm642_vm4, %v1464_v27, 0.0 }
 0x49f   :  { %v1480_v20 = vrot.slane %v1479_v14, 2  ;;  %v1486_v21 = vadd.f32 %v1485_v42, %v1484_v10  ;;  %v1498_v24 = vsel %vm642_vm4, %v1470_v12, 0.0  ;;  %v1520_v28 = vrot.slane %v1519_v19, 4 }
 0x4a0   :  { %v1493_v29 = vadd.f32 %v1492_v15, %v1491_v56  ;;  %v1499_v30 = vrot.slane %v1498_v24, 4  ;;  %v1509_v35 = vadd.f32 %v1508_v16, %v1507_v11  ;;  %v1515_v36 = vrot.slane %v1514_v46, 2 }
 0x4a1   :  { %v1481_v39 = vadd.f32 %v1480_v20, %v1479_v14  ;;  %v1487_v40 = vrot.slane %v1486_v21, 2  ;;  %v1521_v41 = vadd.f32 %v1520_v28, %v1519_v19  ;;  %v1526_v43 = vsel %vm642_vm4, %v1472_v45, 0.0 }
 0x4a2   :  { %v1494_v44 = vrot.slane %v1493_v29, 2  ;;  %v1500_v47 = vadd.f32 %v1499_v30, %v1498_v24  ;;  %v1516_v48 = vadd.f32 %v1515_v36, %v1514_v46  ;;  %v1527_v54 = vrot.slane %v1526_v43, 4 }
 0x4a3   :  { %v1482_v50 = vrot.slane %v1481_v39, 1  ;;  %v1488_v52 = vadd.f32 %v1487_v40, %v1486_v21  ;;  %v1522_v53 = vrot.slane %v1521_v41, 2  ;;  %v1510_v61 = vrot.slane %v1509_v35, 1  ;;  %v5300_v40 = vld [vmem:[%s7412_s5 + $0x70] sm:$0xff]  }
 0x4a4   :  { %v1495_v57 = vadd.f32 %v1494_v44, %v1493_v29  ;;  %v1501_v58 = vrot.slane %v1500_v47, 2  ;;  %v1528_v60 = vadd.f32 %v1527_v54, %v1526_v43  ;;  %v1517_v1 = vrot.slane %v1516_v48, 1  ;;  %v5304_v44 = vld [vmem:[%s7413_s6 + $0x4] ss:$28 sps:$4 sm:$0xff]   ;;  %v5308_v54 = vld [vmem:[%s7413_s6 + $0x38] ss:$28 sps:$4 sm:$0xff]  }
 0x4a5   :  { %v1483_v62 = vadd.f32 %v1482_v50, %v1481_v39  ;;  %v1489_v17 = vrot.slane %v1488_v52, 1  ;;  %v1523_v63 = vadd.f32 %v1522_v53, %v1521_v41  ;;  %v1511_v5 = vadd.f32 %v1510_v61, %v1509_v35  ;;  %v5295_v35 = vld [vmem:[%s7412_s5 + $0x48] sm:$0xff]   ;;  %v5298_v39 = vld [vmem:[%s7412_s5 + $0x60] sm:$0xff]   ;;  %v5301_v41 = vld [vmem:[%s7412_s5 + $0x78] sm:$0xff]   ;;  %3808 = vmatprep.subr.bf16.mxu1 %v5304_v44 }
 0x4a6   :  { %v1496_v13 = vrot.slane %v1495_v57, 1  ;;  %v1502_v0 = vadd.f32 %v1501_v58, %v1500_v47  ;;  %v1529_v3 = vrot.slane %v1528_v60, 2  ;;  %v1518_v55 = vadd.f32 %v1517_v1, %v1516_v48  ;;  %v5307_v47 = vld [vmem:[%s7413_s6 + $0xc] ss:$28 sps:$4 sm:$0xff]   ;;  %v5302_v48 = vld [vmem:[%s7413_s6] ss:$28 sps:$4 sm:$0xff]  }
 0x4a7   :  { %v1490_v23 = vadd.f32 %v1489_v17, %v1488_v52  ;;  %v1524_v2 = vrot.slane %v1523_v63, 1  ;;  %v1534_v26 = vmul.f32 0.25, %v1483_v62  ;;  %v1538_v14 = vmul.f32 0.25, %v1511_v5  ;;  %v5305_v50 = vld [vmem:[%s7413_s6 + $0x8] ss:$28 sps:$4 sm:$0xff]  }
 0x4a8   :  { %v1497_v25 = vadd.f32 %v1496_v13, %v1495_v57  ;;  %v1503_v18 = vrot.slane %v1502_v0, 1  ;;  %v1530_v27 = vadd.f32 %v1529_v3, %v1528_v60  ;;  %v1539_v42 = vmul.f32 0.25, %v1518_v55  ;;  %v5310_v52 = vld [vmem:[%s7413_s6 + $0x3c] ss:$28 sps:$4 sm:$0xff]   ;;  %v5313_v53 = vld [vmem:[%s7413_s6 + $0x44] ss:$28 sps:$4 sm:$0xff]  }
 0x4a9   :  { %v1535_v31 = vmul.f32 0.25, %v1490_v23  ;;  %v1525_v33 = vadd.f32 %v1524_v2, %v1523_v63  ;;  %v1533_v20 = vadd.f32 %v6190_v32, %v6119_v9  ;;  %v1843_v36 = vpack.c.bf16 %v6385_v7, %v6377_v22  ;;  %v5296_v9 = vld [vmem:[%s7412_s5 + $0x50] sm:$0xff]   ;;  %v5297_v32 = vld [vmem:[%s7412_s5 + $0x58] sm:$0xff]   ;;  %v5322_v63 = vld [vmem:[%s7413_s6 + $0xac] ss:$28 sps:$4 sm:$0xff]  }
 0x4aa   :  { %v1504_v8 = vadd.f32 %v1503_v18, %v1502_v0  ;;  %v1536_v34 = vmul.f32 0.25, %v1497_v25  ;;  %v1531_v45 = vrot.slane %v1530_v27, 1  ;;  %v1844_v43 = vpack.c.bf16 %v6381_v6, %v6374_v4  ;;  %v5311_v57 = vld [vmem:[%s7413_s6 + $0x40] ss:$28 sps:$4 sm:$0xff]   ;;  %v5316_v58 = vld [vmem:[%s7413_s6 + $0x74] ss:$28 sps:$4 sm:$0xff]  }
 0x4ab   :  { %v1551_v10 = vsel %vm1550_vm0, %v1535_v31, %v1534_v26  ;;  %v1540_v15 = vmul.f32 0.25, %v1525_v33  ;;  %v5319_v61 = vld [vmem:[%s7413_s6 + $0x7c] ss:$28 sps:$4 sm:$0xff]   ;;  %v5314_v62 = vld [vmem:[%s7413_s6 + $0x70] ss:$28 sps:$4 sm:$0xff]  }
 0x4ac   :  { %v1537_v11 = vmul.f32 0.25, %v1504_v8  ;;  %v1553_v37 = vsel %vm1552_vm3, %v1536_v34, %v1551_v10  ;;  %v1532_v12 = vadd.f32 %v1531_v45, %v1530_v27  ;;  %v5317_v17 = vld [vmem:[%s7413_s6 + $0x78] ss:$28 sps:$4 sm:$0xff]   ;;  %v5320_v13 = vld [vmem:[%s7413_s6 + $0xa8] ss:$28 sps:$4 sm:$0xff]  }
 0x4ad   :  { %v5325_v60 = vld [vmem:[%s7413_s6 + $0xb4] ss:$28 sps:$4 sm:$0xff]   ;;  %v5328_v1 = vld [vmem:[%s7413_s6 + $0xe4] ss:$28 sps:$4 sm:$0xff]   ;;  %v5331_v23 = vld [vmem:[%s7413_s6 + $0xec] ss:$28 sps:$4 sm:$0xff]  }
 0x4ae   :  { %v1555_v56 = vsel %vm1554_vm5, %v1537_v11, %v1553_v37  ;;  %v1541_v46 = vmul.f32 0.25, %v1532_v12  ;;  %v5323_v0 = vld [vmem:[%s7413_s6 + $0xb0] ss:$28 sps:$4 sm:$0xff]   ;;  %v5326_v2 = vld [vmem:[%s7413_s6 + $0xe0] ss:$28 sps:$4 sm:$0xff]  }
 0x4af   :  { %v1557_v16 = vsel %vm1556_vm8, %v1538_v14, %v1555_v56  ;;  %v5329_v3 = vld [vmem:[%s7413_s6 + $0xe8] ss:$28 sps:$4 sm:$0xff]   ;;  %v5334_v25 = vld [vmem:[%s7413_s6 + $0x11c] ss:$28 sps:$4 sm:$0xff]   ;;  %v5340_v26 = vld [vmem:[%s7413_s6 + $0x154] ss:$28 sps:$4 sm:$0xff]  }
 0x4b0   :  { %v1559_v19 = vsel %vm1558_vm9, %v1539_v42, %v1557_v16  ;;  %v5337_v18 = vld [vmem:[%s7413_s6 + $0x124] ss:$28 sps:$4 sm:$0xff]   ;;  %v5332_v5 = vld [vmem:[%s7413_s6 + $0x118] ss:$28 sps:$4 sm:$0xff]   ;;  %v5338_v8 = vld [vmem:[%s7413_s6 + $0x150] ss:$28 sps:$4 sm:$0xff]  }
 0x4b1   :  { %v1561_v21 = vsel %vm1560_vm10, %v1540_v15, %v1559_v19  ;;  %v5335_v27 = vld [vmem:[%s7413_s6 + $0x120] ss:$28 sps:$4 sm:$0xff]   ;;  %v5341_v55 = vld [vmem:[%s7413_s6 + $0x158] ss:$28 sps:$4 sm:$0xff]   ;;  %v5346_v34 = vld [vmem:[%s7413_s6 + $0x18c] ss:$28 sps:$4 sm:$0xff]  }
 0x4b2   :  { %v1563_v24 = vsel %vm1562_vm11, %v1541_v46, %v1561_v21  ;;  %v5343_v31 = vld [vmem:[%s7413_s6 + $0x15c] ss:$28 sps:$4 sm:$0xff]   ;;  %v5349_v33 = vld [vmem:[%s7413_s6 + $0x194] ss:$28 sps:$4 sm:$0xff]   ;;  %v5344_v45 = vld [vmem:[%s7413_s6 + $0x188] ss:$28 sps:$4 sm:$0xff]  }
 0x4b3   :  { %v1565_v28 = vadd.f32 %v1563_v24, %v1533_v20  ;;  %v5347_v10 = vld [vmem:[%s7413_s6 + $0x190] ss:$28 sps:$4 sm:$0xff]   ;;  %v5352_v11 = vld [vmem:[%s7413_s6 + $0x1c4] ss:$28 sps:$4 sm:$0xff]   ;;  %v5358_v42 = vld [vmem:[%s7413_s6 + $0x1fc] ss:$28 sps:$4 sm:$0xff]  }
 0x4b4   :  { %v5355_v37 = vld [vmem:[%s7413_s6 + $0x1cc] ss:$28 sps:$4 sm:$0xff]   ;;  %v5350_v12 = vld [vmem:[%s7413_s6 + $0x1c0] ss:$28 sps:$4 sm:$0xff]   ;;  %v5356_v15 = vld [vmem:[%s7413_s6 + $0x1f8] ss:$28 sps:$4 sm:$0xff]  }
 0x4b5   :  { %v6442_v29 = vmax.f32 %v1565_v28, 0.0  ;;  %v5353_v14 = vld [vmem:[%s7413_s6 + $0x1c8] ss:$28 sps:$4 sm:$0xff]   ;;  %v5359_v16 = vld [vmem:[%s7413_s6 + $0x200] ss:$28 sps:$4 sm:$0xff]  }
 0x4b6   :  { %v5361_v56 = vld [vmem:[%s7413_s6 + $0x204] ss:$28 sps:$4 sm:$0xff]   ;;  %v5364_v46 = vld [vmem:[%s7413_s6 + $0x234] ss:$28 sps:$4 sm:$0xff]   ;;  %v5367_v19 = vld [vmem:[%s7413_s6 + $0x23c] ss:$28 sps:$4 sm:$0xff]  }
 0x4b7   :  { %v1567_v30 = vpack.c.bf16 %v6442_v29, %v6442_v29  ;;  %v5362_v20 = vld [vmem:[%s7413_s6 + $0x230] ss:$28 sps:$4 sm:$0xff]   ;;  %v5365_v21 = vld [vmem:[%s7413_s6 + $0x238] ss:$28 sps:$4 sm:$0xff]  }
 0x4b9   :  { %1794 = vmatmul.mubr.bf16.vlgmr.msra.gmra.mrb[20].mxu0 %v1567_v30  ;;  %1835 = vmatmul.mubr.bf16.vlgmr.msra.gmra.mrb[20].mxu1 %v1567_v30 }
 0x4ba   :  { %5012 = vmatpush3.bf16.msra.mxu0 %v6362_v38  ;;  %5027 = vmatprep.mubr.bf16.mxu0 %v1843_v36  ;;  %v5299_v38 = vld [vmem:[%s7412_s5 + $0x68] sm:$0xff]  }
 0x4bb   :  { %5013 = vmatprep.subr.bf16.mxu0 %v5295_v35  ;;  %3809 = vmatpush1.bf16.msra.mxu1 %v5302_v48 }
 0x4bc   :  { %3810 = vmatprep.subr.bf16.mxu1 %v5310_v52  ;;  %v5371_v52 = vld [vmem:[%s7413_s6 + $0x270] ss:$28 sps:$4 sm:$0xff]  }
 0x4be   :  { %5014 = vmatpush3.bf16.msra.mxu0 %v5295_v35 }
 0x4bf   :  { %5015 = vmatprep.subr.bf16.mxu0 %v5296_v9  ;;  %3811 = vmatpush1.bf16.msra.mxu1 %v5308_v54 }
 0x4c0   :  { %3812 = vmatprep.subr.bf16.mxu1 %v5316_v58 }
 0x4c2   :  { %5016 = vmatpush3.bf16.msra.mxu0 %v5296_v9 }
 0x4c3   :  { %5017 = vmatprep.subr.bf16.mxu0 %v5297_v32  ;;  %3813 = vmatpush1.bf16.msra.mxu1 %v5314_v62 }
 0x4c4   :  { %3814 = vmatprep.subr.bf16.mxu1 %v5322_v63  ;;  %v5379_v63 = vld [vmem:[%s7413_s6 + $0x2ac] ss:$28 sps:$4 sm:$0xff]  }
 0x4c6   :  { %5018 = vmatpush3.bf16.msra.mxu0 %v5297_v32 }
 0x4c7   :  { %5019 = vmatprep.subr.bf16.mxu0 %v5298_v39  ;;  %3815 = vmatpush1.bf16.msra.mxu1 %v5320_v13 }
 0x4c8   :  { %3816 = vmatprep.subr.bf16.mxu1 %v5328_v1 }
 0x4ca   :  { %5020 = vmatpush3.bf16.msra.mxu0 %v5298_v39 }
 0x4cb   :  { %5021 = vmatprep.subr.bf16.mxu0 %v5299_v38  ;;  %3817 = vmatpush1.bf16.msra.mxu1 %v5326_v2  ;;  %v5377_v2 = vld [vmem:[%s7413_s6 + $0x2a8] ss:$28 sps:$4 sm:$0xff]  }
 0x4cc   :  { %3818 = vmatprep.subr.bf16.mxu1 %v5334_v25 }
 0x4ce   :  { %5022 = vmatpush3.bf16.msra.mxu0 %v5299_v38  ;;  %v5370_v38 = vld [vmem:[%s7413_s6 + $0x26c] ss:$28 sps:$4 sm:$0xff]  }
 0x4cf   :  { %5023 = vmatprep.subr.bf16.mxu0 %v5300_v40  ;;  %3819 = vmatpush1.bf16.msra.mxu1 %v5332_v5  ;;  %v5382_v5 = vld [vmem:[%s7413_s6 + $0x2dc] ss:$28 sps:$4 sm:$0xff]  }
 0x4d0   :  { %3820 = vmatprep.subr.bf16.mxu1 %v5340_v26 }
 0x4d2   :  { %5024 = vmatpush3.bf16.msra.mxu0 %v5300_v40  ;;  %v5373_v40 = vld [vmem:[%s7413_s6 + $0x274] ss:$28 sps:$4 sm:$0xff]  }
 0x4d3   :  { %5025 = vmatprep.subr.bf16.mxu0 %v5301_v41  ;;  %3821 = vmatpush1.bf16.msra.mxu1 %v5338_v8 }
 0x4d4   :  { %3822 = vmatprep.subr.bf16.mxu1 %v5346_v34  ;;  %v5385_v34 = vld [vmem:[%s7413_s6 + $0x2e4] ss:$28 sps:$4 sm:$0xff]  }
 0x4d6   :  { %5026 = vmatpush3.bf16.msra.mxu0 %v5301_v41 }
 0x4d7   :  { %3890 = vmatprep.subr.bf16.mxu0 %v5307_v47  ;;  %3823 = vmatpush1.bf16.msra.mxu1 %v5344_v45 }
 0x4d8   :  { %3824 = vmatprep.subr.bf16.mxu1 %v5352_v11  ;;  %v5383_v11 = vld [vmem:[%s7413_s6 + $0x2e0] ss:$28 sps:$4 sm:$0xff]  }
 0x4d9   :  { %5028 = vmatmul.mubr.bf16.vlgmr.msra.gmra.mrb[24].mxu0 %v1844_v43 }
 0x4da   :  { %3891 = vmatpush1.bf16.msra.mxu0 %v5305_v50  ;;  %v5368_v50 = vld [vmem:[%s7413_s6 + $0x268] ss:$28 sps:$4 sm:$0xff]  }
 0x4db   :  { %3892 = vmatprep.subr.bf16.mxu0 %v5313_v53  ;;  %3825 = vmatpush1.bf16.msra.mxu1 %v5350_v12 }
 0x4dc   :  { %3826 = vmatprep.subr.bf16.mxu1 %v5358_v42  ;;  %v5391_v42 = vld [vmem:[%s7413_s6 + $0x31c] ss:$28 sps:$4 sm:$0xff]  }
 0x4de   :  { %3893 = vmatpush1.bf16.msra.mxu0 %v5311_v57 }
 0x4df   :  { %3894 = vmatprep.subr.bf16.mxu0 %v5319_v61  ;;  %3827 = vmatpush1.bf16.msra.mxu1 %v5356_v15 }
 0x4e0   :  { %3828 = vmatprep.subr.bf16.mxu1 %v5364_v46  ;;  %v5386_v46 = vld [vmem:[%s7413_s6 + $0x310] ss:$28 sps:$4 sm:$0xff]  }
 0x4e2   :  { %3895 = vmatpush1.bf16.msra.mxu0 %v5317_v17  ;;  %v5376_v17 = vld [vmem:[%s7413_s6 + $0x2a4] ss:$28 sps:$4 sm:$0xff]  }
 0x4e3   :  { %3896 = vmatprep.subr.bf16.mxu0 %v5325_v60  ;;  %3829 = vmatpush1.bf16.msra.mxu1 %v5362_v20  ;;  %v5394_v20 = vld [vmem:[%s7413_s6 + $0x34c] ss:$28 sps:$4 sm:$0xff]  }
 0x4e4   :  { %3830 = vmatprep.subr.bf16.mxu1 %v5370_v38 }
 0x4e6   :  { %3897 = vmatpush1.bf16.msra.mxu0 %v5323_v0 }
 0x4e7   :  { %3898 = vmatprep.subr.bf16.mxu0 %v5331_v23  ;;  %3831 = vmatpush1.bf16.msra.mxu1 %v5368_v50  ;;  %v5374_v23 = vld [vmem:[%s7413_s6 + $0x2a0] ss:$28 sps:$4 sm:$0xff]  }
 0x4e8   :  { %3832 = vmatprep.subr.bf16.mxu1 %v5376_v17 }
 0x4ea   :  { %3899 = vmatpush1.bf16.msra.mxu0 %v5329_v3 }
 0x4eb   :  { %3900 = vmatprep.subr.bf16.mxu0 %v5337_v18  ;;  %3833 = vmatpush1.bf16.msra.mxu1 %v5374_v23 }
 0x4ec   :  { %3834 = vmatprep.subr.bf16.mxu1 %v5382_v5 }
 0x4ee   :  { %3901 = vmatpush1.bf16.msra.mxu0 %v5335_v27 }
 0x4ef   :  { %3902 = vmatprep.subr.bf16.mxu0 %v5343_v31 }
 0x4f2   :  { %3903 = vmatpush1.bf16.msra.mxu0 %v5341_v55  ;;  %v5380_v55 = vld [vmem:[%s7413_s6 + $0x2d8] ss:$28 sps:$4 sm:$0xff]  }
 0x4f3   :  { %3904 = vmatprep.subr.bf16.mxu0 %v5349_v33  ;;  %3835 = vmatpush1.bf16.msra.mxu1 %v5380_v55 }
 0x4f6   :  { %3905 = vmatpush1.bf16.msra.mxu0 %v5347_v10 }
 0x4f7   :  { %3906 = vmatprep.subr.bf16.mxu0 %v5355_v37  ;;  %v5388_v37 = vld [vmem:[%s7413_s6 + $0x314] ss:$28 sps:$4 sm:$0xff]  }
 0x4f8   :  { %3836 = vmatprep.subr.bf16.mxu1 %v5388_v37 }
 0x4f9   :  { %3837 = vmatpush1.bf16.msra.mxu1 %v5386_v46 }
 0x4fa   :  { %3907 = vmatpush1.bf16.msra.mxu0 %v5353_v14  ;;  %3838 = vmatprep.subr.bf16.mxu1 %v5394_v20 }
 0x4fb   :  { %3908 = vmatprep.subr.bf16.mxu0 %v5361_v56 }
 0x4fe   :  { %3909 = vmatpush1.bf16.msra.mxu0 %v5359_v16 }
 0x4ff   :  { %3910 = vmatprep.subr.bf16.mxu0 %v5367_v19  ;;  %v5389_v19 = vld [vmem:[%s7413_s6 + $0x318] ss:$28 sps:$4 sm:$0xff]  }
 0x502   :  { %3911 = vmatpush1.bf16.msra.mxu0 %v5365_v21  ;;  %v5397_v21 = vld [vmem:[%s7413_s6 + $0x354] ss:$28 sps:$4 sm:$0xff]  }
 0x503   :  { %3912 = vmatprep.subr.bf16.mxu0 %v5373_v40 }
 0x506   :  { %3913 = vmatpush1.bf16.msra.mxu0 %v5371_v52 }
 0x507   :  { %3914 = vmatprep.subr.bf16.mxu0 %v5379_v63 }
 0x50a   :  { %3915 = vmatpush1.bf16.msra.mxu0 %v5377_v2 }
 0x50b   :  { %3916 = vmatprep.subr.bf16.mxu0 %v5385_v34 }
 0x50e   :  { %3917 = vmatpush1.bf16.msra.mxu0 %v5383_v11 }
 0x50f   :  { %3918 = vmatprep.subr.bf16.mxu0 %v5391_v42 }
 0x512   :  { %3919 = vmatpush1.bf16.msra.mxu0 %v5389_v19 }
 0x513   :  { %3920 = vmatprep.subr.bf16.mxu0 %v5397_v21 }
 0x58c   :  { %v1795_v24 = vpop.f32.mrb[20].mxu0  ;;  %v6604_v28 = vpop.f32.mrb[20].mxu1 }
 0x58d   :  { %v1960_v30 = vcombine.high %v1795_v24, %v1795_v24  ;;  %v1967_v35 = vrot.slane %v1795_v24, %v6206_v51  ;;  %v1797_v36 = vpop.f32.mrb[21].mxu0  ;;  %v6607_v9 = vpop.f32.mrb[21].mxu1  ;;  %v5392_v24 = vld [vmem:[%s7413_s6 + $0x348] ss:$28 sps:$4 sm:$0xff]  }
 0x58e   :  { %v1799_v32 = vpop.f32.mrb[22].mxu0  ;;  %v1840_v39 = vpop.f32.mrb[22].mxu1  ;;  %v2050_v61 = vcombine.high %v1797_v36, %v1797_v36  ;;  %3839 = vmatpush1.bf16.msra.mxu1 %v5392_v24 }
 0x58f   :  { %v1974_v41 = vrot.slane %v1960_v30, %v6206_v51  ;;  %v1975_v43 = vcombine.high %v1967_v35, %v1967_v35  ;;  %v1983_v44 = vrot.slane %v1967_v35, %v6206_v51  ;;  %v1800_v47 = vpop.f32.mrb[23].mxu0  ;;  %v1841_v48 = vpop.f32.mrb[23].mxu1  ;;  %v5395_v30 = vld [vmem:[%s7413_s6 + $0x350] ss:$28 sps:$4 sm:$0xff]   ;;  %v5400_v35 = vld [vmem:[%s7413_s6 + $0x384] ss:$28 sps:$4 sm:$0xff]  }
 0x590   :  { %3921 = vmatpush1.bf16.msra.mxu0 %v5395_v30  ;;  %3849 = vmatprep.subr.bf16.mxu1 %v5400_v35 }
 0x591   :  { %v1976_v53 = vcombine.high %v1974_v41, %v1974_v41  ;;  %v1990_v54 = vrot.slane %v1974_v41, %v6206_v51  ;;  %v1997_v57 = vrot.slane %v1975_v43, %v6206_v51  ;;  %v2005_v58 = vcombine.high %v1983_v44, %v1983_v44 }
 0x592   :  { %v2012_v62 = vrot.slane %v1983_v44, %v6216_v59 }
 0x593   :  { %v2004_v60 = vrot.slane %v1976_v53, %v6206_v51  ;;  %v2007_v13 = vcombine.high %v1997_v57, %v1997_v57  ;;  %v2028_v0 = vrot.slane %v1990_v54, %v6216_v59  ;;  %v2016_v1 = vrot.slane %v1997_v57, %v6216_v59 }
 0x594   :  { %v2052_v3 = vadd.f32 %v2012_v62, %v1797_v36  ;;  %v2006_v25 = vcombine.high %v1990_v54, %v1990_v54  ;;  %v2020_v18 = vrot.slane %v2005_v58, %v6216_v59 }
 0x595   :  { %v2032_v27 = vrot.slane %v2004_v60, %v6216_v59  ;;  %v2056_v26 = vadd.f32 %v2050_v61, %v2028_v0  ;;  %v2053_v31 = vadd.f32 %v2016_v1, %v1797_v36  ;;  %v2008_v8 = vcombine.high %v2004_v60, %v2004_v60 }
 0x596   :  { %v2036_v33 = vrot.slane %v2006_v25, %v6216_v59  ;;  %v2024_v45 = vrot.slane %v2007_v13, %v6216_v59  ;;  %v2054_v10 = vadd.f32 %v2020_v18, %v1797_v36 }
 0x597   :  { %v2057_v12 = vadd.f32 %v2050_v61, %v2032_v27  ;;  %v2040_v14 = vrot.slane %v2008_v8, %v6216_v59 }
 0x598   :  { %v2058_v56 = vadd.f32 %v2050_v61, %v2036_v33  ;;  %v2055_v15 = vadd.f32 %v2024_v45, %v1797_v36  ;;  %v5403_v36 = vld [vmem:[%s7413_s6 + $0x38c] ss:$28 sps:$4 sm:$0xff]  }
 0x599   :  { %v2059_v16 = vadd.f32 %v2050_v61, %v2040_v14  ;;  %3931 = vmatprep.subr.bf16.mxu0 %v5403_v36 }
 0x5ac   :  { %v5029_v32 = vpop.f32.mrb[24].mxu0 }
 0x5ad   :  { %v2066_v39 = vcombine.high %v5029_v32, %v5029_v32  ;;  %v2076_v38 = vadd.f32 %v5029_v32, %v2056_v26  ;;  %v1944_v40 = vpop.f32.mrb[25].mxu0 }
 0x5ae   :  { %v2064_v41 = vcombine.high %v1944_v40, %v1944_v40  ;;  %v2072_v43 = vadd.f32 %v2052_v3, %v1944_v40  ;;  %v5030_v44 = vpop.f32.mrb[26].mxu0 }
 0x5af   :  { %v2077_v47 = vadd.f32 %v2066_v39, %v2057_v12  ;;  %v2067_v48 = vcombine.high %v5030_v44, %v5030_v44  ;;  %v2078_v50 = vadd.f32 %v5030_v44, %v2058_v56  ;;  %v1947_v52 = vpop.f32.mrb[27].mxu0  ;;  %v2084_v58 = vmax.f32 %v2076_v38, 0.0 }
 0x5b0   :  { %v2073_v53 = vadd.f32 %v2064_v41, %v2053_v31  ;;  %v2065_v54 = vcombine.high %v1947_v52, %v1947_v52  ;;  %v2074_v57 = vadd.f32 %v2054_v10, %v1947_v52  ;;  %v2080_v17 = vmax.f32 %v2072_v43, 0.0 }
 0x5b1   :  { %v2085_v61 = vmax.f32 %v2077_v47, 0.0  ;;  %v2079_v62 = vadd.f32 %v2067_v48, %v2059_v16  ;;  %v2086_v0 = vmax.f32 %v2078_v50, 0.0 }
 0x5b2   :  { %v2081_v63 = vmax.f32 %v2073_v53, 0.0  ;;  %v2075_v60 = vadd.f32 %v2065_v54, %v2055_v15  ;;  %v2082_v2 = vmax.f32 %v2074_v57, 0.0 }
 0x5b3   :  { %v2098_v13 = vcombine.low %v2084_v58, %v2085_v61  ;;  %v2087_v1 = vmax.f32 %v2079_v62, 0.0 }
 0x5b4   :  { %v2096_v23 = vcombine.low %v2080_v17, %v2081_v63  ;;  %v2083_v3 = vmax.f32 %v2075_v60, 0.0 }
 0x5b5   :  { %v2106_v25 = vadd.f32 %v2098_v13, %v6374_v4  ;;  %v2099_v18 = vcombine.low %v2086_v0, %v2087_v1 }
 0x5b6   :  { %v6690_v5 = vadd.f32 %v2096_v23, %v6377_v22  ;;  %v2097_v27 = vcombine.low %v2082_v2, %v2083_v3 }
 0x5b7   :  { %v4638_v26 = vmul.f32 -1.442695, %v2106_v25  ;;  %2340 = vst [vmem:[#allocation4 + $0x10] sm:$0xff] %v2106_v25  ;;  %v2107_v31 = vadd.f32 %v2099_v18, %v6381_v6 }
 0x5b8   :  { %v4636_v8 = vmul.f32 -1.442695, %v6690_v5  ;;  %2338 = vst [vmem:[#allocation4] sm:$0xff] %v6690_v5  ;;  %v2105_v55 = vadd.f32 %v2097_v27, %v6385_v7 }
 0x5b9   :  { %5662 = vpow2.f32 %v4638_v26  ;;  %v4639_v34 = vmul.f32 -1.442695, %v2107_v31  ;;  %2341 = vst [vmem:[#allocation4 + $0x18] sm:$0xff] %v2107_v31 }
 0x5ba   :  { %5664 = vpow2.f32 %v4636_v8  ;;  %v4637_v4 = vmul.f32 -1.442695, %v2105_v55  ;;  %2339 = vst [vmem:[#allocation4 + $0x8] sm:$0xff] %v2105_v55 }
 0x5bb   :  { %5666 = vpow2.f32 %v4639_v34 }
 0x5bc   :  { %5668 = vpow2.f32 %v4637_v4 }
 0x5c3   :  { %v5663_v22 = vpop.eup %5662 }
 0x5c4   :  { %v5665_v33 = vpop.eup %5664  ;;  %v2122_v45 = vadd.f32 1.0, %v5663_v22 }
 0x5c5   :  { %v5667_v10 = vpop.eup %5666  ;;  %v2120_v11 = vadd.f32 1.0, %v5665_v33 }
 0x5c6   :  { %v5669_v6 = vpop.eup %5668  ;;  %5670 = vrcp.f32 %v2122_v45  ;;  %v2123_v37 = vadd.f32 1.0, %v5667_v10 }
 0x5c7   :  { %5672 = vrcp.f32 %v2120_v11  ;;  %v2121_v12 = vadd.f32 1.0, %v5669_v6 }
 0x5c8   :  { %5674 = vrcp.f32 %v2123_v37 }
 0x5c9   :  { %5676 = vrcp.f32 %v2121_v12 }
 0x5d0   :  { %v5671_v7 = vpop.eup %5670 }
 0x5d1   :  { %v5673_v14 = vpop.eup %5672  ;;  %v2136_v42 = vmul.f32 1.442695, %v5671_v7 }
 0x5d2   :  { %v5675_v56 = vpop.eup %5674  ;;  %v2132_v15 = vmul.f32 1.442695, %v5673_v14 }
 0x5d3   :  { %v5677_v16 = vpop.eup %5676  ;;  %5678 = vpow2.f32 %v2136_v42  ;;  %v2138_v46 = vmul.f32 1.442695, %v5675_v56 }
 0x5d4   :  { %5680 = vpow2.f32 %v2132_v15  ;;  %v2134_v19 = vmul.f32 1.442695, %v5677_v16 }
 0x5d5   :  { %5682 = vpow2.f32 %v2138_v46 }
 0x5d6   :  { %5684 = vpow2.f32 %v2134_v19 }
 0x5dd   :  { %v6696_v20 = vpop.eup %5678 }
 0x5de   :  { %v6698_v21 = vpop.eup %5680  ;;  %v2146_v24 = vcombine.high %v6696_v20, %v6696_v20  ;;  %v2180_v30 = vsel %vm642_vm4, %v6696_v20, 0.0 }
 0x5df   :  { %v6704_v35 = vpop.eup %5682  ;;  %v2181_v36 = vrot.slane %v2180_v30, 4  ;;  %v2144_v32 = vcombine.high %v6698_v21, %v6698_v21  ;;  %v2152_v39 = vsel %vm642_vm4, %v6698_v21, 0.0 }
 0x5e0   :  { %v6710_v38 = vpop.eup %5684  ;;  %v2187_v40 = vsel %vm642_vm4, %v2146_v24, 0.0  ;;  %v2153_v41 = vrot.slane %v2152_v39, 4  ;;  %v2147_v43 = vcombine.high %v6704_v35, %v6704_v35  ;;  %v2194_v44 = vsel %vm642_vm4, %v6704_v35, 0.0 }
 0x5e1   :  { %v2182_v47 = vadd.f32 %v2181_v36, %v2180_v30  ;;  %v2188_v48 = vrot.slane %v2187_v40, 4  ;;  %v2159_v50 = vsel %vm642_vm4, %v2144_v32, 0.0  ;;  %v2195_v52 = vrot.slane %v2194_v44, 4 }
 0x5e2   :  { %v2154_v53 = vadd.f32 %v2153_v41, %v2152_v39  ;;  %v2160_v54 = vrot.slane %v2159_v50, 4  ;;  %v2201_v57 = vsel %vm642_vm4, %v2147_v43, 0.0  ;;  %v2145_v58 = vcombine.high %v6710_v38, %v6710_v38 }
 0x5e3   :  { %v2183_v61 = vrot.slane %v2182_v47, 2  ;;  %v2189_v62 = vadd.f32 %v2188_v48, %v2187_v40  ;;  %v2196_v17 = vadd.f32 %v2195_v52, %v2194_v44  ;;  %v2202_v63 = vrot.slane %v2201_v57, 4 }
 0x5e4   :  { %v2155_v60 = vrot.slane %v2154_v53, 2  ;;  %v2161_v13 = vadd.f32 %v2160_v54, %v2159_v50  ;;  %v2166_v0 = vsel %vm642_vm4, %v6710_v38, 0.0  ;;  %v2173_v1 = vsel %vm642_vm4, %v2145_v58, 0.0 }
 0x5e5   :  { %v2184_v23 = vadd.f32 %v2183_v61, %v2182_v47  ;;  %v2190_v2 = vrot.slane %v2189_v62, 2  ;;  %v2197_v3 = vrot.slane %v2196_v17, 2  ;;  %v2203_v25 = vadd.f32 %v2202_v63, %v2201_v57 }
 0x5e6   :  { %v2156_v18 = vadd.f32 %v2155_v60, %v2154_v53  ;;  %v2162_v27 = vrot.slane %v2161_v13, 2  ;;  %v2167_v26 = vrot.slane %v2166_v0, 4  ;;  %v2174_v31 = vrot.slane %v2173_v1, 4 }
 0x5e7   :  { %v2185_v8 = vrot.slane %v2184_v23, 1  ;;  %v2191_v55 = vadd.f32 %v2190_v2, %v2189_v62  ;;  %v2198_v34 = vadd.f32 %v2197_v3, %v2196_v17  ;;  %v2204_v4 = vrot.slane %v2203_v25, 2 }
 0x5e8   :  { %v2157_v22 = vrot.slane %v2156_v18, 1  ;;  %v2163_v33 = vadd.f32 %v2162_v27, %v2161_v13  ;;  %v2168_v45 = vadd.f32 %v2167_v26, %v2166_v0  ;;  %v2175_v10 = vadd.f32 %v2174_v31, %v2173_v1 }
 0x5e9   :  { %v2192_v11 = vrot.slane %v2191_v55, 1  ;;  %v2199_v6 = vrot.slane %v2198_v34, 1  ;;  %v2205_v37 = vadd.f32 %v2204_v4, %v2203_v25  ;;  %v2186_v42 = vadd.f32 %v2185_v8, %v2184_v23 }
 0x5ea   :  { %v2164_v12 = vrot.slane %v2163_v33, 1  ;;  %v2169_v7 = vrot.slane %v2168_v45, 2  ;;  %v2176_v14 = vrot.slane %v2175_v10, 2  ;;  %v2158_v16 = vadd.f32 %v2157_v22, %v2156_v18 }
 0x5eb   :  { %v2193_v56 = vadd.f32 %v2192_v11, %v2191_v55  ;;  %v2206_v15 = vrot.slane %v2205_v37, 1  ;;  %v2200_v36 = vadd.f32 %v2199_v6, %v2198_v34  ;;  %v4640_v53 = vcombine.high %v6607_v9, %v6607_v9 }
 0x5ec   :  { %v2165_v46 = vadd.f32 %v2164_v12, %v2163_v33  ;;  %v2170_v19 = vadd.f32 %v2169_v7, %v2168_v45  ;;  %v2177_v24 = vadd.f32 %v2176_v14, %v2175_v10  ;;  %v2234_v58 = vcombine.low %v6607_v9, %v6607_v9 }
 0x5ed   :  { %v2218_v30 = vcombine.low %v2186_v42, %v2193_v56  ;;  %v2207_v32 = vadd.f32 %v2206_v15, %v2205_v37 }
 0x5ee   :  { %v2216_v39 = vcombine.low %v2158_v16, %v2165_v46  ;;  %v2171_v40 = vrot.slane %v2170_v19, 1  ;;  %v2178_v41 = vrot.slane %v2177_v24, 1 }
 0x5ef   :  { %5686 = vrcp.f32 %v2218_v30  ;;  %v2219_v43 = vcombine.low %v2200_v36, %v2207_v32 }
 0x5f0   :  { %5688 = vrcp.f32 %v2216_v39  ;;  %v2172_v44 = vadd.f32 %v2171_v40, %v2170_v19  ;;  %v2179_v47 = vadd.f32 %v2178_v41, %v2177_v24 }
 0x5f1   :  { %5690 = vrcp.f32 %v2219_v43 }
 0x5f2   :  { %v2217_v48 = vcombine.low %v2172_v44, %v2179_v47 }
 0x5f4   :  { %5692 = vrcp.f32 %v2217_v48 }
 0x5f9   :  { %v5687_v50 = vpop.eup %5686 }
 0x5fa   :  { %v5689_v52 = vpop.eup %5688  ;;  %v2229_v54 = vmul.f32 %v5687_v50, %v6696_v20 }
 0x5fb   :  { %v5691_v57 = vpop.eup %5690  ;;  %v2225_v61 = vmul.f32 %v5689_v52, %v6698_v21 }
 0x5fc   :  { %v2240_v62 = vmul.f32 %v4640_v53, %v2229_v54  ;;  %v2231_v17 = vmul.f32 %v5691_v57, %v6704_v35 }
 0x5fd   :  { %v2238_v63 = vmul.f32 %v2234_v58, %v2225_v61 }
 0x5fe   :  { %v5693_v60 = vpop.eup %5692  ;;  %v2248_v13 = vcombine.high %v2240_v62, %v2240_v62  ;;  %v2282_v0 = vsel %vm642_vm4, %v2240_v62, 0.0  ;;  %v2241_v1 = vmul.f32 %v4640_v53, %v2231_v17 }
 0x5ff   :  { %v2283_v23 = vrot.slane %v2282_v0, 4  ;;  %v2246_v2 = vcombine.high %v2238_v63, %v2238_v63  ;;  %v2254_v3 = vsel %vm642_vm4, %v2238_v63, 0.0  ;;  %v2227_v20 = vmul.f32 %v5693_v60, %v6710_v38 }
 0x600   :  { %v2289_v25 = vsel %vm642_vm4, %v2248_v13, 0.0  ;;  %v2255_v9 = vrot.slane %v2254_v3, 4  ;;  %v2249_v18 = vcombine.high %v2241_v1, %v2241_v1  ;;  %v2296_v21 = vsel %vm642_vm4, %v2241_v1, 0.0 }
 0x601   :  { %v2284_v27 = vadd.f32 %v2283_v23, %v2282_v0  ;;  %v2290_v35 = vrot.slane %v2289_v25, 4  ;;  %v2261_v26 = vsel %vm642_vm4, %v2246_v2, 0.0  ;;  %v2297_v31 = vrot.slane %v2296_v21, 4 }
 0x602   :  { %v2256_v8 = vadd.f32 %v2255_v9, %v2254_v3  ;;  %v2262_v55 = vrot.slane %v2261_v26, 4  ;;  %v2303_v34 = vsel %vm642_vm4, %v2249_v18, 0.0  ;;  %v2239_v4 = vmul.f32 %v2234_v58, %v2227_v20 }
 0x603   :  { %v2291_v22 = vadd.f32 %v2290_v35, %v2289_v25  ;;  %v2298_v33 = vadd.f32 %v2297_v31, %v2296_v21  ;;  %v2304_v45 = vrot.slane %v2303_v34, 4  ;;  %v2285_v37 = vrot.slane %v2284_v27, 2 }
 0x604   :  { %v2257_v38 = vrot.slane %v2256_v8, 2  ;;  %v2263_v10 = vadd.f32 %v2262_v55, %v2261_v26  ;;  %v2247_v11 = vcombine.high %v2239_v4, %v2239_v4  ;;  %v2268_v6 = vsel %vm642_vm4, %v2239_v4, 0.0 }
 0x605   :  { %v2292_v12 = vrot.slane %v2291_v22, 2  ;;  %v2305_v7 = vadd.f32 %v2304_v45, %v2303_v34  ;;  %v2269_v56 = vrot.slane %v2268_v6, 4  ;;  %v2299_v16 = vrot.slane %v2298_v33, 2 }
 0x606   :  { %v2258_v14 = vadd.f32 %v2257_v38, %v2256_v8  ;;  %v2264_v42 = vrot.slane %v2263_v10, 2  ;;  %v2275_v15 = vsel %vm642_vm4, %v2247_v11, 0.0  ;;  %v2286_v32 = vadd.f32 %v2285_v37, %v2284_v27 }
 0x607   :  { %v2306_v46 = vrot.slane %v2305_v7, 2  ;;  %v2270_v30 = vadd.f32 %v2269_v56, %v2268_v6  ;;  %v2276_v36 = vrot.slane %v2275_v15, 4  ;;  %v2293_v39 = vadd.f32 %v2292_v12, %v2291_v22 }
 0x608   :  { %v2259_v19 = vrot.slane %v2258_v14, 1  ;;  %v2265_v24 = vadd.f32 %v2264_v42, %v2263_v10  ;;  %v2300_v47 = vadd.f32 %v2299_v16, %v2298_v33  ;;  %v2287_v54 = vrot.slane %v2286_v32, 1  ;;  %v5409_v16 = vld [vmem:[%s7413_s6 + $0x3c4] ss:$28 sps:$4 sm:$0xff]  }
 0x609   :  { %v2271_v41 = vrot.slane %v2270_v30, 2  ;;  %v2277_v43 = vadd.f32 %v2276_v36, %v2275_v15  ;;  %v2307_v50 = vadd.f32 %v2306_v46, %v2305_v7  ;;  %v2294_v57 = vrot.slane %v2293_v39, 1  ;;  %v5398_v7 = vld [vmem:[%s7413_s6 + $0x380] ss:$28 sps:$4 sm:$0xff]  }
 0x60a   :  { %v2266_v40 = vrot.slane %v2265_v24, 1  ;;  %v2260_v44 = vadd.f32 %v2259_v19, %v2258_v14  ;;  %v2301_v63 = vrot.slane %v2300_v47, 1  ;;  %v2288_v1 = vadd.f32 %v2287_v54, %v2286_v32  ;;  %v5401_v14 = vld [vmem:[%s7413_s6 + $0x388] ss:$28 sps:$4 sm:$0xff]   ;;  %v5406_v15 = vld [vmem:[%s7413_s6 + $0x3bc] ss:$28 sps:$4 sm:$0xff]  }
 0x60b   :  { %v2272_v52 = vadd.f32 %v2271_v41, %v2270_v30  ;;  %v2278_v53 = vrot.slane %v2277_v43, 2  ;;  %v2308_v0 = vrot.slane %v2307_v50, 1  ;;  %v2295_v2 = vadd.f32 %v2294_v57, %v2293_v39  ;;  %v5404_v19 = vld [vmem:[%s7413_s6 + $0x3b8] ss:$28 sps:$4 sm:$0xff]   ;;  %v5410_v32 = vld [vmem:[%s7413_s6 + $0x3f0] ss:$28 sps:$4 sm:$0xff]  }
 0x60c   :  { %v2267_v48 = vadd.f32 %v2266_v40, %v2265_v24  ;;  %v2311_v17 = vmul.f32 0.25, %v2260_v44  ;;  %v2302_v25 = vadd.f32 %v2301_v63, %v2300_v47  ;;  %v2315_v27 = vmul.f32 0.25, %v2288_v1  ;;  %v5407_v24 = vld [vmem:[%s7413_s6 + $0x3c0] ss:$28 sps:$4 sm:$0xff]   ;;  %v5412_v30 = vld [vmem:[%s7413_s6 + $0x3f4] ss:$28 sps:$4 sm:$0xff]  }
 0x60d   :  { %v2273_v61 = vrot.slane %v2272_v52, 1  ;;  %v2279_v62 = vadd.f32 %v2278_v53, %v2277_v43  ;;  %v2309_v21 = vadd.f32 %v2308_v0, %v2307_v50  ;;  %v2316_v35 = vmul.f32 0.25, %v2295_v2  ;;  %v5415_v36 = vld [vmem:[%s7413_s6 + $0x3fc] ss:$28 sps:$4 sm:$0xff]   ;;  %v5418_v40 = vld [vmem:[%s7413_s6 + $0x42c] ss:$28 sps:$4 sm:$0xff]  }
 0x60e   :  { %v2312_v58 = vmul.f32 0.25, %v2267_v48  ;;  %v2317_v31 = vmul.f32 0.25, %v2302_v25  ;;  %v2310_v4 = vadd.f32 %v6604_v28, %v6442_v29  ;;  %v5413_v39 = vld [vmem:[%s7413_s6 + $0x3f8] ss:$28 sps:$4 sm:$0xff]   ;;  %v5416_v43 = vld [vmem:[%s7413_s6 + $0x428] ss:$28 sps:$4 sm:$0xff]  }
 0x60f   :  { %v2274_v60 = vadd.f32 %v2273_v61, %v2272_v52  ;;  %v2280_v13 = vrot.slane %v2279_v62, 1  ;;  %v2318_v55 = vmul.f32 0.25, %v2309_v21  ;;  %v5421_v41 = vld [vmem:[%s7413_s6 + $0x434] ss:$28 sps:$4 sm:$0xff]   ;;  %v5424_v47 = vld [vmem:[%s7413_s6 + $0x464] ss:$28 sps:$4 sm:$0xff]  }
 0x610   :  { %v2327_v23 = vsel %vm1550_vm0, %v2312_v58, %v2311_v17  ;;  %v5419_v44 = vld [vmem:[%s7413_s6 + $0x430] ss:$28 sps:$4 sm:$0xff]   ;;  %v5422_v50 = vld [vmem:[%s7413_s6 + $0x460] ss:$28 sps:$4 sm:$0xff]   ;;  %v5425_v52 = vld [vmem:[%s7413_s6 + $0x468] ss:$28 sps:$4 sm:$0xff]  }
 0x611   :  { %v2281_v3 = vadd.f32 %v2280_v13, %v2279_v62  ;;  %v2313_v20 = vmul.f32 0.25, %v2274_v60  ;;  %v5427_v48 = vld [vmem:[%s7413_s6 + $0x46c] ss:$28 sps:$4 sm:$0xff]   ;;  %v5430_v53 = vld [vmem:[%s7413_s6 + $0x49c] ss:$28 sps:$4 sm:$0xff]  }
 0x612   :  { %v5433_v54 = vld [vmem:[%s7413_s6 + $0x4a4] ss:$28 sps:$4 sm:$0xff]   ;;  %v5428_v57 = vld [vmem:[%s7413_s6 + $0x498] ss:$28 sps:$4 sm:$0xff]   ;;  %v5434_v17 = vld [vmem:[%s7413_s6 + $0x4d0] ss:$28 sps:$4 sm:$0xff]  }
 0x613   :  { %v2314_v9 = vmul.f32 0.25, %v2281_v3  ;;  %v2328_v18 = vsel %vm1552_vm3, %v2313_v20, %v2327_v23  ;;  %v5431_v58 = vld [vmem:[%s7413_s6 + $0x4a0] ss:$28 sps:$4 sm:$0xff]   ;;  %v5436_v61 = vld [vmem:[%s7413_s6 + $0x4d4] ss:$28 sps:$4 sm:$0xff]  }
 0x614   :  { %v5439_v62 = vld [vmem:[%s7413_s6 + $0x4dc] ss:$28 sps:$4 sm:$0xff]   ;;  %v5442_v60 = vld [vmem:[%s7413_s6 + $0x50c] ss:$28 sps:$4 sm:$0xff]   ;;  %v5445_v13 = vld [vmem:[%s7413_s6 + $0x514] ss:$28 sps:$4 sm:$0xff]  }
 0x615   :  { %v2329_v26 = vsel %vm1554_vm5, %v2314_v9, %v2328_v18  ;;  %v5437_v63 = vld [vmem:[%s7413_s6 + $0x4d8] ss:$28 sps:$4 sm:$0xff]   ;;  %v5440_v0 = vld [vmem:[%s7413_s6 + $0x508] ss:$28 sps:$4 sm:$0xff]   ;;  %v5443_v1 = vld [vmem:[%s7413_s6 + $0x510] ss:$28 sps:$4 sm:$0xff]  }
 0x616   :  { %v2330_v8 = vsel %vm1556_vm8, %v2315_v27, %v2329_v26  ;;  %v5448_v23 = vld [vmem:[%s7413_s6 + $0x544] ss:$28 sps:$4 sm:$0xff]   ;;  %v5451_v2 = vld [vmem:[%s7413_s6 + $0x54c] ss:$28 sps:$4 sm:$0xff]   ;;  %v5454_v25 = vld [vmem:[%s7413_s6 + $0x57c] ss:$28 sps:$4 sm:$0xff]  }
 0x617   :  { %v2331_v34 = vsel %vm1558_vm9, %v2316_v35, %v2330_v8  ;;  %v5446_v3 = vld [vmem:[%s7413_s6 + $0x540] ss:$28 sps:$4 sm:$0xff]   ;;  %v5449_v20 = vld [vmem:[%s7413_s6 + $0x548] ss:$28 sps:$4 sm:$0xff]   ;;  %v5452_v18 = vld [vmem:[%s7413_s6 + $0x578] ss:$28 sps:$4 sm:$0xff]  }
 0x618   :  { %v2332_v22 = vsel %vm1560_vm10, %v2317_v31, %v2331_v34  ;;  %v5457_v9 = vld [vmem:[%s7413_s6 + $0x584] ss:$28 sps:$4 sm:$0xff]   ;;  %v5460_v27 = vld [vmem:[%s7413_s6 + $0x5b4] ss:$28 sps:$4 sm:$0xff]   ;;  %v5463_v35 = vld [vmem:[%s7413_s6 + $0x5bc] ss:$28 sps:$4 sm:$0xff]  }
 0x619   :  { %v2333_v33 = vsel %vm1562_vm11, %v2318_v55, %v2332_v22  ;;  %v5455_v21 = vld [vmem:[%s7413_s6 + $0x580] ss:$28 sps:$4 sm:$0xff]   ;;  %v5458_v26 = vld [vmem:[%s7413_s6 + $0x5b0] ss:$28 sps:$4 sm:$0xff]   ;;  %v5461_v31 = vld [vmem:[%s7413_s6 + $0x5b8] ss:$28 sps:$4 sm:$0xff]  }
 0x61a   :  { %v2335_v45 = vadd.f32 %v2333_v33, %v2310_v4  ;;  %v5466_v8 = vld [vmem:[%s7413_s6 + $0x5ec] ss:$28 sps:$4 sm:$0xff]   ;;  %v5469_v55 = vld [vmem:[%s7413_s6 + $0x5f4] ss:$28 sps:$4 sm:$0xff]   ;;  %v5472_v22 = vld [vmem:[%s7413_s6 + $0x624] ss:$28 sps:$4 sm:$0xff]  }
 0x61b   :  { %v5464_v34 = vld [vmem:[%s7413_s6 + $0x5e8] ss:$28 sps:$4 sm:$0xff]   ;;  %v5467_v4 = vld [vmem:[%s7413_s6 + $0x5f0] ss:$28 sps:$4 sm:$0xff]  }
 0x61c   :  { %v6749_v38 = vmax.f32 %v2335_v45, 0.0  ;;  %v5475_v33 = vld [vmem:[%s7413_s6 + $0x62c] ss:$28 sps:$4 sm:$0xff]   ;;  %v5470_v45 = vld [vmem:[%s7413_s6 + $0x620] ss:$28 sps:$4 sm:$0xff]  }
 0x61e   :  { %v2346_v10 = vrot.slane %v6749_v38, 1  ;;  %v2348_v11 = vrot.slane %v6749_v38, 4  ;;  %2337 = vst [vmem:[#allocation2] sm:$0xff] %v6749_v38  ;;  %v2343_v6 = vrot.slane %v6749_v38, 3  ;;  %v2356_v37 = vrot.slane %v6749_v38, 6 }
 0x620   :  { %v2350_v12 = vsel %vm636_vm1, %v2346_v10, %v2348_v11  ;;  %v2345_v29 = vsel %vm636_vm1, %v6749_v38, %v2343_v6  ;;  %v2358_v56 = vsel %vm636_vm1, %v2343_v6, %v2356_v37  ;;  %v5473_v10 = vld [vmem:[%s7413_s6 + $0x628] ss:$28 sps:$4 sm:$0xff]   ;;  %v5478_v11 = vld [vmem:[%s7413_s6 + $0x65c] ss:$28 sps:$4 sm:$0xff]  }
 0x621   :  { %v6759_v28 = vpack.c.bf16 %v2350_v12, %v2350_v12  ;;  %v6767_v42 = vpack.c.bf16 %v2345_v29, %v2345_v29  ;;  %v6780_v46 = vpack.c.bf16 %v2358_v56, %v2358_v56  ;;  %v5481_v6 = vld [vmem:[%s7413_s6 + $0x664] ss:$28 sps:$4 sm:$0xff]   ;;  %v5476_v37 = vld [vmem:[%s7413_s6 + $0x658] ss:$28 sps:$4 sm:$0xff]  }
 0x622   :  { %v5479_v12 = vld [vmem:[%s7413_s6 + $0x660] ss:$28 sps:$4 sm:$0xff]   ;;  %v5484_v29 = vld [vmem:[%s7413_s6 + $0x694] ss:$28 sps:$4 sm:$0xff]  }
 0x623   :  { %3840 = vmatprep.mubr.bf16.mxu1 %v6759_v28  ;;  %3922 = vmatprep.mubr.bf16.mxu0 %v6759_v28  ;;  %v5485_v56 = vld [vmem:[%s7413_s6 + $0x698] ss:$28 sps:$4 sm:$0xff]  }
 0x624   :  { %3841 = vmatmul.mubr.bf16.vlgmr.msra.gmra.mrb[24].mxu1 %v6767_v42  ;;  %3923 = vmatmul.mubr.bf16.vlgmr.msra.gmra.mrb[28].mxu0 %v6767_v42 }
 0x625   :  { %3850 = vmatpush1.bf16.msra.mxu1 %v5398_v7  ;;  %3932 = vmatpush1.bf16.msra.mxu0 %v5401_v14  ;;  %v5487_v7 = vld [vmem:[%s7413_s6 + $0x69c] ss:$28 sps:$4 sm:$0xff]   ;;  %v5482_v14 = vld [vmem:[%s7413_s6 + $0x690] ss:$28 sps:$4 sm:$0xff]  }
 0x626   :  { %3881 = vmatprep.mubr.bf16.mxu1 %v6780_v46  ;;  %3963 = vmatprep.mubr.bf16.mxu0 %v6780_v46 }
 0x627   :  { %3851 = vmatprep.subr.bf16.mxu1 %v5406_v15  ;;  %3933 = vmatprep.subr.bf16.mxu0 %v5409_v16  ;;  %v5490_v15 = vld [vmem:[%s7413_s6 + $0x6cc] ss:$28 sps:$4 sm:$0xff]   ;;  %v5493_v16 = vld [vmem:[%s7413_s6 + $0x6d4] ss:$28 sps:$4 sm:$0xff]  }
 0x629   :  { %3852 = vmatpush1.bf16.msra.mxu1 %v5404_v19  ;;  %3934 = vmatpush1.bf16.msra.mxu0 %v5407_v24  ;;  %v2351_v19 = vrot.slane %v6749_v38, 2  ;;  %v2353_v24 = vrot.slane %v6749_v38, 5  ;;  %v5497_v38 = vld [vmem:[%s7413_s6 + $0x1d8] ss:$28 sps:$4 sm:$0xff]  }
 0x62a   :  { %3853 = vmatprep.subr.bf16.mxu1 %v5412_v30  ;;  %3935 = vmatprep.subr.bf16.mxu0 %v5415_v36  ;;  %v5488_v30 = vld [vmem:[%s7413_s6 + $0x6c8] ss:$28 sps:$4 sm:$0xff]   ;;  %v5491_v36 = vld [vmem:[%s7413_s6 + $0x6d0] ss:$28 sps:$4 sm:$0xff]  }
 0x62d   :  { %3854 = vmatpush1.bf16.msra.mxu1 %v5410_v32  ;;  %3936 = vmatpush1.bf16.msra.mxu0 %v5413_v39  ;;  %v5496_v32 = vld [vmem:[%s7413_s6 + $0x14] ss:$28 sps:$4 sm:$0xff]   ;;  %v2355_v39 = vsel %vm636_vm1, %v2351_v19, %v2353_v24 }
 0x62e   :  { %3855 = vmatprep.subr.bf16.mxu1 %v5418_v40  ;;  %3937 = vmatprep.subr.bf16.mxu0 %v5421_v41  ;;  %v5494_v40 = vld [vmem:[%s7413_s6 + $0x10] ss:$28 sps:$4 sm:$0xff]   ;;  %v6970_v41 = vpack.c.bf16 %v2355_v39, %v2355_v39  ;;  %v5557_v24 = vld [vmem:[%s7413_s6 + $0x638] ss:$28 sps:$4 sm:$0xff]   ;;  %v5559_v39 = vld [vmem:[%s7413_s6 + $0x2e8] ss:$28 sps:$4 sm:$0xff]  }
 0x62f   :  { %v5556_v19 = vld [vmem:[%s7413_s6 + $0x2b4] ss:$28 sps:$4 sm:$0xff]  }
 0x631   :  { %3856 = vmatpush1.bf16.msra.mxu1 %v5416_v43  ;;  %3938 = vmatpush1.bf16.msra.mxu0 %v5419_v44  ;;  %v5498_v43 = vld [vmem:[%s7413_s6 + $0x18] ss:$28 sps:$4 sm:$0xff]   ;;  %v5501_v44 = vld [vmem:[%s7413_s6 + $0x4c] ss:$28 sps:$4 sm:$0xff]  }
 0x632   :  { %3857 = vmatprep.subr.bf16.mxu1 %v5424_v47  ;;  %3939 = vmatprep.subr.bf16.mxu0 %v5427_v48  ;;  %v5502_v47 = vld [vmem:[%s7413_s6 + $0x210] ss:$28 sps:$4 sm:$0xff]   ;;  %v4154_v48 = vld [vmem:[%s7415_s8] sm:$0x7f] }
 0x635   :  { %3858 = vmatpush1.bf16.msra.mxu1 %v5422_v50  ;;  %3940 = vmatpush1.bf16.msra.mxu0 %v5425_v52  ;;  %v5499_v50 = vld [vmem:[%s7413_s6 + $0x48] ss:$28 sps:$4 sm:$0xff]   ;;  %v6990_v52 = vmax.f32 %v4154_v48, 0.0 }
 0x636   :  { %3859 = vmatprep.subr.bf16.mxu1 %v5430_v53  ;;  %3941 = vmatprep.subr.bf16.mxu0 %v5433_v54  ;;  %v5503_v53 = vld [vmem:[%s7413_s6 + $0x50] ss:$28 sps:$4 sm:$0xff]   ;;  %v5506_v54 = vld [vmem:[%s7413_s6 + $0x84] ss:$28 sps:$4 sm:$0xff]  }
 0x637   :  { %v5568_v48 = vld [vmem:[%s7413_s6 + $0x4e8] ss:$28 sps:$4 sm:$0xff]  }
 0x639   :  { %3860 = vmatpush1.bf16.msra.mxu1 %v5428_v57  ;;  %3942 = vmatpush1.bf16.msra.mxu0 %v5431_v58  ;;  %v5507_v57 = vld [vmem:[%s7413_s6 + $0x248] ss:$28 sps:$4 sm:$0xff]   ;;  %v4156_v58 = vmul.f32 %v6990_v52, %v6990_v52 }
 0x63a   :  { %3861 = vmatprep.subr.bf16.mxu1 %v5436_v61  ;;  %3943 = vmatprep.subr.bf16.mxu0 %v5439_v62  ;;  %v5508_v62 = vld [vmem:[%s7413_s6 + $0x88] ss:$28 sps:$4 sm:$0xff]  }
 0x63b   :  { %v4157_v61 = vsel %vm648_vm7, %v4156_v58, 0.0  ;;  %v5569_v58 = vld [vmem:[%s7413_s6 + $0x358] ss:$28 sps:$4 sm:$0xff]  }
 0x63c   :  { %4158 = vadd.xlane.f32.xlu0 %v4157_v61  ;;  %v5576_v61 = vld [vmem:[%s7413_s6 + $0x394] ss:$28 sps:$4 sm:$0xff]  }
 0x63d   :  { %3862 = vmatpush1.bf16.msra.mxu1 %v5434_v17  ;;  %3944 = vmatpush1.bf16.msra.mxu0 %v5437_v63  ;;  %v5511_v17 = vld [vmem:[%s7413_s6 + $0xbc] ss:$28 sps:$4 sm:$0xff]  }
 0x63e   :  { %3863 = vmatprep.subr.bf16.mxu1 %v5442_v60  ;;  %3945 = vmatprep.subr.bf16.mxu0 %v5445_v13  ;;  %v5512_v63 = vld [vmem:[%s7413_s6 + $0x280] ss:$28 sps:$4 sm:$0xff]   ;;  %v5509_v60 = vld [vmem:[%s7413_s6 + $0xb8] ss:$28 sps:$4 sm:$0xff]  }
 0x63f   :  { %v5513_v13 = vld [vmem:[%s7413_s6 + $0xc0] ss:$28 sps:$4 sm:$0xff]  }
 0x641   :  { %3864 = vmatpush1.bf16.msra.mxu1 %v5440_v0  ;;  %3946 = vmatpush1.bf16.msra.mxu0 %v5443_v1  ;;  %v5516_v0 = vld [vmem:[%s7413_s6 + $0xf4] ss:$28 sps:$4 sm:$0xff]  }
 0x642   :  { %3865 = vmatprep.subr.bf16.mxu1 %v5448_v23  ;;  %3947 = vmatprep.subr.bf16.mxu0 %v5451_v2  ;;  %v5517_v1 = vld [vmem:[%s7413_s6 + $0x2b8] ss:$28 sps:$4 sm:$0xff]   ;;  %v5514_v23 = vld [vmem:[%s7413_s6 + $0xf0] ss:$28 sps:$4 sm:$0xff]  }
 0x643   :  { %v5518_v2 = vld [vmem:[%s7413_s6 + $0xf8] ss:$28 sps:$4 sm:$0xff]  }
 0x645   :  { %3866 = vmatpush1.bf16.msra.mxu1 %v5446_v3  ;;  %3948 = vmatpush1.bf16.msra.mxu0 %v5449_v20  ;;  %v5521_v3 = vld [vmem:[%s7413_s6 + $0x12c] ss:$28 sps:$4 sm:$0xff]  }
 0x646   :  { %3867 = vmatprep.subr.bf16.mxu1 %v5454_v25  ;;  %3949 = vmatprep.subr.bf16.mxu0 %v5457_v9  ;;  %v5522_v20 = vld [vmem:[%s7413_s6 + $0x2f0] ss:$28 sps:$4 sm:$0xff]   ;;  %v5519_v25 = vld [vmem:[%s7413_s6 + $0x128] ss:$28 sps:$4 sm:$0xff]  }
 0x647   :  { %v5523_v9 = vld [vmem:[%s7413_s6 + $0x130] ss:$28 sps:$4 sm:$0xff]  }
 0x649   :  { %3868 = vmatpush1.bf16.msra.mxu1 %v5452_v18  ;;  %3950 = vmatpush1.bf16.msra.mxu0 %v5455_v21  ;;  %v5526_v18 = vld [vmem:[%s7413_s6 + $0x164] ss:$28 sps:$4 sm:$0xff]  }
 0x64a   :  { %3869 = vmatprep.subr.bf16.mxu1 %v5460_v27  ;;  %3951 = vmatprep.subr.bf16.mxu0 %v5463_v35  ;;  %v5527_v21 = vld [vmem:[%s7413_s6 + $0x328] ss:$28 sps:$4 sm:$0xff]   ;;  %v5524_v27 = vld [vmem:[%s7413_s6 + $0x160] ss:$28 sps:$4 sm:$0xff]  }
 0x64b   :  { %v5528_v35 = vld [vmem:[%s7413_s6 + $0x168] ss:$28 sps:$4 sm:$0xff]  }
 0x64d   :  { %3870 = vmatpush1.bf16.msra.mxu1 %v5458_v26  ;;  %3952 = vmatpush1.bf16.msra.mxu0 %v5461_v31  ;;  %v5531_v26 = vld [vmem:[%s7413_s6 + $0x19c] ss:$28 sps:$4 sm:$0xff]  }
 0x64e   :  { %3871 = vmatprep.subr.bf16.mxu1 %v5466_v8  ;;  %3953 = vmatprep.subr.bf16.mxu0 %v5469_v55  ;;  %v5532_v31 = vld [vmem:[%s7413_s6 + $0x360] ss:$28 sps:$4 sm:$0xff]   ;;  %v5529_v8 = vld [vmem:[%s7413_s6 + $0x198] ss:$28 sps:$4 sm:$0xff]  }
 0x64f   :  { %v5533_v55 = vld [vmem:[%s7413_s6 + $0x1a0] ss:$28 sps:$4 sm:$0xff]  }
 0x651   :  { %3872 = vmatpush1.bf16.msra.mxu1 %v5464_v34  ;;  %3954 = vmatpush1.bf16.msra.mxu0 %v5467_v4  ;;  %v5536_v34 = vld [vmem:[%s7413_s6 + $0x1d4] ss:$28 sps:$4 sm:$0xff]  }
 0x652   :  { %3873 = vmatprep.subr.bf16.mxu1 %v5472_v22  ;;  %3955 = vmatprep.subr.bf16.mxu0 %v5475_v33  ;;  %v5537_v4 = vld [vmem:[%s7413_s6 + $0x558] ss:$28 sps:$4 sm:$0xff]   ;;  %v5534_v22 = vld [vmem:[%s7413_s6 + $0x1d0] ss:$28 sps:$4 sm:$0xff]  }
 0x653   :  { %v5538_v33 = vld [vmem:[%s7413_s6 + $0x398] ss:$28 sps:$4 sm:$0xff]  }
 0x655   :  { %3874 = vmatpush1.bf16.msra.mxu1 %v5470_v45  ;;  %3956 = vmatpush1.bf16.msra.mxu0 %v5473_v10  ;;  %v5541_v45 = vld [vmem:[%s7413_s6 + $0x20c] ss:$28 sps:$4 sm:$0xff]  }
 0x656   :  { %3875 = vmatprep.subr.bf16.mxu1 %v5478_v11  ;;  %3957 = vmatprep.subr.bf16.mxu0 %v5481_v6  ;;  %v5542_v10 = vld [vmem:[%s7413_s6 + $0x590] ss:$28 sps:$4 sm:$0xff]   ;;  %v5539_v11 = vld [vmem:[%s7413_s6 + $0x208] ss:$28 sps:$4 sm:$0xff]  }
 0x657   :  { %v5543_v6 = vld [vmem:[%s7413_s6 + $0x3d0] ss:$28 sps:$4 sm:$0xff]  }
 0x659   :  { %3876 = vmatpush1.bf16.msra.mxu1 %v5476_v37  ;;  %3958 = vmatpush1.bf16.msra.mxu0 %v5479_v12  ;;  %v5546_v37 = vld [vmem:[%s7413_s6 + $0x244] ss:$28 sps:$4 sm:$0xff]  }
 0x65a   :  { %3877 = vmatprep.subr.bf16.mxu1 %v5484_v29  ;;  %3959 = vmatprep.subr.bf16.mxu0 %v5487_v7  ;;  %v5547_v12 = vld [vmem:[%s7413_s6 + $0x5c8] ss:$28 sps:$4 sm:$0xff]   ;;  %v5544_v29 = vld [vmem:[%s7413_s6 + $0x240] ss:$28 sps:$4 sm:$0xff]  }
 0x65b   :  { %v5548_v7 = vld [vmem:[%s7413_s6 + $0x408] ss:$28 sps:$4 sm:$0xff]  }
 0x65d   :  { %3878 = vmatpush1.bf16.msra.mxu1 %v5482_v14  ;;  %3960 = vmatpush1.bf16.msra.mxu0 %v5485_v56  ;;  %v5551_v14 = vld [vmem:[%s7413_s6 + $0x27c] ss:$28 sps:$4 sm:$0xff]  }
 0x65e   :  { %3879 = vmatprep.subr.bf16.mxu1 %v5490_v15  ;;  %3961 = vmatprep.subr.bf16.mxu0 %v5493_v16  ;;  %v5552_v56 = vld [vmem:[%s7413_s6 + $0x600] ss:$28 sps:$4 sm:$0xff]   ;;  %v5549_v15 = vld [vmem:[%s7413_s6 + $0x278] ss:$28 sps:$4 sm:$0xff]  }
 0x65f   :  { %v5553_v16 = vld [vmem:[%s7413_s6 + $0x440] ss:$28 sps:$4 sm:$0xff]  }
 0x661   :  { %3880 = vmatpush1.bf16.msra.mxu1 %v5488_v30  ;;  %3962 = vmatpush1.bf16.msra.mxu0 %v5491_v36  ;;  %v5554_v30 = vld [vmem:[%s7413_s6 + $0x2b0] ss:$28 sps:$4 sm:$0xff]   ;;  %v5558_v36 = vld [vmem:[%s7413_s6 + $0x478] ss:$28 sps:$4 sm:$0xff]  }
 0x662   :  { %3972 = vmatprep.subr.bf16.mxu1 %v5496_v32  ;;  %4919 = vmatprep.subr.bf16.mxu0 %v5497_v38  ;;  %v5561_v32 = vld [vmem:[%s7413_s6 + $0x2ec] ss:$28 sps:$4 sm:$0xff]  }
 0x663   :  { %v5562_v38 = vld [vmem:[%s7413_s6 + $0x670] ss:$28 sps:$4 sm:$0xff]  }
 0x664   :  { %3882 = vmatmul.mubr.bf16.vlgmr.msra.gmra.mrb[24].mxu1 %v6970_v41  ;;  %3964 = vmatmul.mubr.bf16.vlgmr.msra.gmra.mrb[28].mxu0 %v6970_v41 }
 0x665   :  { %3973 = vmatpush1.bf16.msra.mxu1 %v5494_v40  ;;  %4004 = vmatprep.mubr.bf16.mxu1 %v6759_v28  ;;  %v5563_v40 = vld [vmem:[%s7413_s6 + $0x4b0] ss:$28 sps:$4 sm:$0xff]  }
 0x666   :  { %4920 = vmatpush3.bf16.msra.mxu0 %v5498_v43  ;;  %4086 = vmatprep.mubr.bf16.mxu0 %v6759_v28  ;;  %v5504_v28 = vld [vmem:[%s7413_s6 + $0x80] ss:$28 sps:$4 sm:$0xff]  }
 0x667   :  { %3974 = vmatprep.subr.bf16.mxu1 %v5501_v44  ;;  %4921 = vmatprep.subr.bf16.mxu0 %v5502_v47  ;;  %v5566_v43 = vld [vmem:[%s7413_s6 + $0x324] ss:$28 sps:$4 sm:$0xff]  }
 0x668   :  { %v5567_v44 = vld [vmem:[%s7413_s6 + $0x6a8] ss:$28 sps:$4 sm:$0xff]   ;;  %v5564_v47 = vld [vmem:[%s7413_s6 + $0x320] ss:$28 sps:$4 sm:$0xff]  }
 0x669   :  { %3975 = vmatpush1.bf16.msra.mxu1 %v5499_v50  ;;  %v5571_v50 = vld [vmem:[%s7413_s6 + $0x35c] ss:$28 sps:$4 sm:$0xff]  }
 0x66a   :  { %4922 = vmatpush3.bf16.msra.mxu0 %v5503_v53  ;;  %3976 = vmatprep.subr.bf16.mxu1 %v5506_v54  ;;  %v5572_v53 = vld [vmem:[%s7413_s6 + $0x6e0] ss:$28 sps:$4 sm:$0xff]  }
 0x66b   :  { %4923 = vmatprep.subr.bf16.mxu0 %v5507_v57  ;;  %v4297_v54 = vld [vmem:[%s7416_s9] sm:$0xff]  ;;  %v4298_v57 = vld [vmem:[%s7416_s9 + $0x8] sm:$0xff] }
 0x66d   :  { %3977 = vmatpush1.bf16.msra.mxu1 %v5504_v28  ;;  %v5573_v28 = vld [vmem:[%s7413_s6 + $0x520] ss:$28 sps:$4 sm:$0xff]  }
 0x66e   :  { %4924 = vmatpush3.bf16.msra.mxu0 %v5508_v62  ;;  %3978 = vmatprep.subr.bf16.mxu1 %v5511_v17  ;;  %v5069_v62 = vpack.c.bf16 %v4298_v57, %v4297_v54  ;;  %v5574_v17 = vld [vmem:[%s7413_s6 + $0x390] ss:$28 sps:$4 sm:$0xff]   ;;  %v5621_v54 = vld [vmem:[%s7413_s6 + $0x6dc] ss:$28 sps:$4 sm:$0xff]  }
 0x66f   :  { %4925 = vmatprep.subr.bf16.mxu0 %v5512_v63  ;;  %v4299_v63 = vld [vmem:[%s7416_s9 + $0x10] sm:$0xff] }
 0x670   :  { %v5619_v57 = vld [vmem:[%s7413_s6 + $0x6d8] ss:$28 sps:$4 sm:$0xff]  }
 0x671   :  { %3979 = vmatpush1.bf16.msra.mxu1 %v5509_v60  ;;  %v4300_v60 = vld [vmem:[%s7416_s9 + $0x18] sm:$0xff] }
 0x672   :  { %4926 = vmatpush3.bf16.msra.mxu0 %v5513_v13  ;;  %3980 = vmatprep.subr.bf16.mxu1 %v5516_v0  ;;  %v5579_v13 = vld [vmem:[%s7413_s6 + $0x3cc] ss:$28 sps:$4 sm:$0xff]   ;;  %v5073_v0 = vpack.c.bf16 %v4300_v60, %v4299_v63 }
 0x673   :  { %4927 = vmatprep.subr.bf16.mxu0 %v5517_v1  ;;  %v4301_v1 = vld [vmem:[%s7416_s9 + $0x20] sm:$0xff] }
 0x675   :  { %3981 = vmatpush1.bf16.msra.mxu1 %v5514_v23  ;;  %v4302_v23 = vld [vmem:[%s7416_s9 + $0x28] sm:$0xff] }
 0x676   :  { %4928 = vmatpush3.bf16.msra.mxu0 %v5518_v2  ;;  %3982 = vmatprep.subr.bf16.mxu1 %v5521_v3  ;;  %v5577_v2 = vld [vmem:[%s7413_s6 + $0x3c8] ss:$28 sps:$4 sm:$0xff]   ;;  %v5077_v3 = vpack.c.bf16 %v4302_v23, %v4301_v1 }
 0x677   :  { %4929 = vmatprep.subr.bf16.mxu0 %v5522_v20  ;;  %v4303_v20 = vld [vmem:[%s7416_s9 + $0x30] sm:$0xff] }
 0x679   :  { %3983 = vmatpush1.bf16.msra.mxu1 %v5519_v25  ;;  %v4304_v25 = vld [vmem:[%s7416_s9 + $0x38] sm:$0xff] }
 0x67a   :  { %4930 = vmatpush3.bf16.msra.mxu0 %v5523_v9  ;;  %3984 = vmatprep.subr.bf16.mxu1 %v5526_v18  ;;  %v5081_v9 = vpack.c.bf16 %v4304_v25, %v4303_v20  ;;  %v4305_v18 = vld [vmem:[%s7416_s9 + $0x40] sm:$0xff] }
 0x67b   :  { %4931 = vmatprep.subr.bf16.mxu0 %v5527_v21  ;;  %v4306_v21 = vld [vmem:[%s7416_s9 + $0x48] sm:$0xff] }
 0x67d   :  { %3985 = vmatpush1.bf16.msra.mxu1 %v5524_v27  ;;  %v5583_v27 = vld [vmem:[%s7413_s6 + $0x438] ss:$28 sps:$4 sm:$0xff]  }
 0x67e   :  { %4932 = vmatpush3.bf16.msra.mxu0 %v5528_v35  ;;  %3986 = vmatprep.subr.bf16.mxu1 %v5531_v26  ;;  %v5588_v35 = vld [vmem:[%s7413_s6 + $0x474] ss:$28 sps:$4 sm:$0xff]   ;;  %v5085_v26 = vpack.c.bf16 %v4306_v21, %v4305_v18 }
 0x67f   :  { %4933 = vmatprep.subr.bf16.mxu0 %v5532_v31  ;;  %v4307_v31 = vld [vmem:[%s7416_s9 + $0x50] sm:$0xff] }
 0x681   :  { %3987 = vmatpush1.bf16.msra.mxu1 %v5529_v8  ;;  %v4308_v8 = vld [vmem:[%s7416_s9 + $0x58] sm:$0xff] }
 0x682   :  { %4934 = vmatpush3.bf16.msra.mxu0 %v5533_v55  ;;  %3988 = vmatprep.subr.bf16.mxu1 %v5536_v34  ;;  %v5586_v55 = vld [vmem:[%s7413_s6 + $0x470] ss:$28 sps:$4 sm:$0xff]  }
 0x683   :  { %4941 = vmatprep.subr.bf16.mxu0 %v5537_v4  ;;  %v5591_v34 = vld [vmem:[%s7413_s6 + $0x4ac] ss:$28 sps:$4 sm:$0xff]   ;;  %v5089_v4 = vpack.c.bf16 %v4308_v8, %v4307_v31 }
 0x685   :  { %4087 = vmatmul.mubr.bf16.vlgmr.msra.gmra.mrb[32].mxu0 %v6767_v42  ;;  %3989 = vmatpush1.bf16.msra.mxu1 %v5534_v22  ;;  %v4309_v22 = vld [vmem:[%s7416_s9 + $0x60] sm:$0xff] }
 0x686   :  { %4942 = vmatpush3.bf16.msra.mxu0 %v5538_v33  ;;  %4126 = vmatprep.mubr.bf16.mxu0 %v6780_v46  ;;  %v4310_v33 = vld [vmem:[%s7416_s9 + $0x68] sm:$0xff] }
 0x687   :  { %3990 = vmatprep.subr.bf16.mxu1 %v5541_v45  ;;  %4943 = vmatprep.subr.bf16.mxu0 %v5542_v10  ;;  %v5589_v45 = vld [vmem:[%s7413_s6 + $0x4a8] ss:$28 sps:$4 sm:$0xff]  }
 0x688   :  { %v5594_v10 = vld [vmem:[%s7413_s6 + $0x4e4] ss:$28 sps:$4 sm:$0xff]  }
 0x689   :  { %3991 = vmatpush1.bf16.msra.mxu1 %v5539_v11  ;;  %v5093_v11 = vpack.c.bf16 %v4310_v33, %v4309_v22 }
 0x68a   :  { %4944 = vmatpush3.bf16.msra.mxu0 %v5543_v6  ;;  %3992 = vmatprep.subr.bf16.mxu1 %v5546_v37  ;;  %v4311_v6 = vld [vmem:[%s7416_s9 + $0x70] sm:$0xff]  ;;  %v4312_v37 = vld [vmem:[%s7416_s9 + $0x78] sm:$0xff] }
 0x68b   :  { %4945 = vmatprep.subr.bf16.mxu0 %v5547_v12  ;;  %v5592_v12 = vld [vmem:[%s7413_s6 + $0x4e0] ss:$28 sps:$4 sm:$0xff]  }
 0x68d   :  { %3993 = vmatpush1.bf16.msra.mxu1 %v5544_v29  ;;  %v5597_v29 = vld [vmem:[%s7413_s6 + $0x51c] ss:$28 sps:$4 sm:$0xff]  }
 0x68e   :  { %4946 = vmatpush3.bf16.msra.mxu0 %v5548_v7  ;;  %3994 = vmatprep.subr.bf16.mxu1 %v5551_v14  ;;  %v5097_v7 = vpack.c.bf16 %v4312_v37, %v4311_v6  ;;  %v5595_v14 = vld [vmem:[%s7413_s6 + $0x518] ss:$28 sps:$4 sm:$0xff]  }
 0x68f   :  { %4947 = vmatprep.subr.bf16.mxu0 %v5552_v56  ;;  %v5600_v56 = vld [vmem:[%s7413_s6 + $0x554] ss:$28 sps:$4 sm:$0xff]  }
 0x691   :  { %3995 = vmatpush1.bf16.msra.mxu1 %v5549_v15  ;;  %v5598_v15 = vld [vmem:[%s7413_s6 + $0x550] ss:$28 sps:$4 sm:$0xff]  }
 0x692   :  { %4948 = vmatpush3.bf16.msra.mxu0 %v5553_v16  ;;  %3996 = vmatprep.subr.bf16.mxu1 %v5556_v19  ;;  %v5603_v16 = vld [vmem:[%s7413_s6 + $0x58c] ss:$28 sps:$4 sm:$0xff]   ;;  %v5700_v19 = vld [vmem:[#allocation4 + $0x8] sm:$0xff] }
 0x693   :  { %4949 = vmatprep.subr.bf16.mxu0 %v5557_v24  ;;  %v5601_v24 = vld [vmem:[%s7413_s6 + $0x588] ss:$28 sps:$4 sm:$0xff]  }
 0x695   :  { %3997 = vmatpush1.bf16.msra.mxu1 %v5554_v30  ;;  %v5701_v30 = vld [vmem:[#allocation4 + $0x10] sm:$0xff] }
 0x696   :  { %4950 = vmatpush3.bf16.msra.mxu0 %v5558_v36  ;;  %3998 = vmatprep.subr.bf16.mxu1 %v5561_v32  ;;  %v5606_v36 = vld [vmem:[%s7413_s6 + $0x5c4] ss:$28 sps:$4 sm:$0xff]  }
 0x697   :  { %4951 = vmatprep.subr.bf16.mxu0 %v5562_v38  ;;  %v5702_v32 = vld [vmem:[#allocation4 + $0x18] sm:$0xff] }
 0x698   :  { %v5604_v38 = vld [vmem:[%s7413_s6 + $0x5c0] ss:$28 sps:$4 sm:$0xff]  }
 0x699   :  { %3999 = vmatpush1.bf16.msra.mxu1 %v5559_v39  ;;  %v5609_v39 = vld [vmem:[%s7413_s6 + $0x5fc] ss:$28 sps:$4 sm:$0xff]  }
 0x69a   :  { %4952 = vmatpush3.bf16.msra.mxu0 %v5563_v40  ;;  %4000 = vmatprep.subr.bf16.mxu1 %v5566_v43  ;;  %v5607_v40 = vld [vmem:[%s7413_s6 + $0x5f8] ss:$28 sps:$4 sm:$0xff]  }
 0x69b   :  { %4953 = vmatprep.subr.bf16.mxu0 %v5567_v44  ;;  %v5612_v43 = vld [vmem:[%s7413_s6 + $0x634] ss:$28 sps:$4 sm:$0xff]  }
 0x69c   :  { %v5610_v44 = vld [vmem:[%s7413_s6 + $0x630] ss:$28 sps:$4 sm:$0xff]  }
 0x69d   :  { %4001 = vmatpush1.bf16.msra.mxu1 %v5564_v47  ;;  %v5615_v47 = vld [vmem:[%s7413_s6 + $0x66c] ss:$28 sps:$4 sm:$0xff]  }
 0x69e   :  { %4954 = vmatpush3.bf16.msra.mxu0 %v5568_v48  ;;  %4002 = vmatprep.subr.bf16.mxu1 %v5571_v50  ;;  %v5613_v48 = vld [vmem:[%s7413_s6 + $0x668] ss:$28 sps:$4 sm:$0xff]  }
 0x69f   :  { %4955 = vmatprep.subr.bf16.mxu0 %v5572_v53  ;;  %v5618_v50 = vld [vmem:[%s7413_s6 + $0x6a4] ss:$28 sps:$4 sm:$0xff]  }
 0x6a0   :  { %v5616_v53 = vld [vmem:[%s7413_s6 + $0x6a0] ss:$28 sps:$4 sm:$0xff]  }
 0x6a1   :  { %4003 = vmatpush1.bf16.msra.mxu1 %v5569_v58  ;;  %v2631_v58 = vsub.s32 2, %v6200_v49 }
 0x6a2   :  { %4956 = vmatpush3.bf16.msra.mxu0 %v5573_v28  ;;  %4013 = vmatprep.subr.bf16.mxu1 %v5576_v61  ;;  %v2619_v28 = vld [vmem:[%s7414_s7] sm:$0xff]  ;;  %v2627_v61 = vsub.s32 1, %v6200_v49 }
 0x6a3   :  { %5070 = vmatprep.subr.bf16.mxu0 %v5069_v62 }
 0x6a4   :  { %4005 = vmatmul.mubr.bf16.vlgmr.msra.gmra.mrb[28].mxu1 %v6767_v42  ;;  %v5582_v42 = vld [vmem:[%s7413_s6 + $0x404] ss:$28 sps:$4 sm:$0xff]   ;;  %v2628_v63 = vrot.slane %v2619_v28, %v2627_v61 }
 0x6a5   :  { %4127 = vmatmul.mubr.bf16.vlgmr.msra.gmra.mrb[36].mxu0 %v6970_v41  ;;  %4014 = vmatpush1.bf16.msra.mxu1 %v5574_v17  ;;  %v2632_v17 = vrot.slane %v2619_v28, %v2631_v58 }
 0x6a6   :  { %4045 = vmatprep.mubr.bf16.mxu1 %v6780_v46  ;;  %5072 = vmatpush3.bf16.msra.mxu0 %v5069_v62  ;;  %v5580_v46 = vld [vmem:[%s7413_s6 + $0x400] ss:$28 sps:$4 sm:$0xff]   ;;  %v2635_v62 = vsub.s32 3, %v6200_v49 }
 0x6a7   :  { %5063 = vmatprep.mubr.f32.mxu0 %v6690_v5  ;;  %4015 = vmatprep.subr.bf16.mxu1 %v5579_v13  ;;  %v5585_v5 = vld [vmem:[%s7413_s6 + $0x43c] ss:$28 sps:$4 sm:$0xff]   ;;  %v2624_v13 = vrot.slane %v2619_v28, %v6216_v59 }
 0x6a8   :  { %5074 = vmatprep.subr.bf16.mxu0 %v5073_v0  ;;  %v2636_v60 = vrot.slane %v2619_v28, %v2635_v62 }
 0x6a9   :  { %4016 = vmatpush1.bf16.msra.mxu1 %v5577_v2 }
 0x6aa   :  { %5076 = vmatpush3.bf16.msra.mxu0 %v5073_v0  ;;  %4017 = vmatprep.subr.bf16.mxu1 %v5582_v42 }
 0x6ab   :  { %5078 = vmatprep.subr.bf16.mxu0 %v5077_v3 }
 0x6ad   :  { %4018 = vmatpush1.bf16.msra.mxu1 %v5580_v46 }
 0x6ae   :  { %5080 = vmatpush3.bf16.msra.mxu0 %v5077_v3  ;;  %4019 = vmatprep.subr.bf16.mxu1 %v5585_v5 }
 0x6af   :  { %5082 = vmatprep.subr.bf16.mxu0 %v5081_v9 }
 0x6b1   :  { %4020 = vmatpush1.bf16.msra.mxu1 %v5583_v27 }
 0x6b2   :  { %5084 = vmatpush3.bf16.msra.mxu0 %v5081_v9  ;;  %4021 = vmatprep.subr.bf16.mxu1 %v5588_v35 }
 0x6b3   :  { %5086 = vmatprep.subr.bf16.mxu0 %v5085_v26 }
 0x6b5   :  { %4022 = vmatpush1.bf16.msra.mxu1 %v5586_v55 }
 0x6b6   :  { %5088 = vmatpush3.bf16.msra.mxu0 %v5085_v26  ;;  %4023 = vmatprep.subr.bf16.mxu1 %v5591_v34 }
 0x6b7   :  { %5090 = vmatprep.subr.bf16.mxu0 %v5089_v4 }
 0x6b9   :  { %4024 = vmatpush1.bf16.msra.mxu1 %v5589_v45  ;;  %v2647_v45 = vsub.s32 6, %v6200_v49 }
 0x6ba   :  { %5092 = vmatpush3.bf16.msra.mxu0 %v5089_v4  ;;  %4025 = vmatprep.subr.bf16.mxu1 %v5594_v10 }
 0x6bb   :  { %5094 = vmatprep.subr.bf16.mxu0 %v5093_v11  ;;  %v2648_v10 = vrot.slane %v2619_v28, %v2647_v45 }
 0x6bd   :  { %4026 = vmatpush1.bf16.msra.mxu1 %v5592_v12 }
 0x6be   :  { %5096 = vmatpush3.bf16.msra.mxu0 %v5093_v11  ;;  %4027 = vmatprep.subr.bf16.mxu1 %v5597_v29 }
 0x6bf   :  { %5098 = vmatprep.subr.bf16.mxu0 %v5097_v7 }
 0x6c1   :  { %4028 = vmatpush1.bf16.msra.mxu1 %v5595_v14 }
 0x6c2   :  { %5100 = vmatpush3.bf16.msra.mxu0 %v5097_v7  ;;  %4029 = vmatprep.subr.bf16.mxu1 %v5600_v56  ;;  %v4865_v56 = vld [vmem:[%s7417_s10] ss:$0 sm:$0xff] }
 0x6c5   :  { %5064 = vmatmul.mubr.f32.vlgmr.msra.gmra.mrb[40].mxu0 %v5700_v19  ;;  %4030 = vmatpush1.bf16.msra.mxu1 %v5598_v15 }
 0x6c6   :  { %5066 = vmatprep.mubr.f32.mxu0 %v5701_v30  ;;  %4031 = vmatprep.subr.bf16.mxu1 %v5603_v16 }
 0x6c9   :  { %5067 = vmatmul.mubr.f32.gmra.mrb[42].mxu0 %v5702_v32  ;;  %4032 = vmatpush1.bf16.msra.mxu1 %v5601_v24 }
 0x6ca   :  { %4033 = vmatprep.subr.bf16.mxu1 %v5606_v36 }
 0x6cd   :  { %4034 = vmatpush1.bf16.msra.mxu1 %v5604_v38 }
 0x6ce   :  { %4035 = vmatprep.subr.bf16.mxu1 %v5609_v39  ;;  %v4159_v39 = vpop.xlane.xlu0 %4158 }
 0x6d1   :  { %4036 = vmatpush1.bf16.msra.mxu1 %v5607_v40  ;;  %v4160_v40 = vmax.f32 %v4159_v39, 1e-24 }
 0x6d2   :  { %4037 = vmatprep.subr.bf16.mxu1 %v5612_v43  ;;  %v2643_v43 = vsub.s32 5, %v6200_v49 }
 0x6d3   :  { %5694 = vrsqrt.f32 %v4160_v40 }
 0x6d5   :  { %4038 = vmatpush1.bf16.msra.mxu1 %v5610_v44  ;;  %v2639_v44 = vsub.s32 4, %v6200_v49 }
 0x6d6   :  { %4039 = vmatprep.subr.bf16.mxu1 %v5615_v47  ;;  %v2644_v47 = vrot.slane %v2619_v28, %v2643_v43 }
 0x6d9   :  { %4040 = vmatpush1.bf16.msra.mxu1 %v5613_v48  ;;  %v2640_v48 = vrot.slane %v2619_v28, %v2639_v44 }
 0x6da   :  { %4041 = vmatprep.subr.bf16.mxu1 %v5618_v50 }
 0x6dd   :  { %4042 = vmatpush1.bf16.msra.mxu1 %v5616_v53  ;;  %v5695_v53 = vpop.eup %5694 }
 0x6de   :  { %4043 = vmatprep.subr.bf16.mxu1 %v5621_v54 }
 0x6e1   :  { %4044 = vmatpush1.bf16.msra.mxu1 %v5619_v57 }
 0x6e4   :  { %4046 = vmatmul.mubr.bf16.vlgmr.msra.gmra.mrb[28].mxu1 %v6970_v41 }
 0x737   :  { %v3883_v0 = vpop.f32.mrb[24].mxu1  ;;  %v3965_v1 = vpop.f32.mrb[28].mxu0 }
 0x738   :  { %v5103_v23 = vadd.f32 %v3965_v1, %v2632_v17  ;;  %v3885_v2 = vpop.f32.mrb[25].mxu1  ;;  %v3967_v41 = vpop.f32.mrb[29].mxu0  ;;  %v5101_v9 = vadd.f32 %v3883_v0, %v2624_v13 }
 0x739   :  { %v5102_v42 = vadd.f32 %v3885_v2, %v2628_v63  ;;  %v5104_v3 = vadd.f32 %v3967_v41, %v2636_v60  ;;  %v3887_v20 = vpop.f32.mrb[26].mxu1  ;;  %v3969_v25 = vpop.f32.mrb[30].mxu0  ;;  %v4162_v63 = vmul.f32 %v5695_v53, %v6990_v52 }
 0x73a   :  { %v3888_v46 = vpop.f32.mrb[27].mxu1  ;;  %v3970_v5 = vpop.f32.mrb[31].mxu0  ;;  %v4138_v21 = vrot.slane %v5103_v23, 4  ;;  %v5753_v25 = vmov 1983009808  }
 0x73b   :  { %v4135_v18 = vrot.slane %v5102_v42, 6  ;;  %v4141_v35 = vrot.slane %v5104_v3, 2  ;;  %v4171_v23 = vrot.slane %v4162_v63, %v6206_v51  ;;  %v4256_v52 = vunpack.c.l.s4 %v5753_v25 }
 0x73d   :  { %v4149_v27 = vsel %vm638_vm2, %v5101_v9, %v4135_v18  ;;  %v4179_v2 = vcombine.high %v4171_v23, %v4171_v23  ;;  %v4187_v41 = vrot.slane %v4171_v23, %v6206_v51 }
 0x73e   :  { %v4150_v26 = vsel %vm642_vm4, %v4149_v27, %v4138_v21  ;;  %v4257_v27 = vunpack.c.0.s8 %v4256_v52 }
 0x73f   :  { %v7328_v31 = vsel %vm646_vm6, %v4150_v26, %v4141_v35  ;;  %v4201_v42 = vrot.slane %v4179_v2, %v6206_v51  ;;  %v4209_v3 = vcombine.high %v4187_v41, %v4187_v41  ;;  %v4215_v46 = vrot.slane %v4187_v41, %v6216_v59 }
 0x740   :  { %v4240_v8 = vmul.f32 %v7328_v31, %v7328_v31 }
 0x741   :  { %v4211_v20 = vcombine.high %v4201_v42, %v4201_v42  ;;  %v4219_v9 = vrot.slane %v4201_v42, %v6216_v59  ;;  %v4223_v18 = vrot.slane %v4209_v3, %v6216_v59 }
 0x742   :  { %4242 = vadd.xlane.f32.xlu0 %v4240_v8 }
 0x743   :  { %v4227_v21 = vrot.slane %v4211_v20, %v6216_v59  ;;  %v4253_v26 = vcombine.low %v4215_v46, %v4219_v9 }
 0x745   :  { %v4254_v8 = vcombine.low %v4223_v18, %v4227_v21 }
 0x758   :  { %v4935_v55 = vpop.f32.mrb[32].mxu0 }
 0x759   :  { %v4936_v34 = vpop.f32.mrb[33].mxu0 }
 0x75a   :  { %v4937_v4 = vadd.f32 %v4936_v34, %v4935_v55  ;;  %v4938_v22 = vpop.f32.mrb[34].mxu0  ;;  %v4260_v55 = vsub.s32 %v4257_v27, %v6200_v49 }
 0x75b   :  { %v4939_v33 = vpop.f32.mrb[35].mxu0 }
 0x75c   :  { %v4089_v37 = vadd.f32 %v4937_v4, %v2648_v10  ;;  %v4261_v34 = vrot.slane %v4253_v26, %v4260_v55  ;;  %v4268_v4 = vrot.slane %v4254_v8, %v4260_v55 }
 0x75e   :  { %v4269_v22 = vcombine.low %v4261_v34, %v4268_v4 }
 0x778   :  { %v4957_v11 = vpop.f32.mrb[36].mxu0 }
 0x779   :  { %v4958_v6 = vpop.f32.mrb[37].mxu0 }
 0x77a   :  { %v4959_v12 = vadd.f32 %v4958_v6, %v4957_v11  ;;  %v4960_v29 = vpop.f32.mrb[38].mxu0  ;;  %v4164_v11 = vcombine.high %v4162_v63, %v4162_v63 }
 0x77b   :  { %v4961_v7 = vpop.f32.mrb[39].mxu0 }
 0x77c   :  { %v4129_v14 = vadd.f32 %v4959_v12, %v4089_v37  ;;  %v4178_v6 = vrot.slane %v4164_v11, %v6206_v51 }
 0x77e   :  { %v4147_v60 = vrot.slane %v4129_v14, 4  ;;  %v4180_v37 = vcombine.high %v4178_v6, %v4178_v6  ;;  %v4194_v12 = vrot.slane %v4178_v6, %v6206_v51 }
 0x780   :  { %v4208_v29 = vrot.slane %v4180_v37, %v6206_v51  ;;  %v4231_v49 = vrot.slane %v4194_v12, %v6216_v59 }
 0x798   :  { %v5065_v15 = vpop.f32.mrb[40].mxu0 }
 0x799   :  { %v4392_v16 = vadd.f32 %v5065_v15, %v4865_v56  ;;  %v4386_v19 = vpop.f32.mrb[41].mxu0  ;;  %v4235_v15 = vrot.slane %v4208_v29, %v6216_v59 }
 0x79a   :  { %v4387_v24 = vadd.f32 %v4865_v56, %v4386_v19 }
 0x79b   :  { %4406 = vst [vmem:[%s7419_s12 + $0x8] sm:$0xff] %v4392_v16  ;;  %v4270_v16 = vcombine.low %v4231_v49, %v4235_v15 }
 0x79c   :  { %4405 = vst [vmem:[%s7419_s12] sm:$0xff] %v4387_v24  ;;  %v5068_v30 = vpop.f32.mrb[42].mxu0 }
 0x79d   :  { %v4402_v36 = vadd.f32 %v5068_v30, %v4865_v56  ;;  %v4396_v32 = vpop.f32.mrb[43].mxu0  ;;  %v4277_v19 = vrot.slane %v4270_v16, %v4260_v55 }
 0x79e   :  { %v4397_v38 = vadd.f32 %v4865_v56, %v4396_v32  ;;  %v4210_v56 = vcombine.high %v4194_v12, %v4194_v12 }
 0x79f   :  { %4408 = vst [vmem:[%s7419_s12 + $0x18] sm:$0xff] %v4402_v36 }
 0x7a0   :  { %4407 = vst [vmem:[%s7419_s12 + $0x10] sm:$0xff] %v4397_v38 }
 0x7b7   :  { %v4047_v50 = vpop.f32.mrb[28].mxu1 }
 0x7b8   :  { %v4049_v54 = vpop.f32.mrb[29].mxu1  ;;  %v5105_v62 = vadd.f32 %v4047_v50, %v2640_v48 }
 0x7b9   :  { %v5106_v57 = vadd.f32 %v4049_v54, %v2644_v47  ;;  %v4051_v58 = vpop.f32.mrb[30].mxu1 }
 0x7ba   :  { %v4052_v61 = vpop.f32.mrb[31].mxu1 }
 0x7bb   :  { %v4144_v17 = vrot.slane %v5106_v57, 6 }
 0x7bd   :  { %v4152_v13 = vsel %vm638_vm2, %v5105_v62, %v4144_v17 }
 0x7be   :  { %v4153_v0 = vsel %vm642_vm4, %v4152_v13, %v4147_v60 }
 0x7bf   :  { %v4241_v1 = vmul.f32 %v4153_v0, %v4153_v0 }
 0x7c1   :  { %v4244_v28 = vsel %vm646_vm6, %v4241_v1, 0.0 }
 0x7c2   :  { %4245 = vadd.xlane.f32.xlu1 %v4244_v28 }
 0x7cf   :  { %v4243_v5 = vpop.xlane.xlu0 %4242 }
 0x7d0   :  { %v4247_v35 = vmax.f32 %v4243_v5, 1e-24 }
 0x7d2   :  { %5696 = vrsqrt.f32 %v4247_v35 }
 0x7dc   :  { %v5697_v33 = vpop.eup %5696 }
 0x7dd   :  { %v4251_v45 = vmul.f32 %v5697_v33, %v7328_v31  ;;  %v4239_v31 = vrot.slane %v4210_v56, %v6216_v59 }
 0x7df   :  { %v4288_v10 = vmul.f32 %v4269_v22, %v4251_v45  ;;  %v4284_v24 = vrot.slane %v4239_v31, %v4260_v55 }
 0x7e1   :  { %4290 = vadd.xlane.f32.xlu1 %v4288_v10  ;;  %v4285_v32 = vcombine.low %v4277_v19, %v4284_v24 }
 0x84f   :  { %v4246_v7 = vpop.xlane.xlu1 %4245 }
 0x850   :  { %v4248_v14 = vmax.f32 %v4246_v7, 1e-24 }
 0x852   :  { %5698 = vrsqrt.f32 %v4248_v14 }
 0x85c   :  { %v5699_v30 = vpop.eup %5698 }
 0x85d   :  { %v4252_v36 = vmul.f32 %v5699_v30, %v4153_v0 }
 0x85f   :  { %v4289_v38 = vmul.f32 %v4285_v32, %v4252_v36 }
 0x861   :  { %v4292_v39 = vsel %vm646_vm6, %v4289_v38, 0.0 }
 0x862   :  { %4293 = vadd.xlane.f32.xlu0 %v4292_v39 }
 0x86e   :  { %v4291_v51 = vpop.xlane.xlu1 %4290 }
 0x86f   :  { %4295 = vst [vmem:[%s7418_s11] sm:$0xff] %v4291_v51 }
 0x870   :  { %5714 = shalt.err (!%p5711_p4)
}
 0x871   :  { %s5715_s25 = scalar_lea.hbm %s7420_s13, 128 }
 0x872   :  { %p5716_p5 = scmp.ne.s32.totalorder %s7420_s13, %s5715_s25  ;;  %p5719_p6 = scmp.lt.u32.totalorder %s5715_s25, %s7420_s13 }
 0x874   :  { %p5721_p7 = pnand %p5719_p6, %p5716_p5 }
 0x876   :  { %5724 = shalt.err (!%p5721_p7)
}
 0x877   :  { %4422 = dma.vmem_to_hbm [thread:$0]  %s4420_s20, 128, %s7420_s13, [#allocation3]  }
 0x878   :  { %s5725_s15 = scalar_lea.vmem %s7373_s22, 512  ;;  %p5730_p9 = scmp.lt.s32.totalorder %s7373_s22, %s7373_s22 }
 0x879   :  { %p5726_p8 = scmp.ne.s32.totalorder %s7373_s22, %s5725_s15  ;;  %p5731_p10 = scmp.lt.s32.totalorder %s5725_s15, %s5725_s15 }
 0x87b   :  { %p5732_p11 = por %p5731_p10, %p5730_p9 }
 0x87d   :  { %p5733_p12 = pnand %p5732_p11, %p5726_p8 }
 0x87f   :  { %5736 = shalt.err (!%p5733_p12)
}
 0x880   :  { %s5737_s7 = scalar_lea.hbm %s7421_s14, 512 }
 0x881   :  { %p5738_p13 = scmp.ne.s32.totalorder %s7421_s14, %s5737_s7  ;;  %p5741_p0 = scmp.lt.u32.totalorder %s5737_s7, %s7421_s14 }
 0x883   :  { %p5743_p1 = pnand %p5741_p0, %p5738_p13 }
 0x885   :  { %5746 = shalt.err (!%p5743_p1)
}
 0x886   :  { %s5756_s13 = smov 128   ;;  %s5757_s17 = smov 8  }
 0x887   :  { %4434 = dma.vmem_to_hbm [thread:$0]  %s7373_s22, 512, %s7421_s14, [#allocation5], %s5756_s13, %s5756_s13, %s5757_s17  }
 0x8ef   :  { %v4294_v59 = vpop.xlane.xlu0 %4293 }
 0x8f0   :  { %4296 = vst [vmem:[%s7418_s11 + $0x8] sm:$0x3f] %v4294_v59 }
 0x8f1   :  { %5747 = dma.done.wait [#allocation3], 128  }
 0x8f2   :  { %5748 = vsyncadd [#allocation3], 4294967168 }
 0x8f3   :  { %5749 = dma.done.wait [#allocation5], 512  }
 0x8f4   :  { %5750 = vsyncadd [#allocation5], 4294966784 }
 0x8f5   :  { %4449 = vsyncpa [#allocation3], 1 }
 0x8f6   :  { %4450 = vsyncpa [#allocation5], 1 }

</bundles_post_ra>
